<compile_context>
chip_gen: v7x
topology: tpu7x:2x2x1
jax: 0.10.0
libtpu: 0.0.40
codegen_flags: <defaults>
</compile_context>

<pallas_src>
import functools

import jax
import jax.numpy as jnp
from jax.experimental import pallas as pl
from jax.experimental.pallas import tpu as pltpu

HID32 = 32            # hidden width of every meta-learner MLP (nn.Linear(dim_meta, 32))
GRP = 48              # per-learner group: [32 hidden | 1 constant-one (folded bias) | 15 zero]
                      # -> multiple of 16, aligned for both f32 and bf16 sublane packing.


def _round_up(v, m):
    return ((v + m - 1) // m) * m


# --------------------------------------------------------------------------- kernel
def gru_cell_kernel(xm_ref, x_ref, h_ref,
                    w1_ref, w2x_ref, w2h_ref, w2b_ref,
                    out_ref,
                    px_s, ph_s):
    f32 = jnp.float32
    wdt = w1_ref.dtype                      # weight / MXU-input dtype (bf16 or f32)
    C = x_ref.shape[0]
    H = out_ref.shape[0]

    xm = xm_ref[...]                        # [MP, T]  already in weight dtype (+ ones row)
    x_w = x_ref[...].astype(wdt)            # [C, T]
    h_f = h_ref[...].astype(f32)            # [H, T]   f32 copy kept for the final blend
    h_w = h_f.astype(wdt)

    # ---- meta-learner first layers: all 9 learners in one MXU matmul --------------------
    # Each learner's GRP-row group = [32 hidden | 1 constant one | 15 zeros]; relu(1)=1 and
    # relu(0)=0, so all second-layer biases fold into a weight column -> no bias broadcasts.
    hid = jnp.maximum(jnp.dot(w1_ref[...], xm, preferred_element_type=f32), 0.0)   # [9*GRP, T]
    hid_w = hid.astype(wdt)

    # ---- all three b-learner second layers, fused block-diagonally ----------------------
    b_all = jnp.dot(w2b_ref[...], hid_w[6 * GRP:, :], preferred_element_type=f32)  # [3*H, T]

    def fill_outer(scr, a_w, grp_idx, k_outer):
        # scr[k*GRP + m, t] = a_w[k, t] * hid_learner[m, t]  (per-row rank-1 outer product)
        hg = hid_w[grp_idx * GRP:(grp_idx + 1) * GRP, :]
        for k in range(k_outer):
            # [1,T] sublane-broadcast * [GRP,T]; stored to a 16/8-sublane-aligned slab.
            scr[k * GRP:(k + 1) * GRP, :] = a_w[k:k + 1, :] * hg

    def gate_pre(a_w, gate):
        # pre = x @ Wx_gate + a @ Wh_gate + b_gate, with Wx/Wh never materialized: the per-row
        # weights are contracted on the MXU (long axis K = (C|H)*GRP) against outer products
        #   P[k*GRP+m] = a[k] * hid[m]
        # using the shared second-layer weights reordered to [H, K*GRP] at pack time.
        fill_outer(px_s, x_w, gate, C)          # wx learner `gate`  -> [C*GRP, T]
        fill_outer(ph_s, a_w, 3 + gate, H)      # wh learner `gate`  -> [H*GRP, T]
        return (jnp.dot(w2x_ref[gate], px_s[...], preferred_element_type=f32)
                + jnp.dot(w2h_ref[gate], ph_s[...], preferred_element_type=f32)
                + b_all[gate * H:(gate + 1) * H, :])

    r = jax.nn.sigmoid(gate_pre(h_w, 0))
    z = jax.nn.sigmoid(gate_pre(h_w, 1))
    rh_w = (r * h_f).astype(wdt)                # c-gate uses (r*h) @ Wch, computed after r/z
    hc = jnp.tanh(gate_pre(rh_w, 2))

    out_ref[...] = ((1.0 - z) * h_f + z * hc).astype(out_ref.dtype)


# --------------------------------------------------------------------------- wrapper
@functools.partial(jax.jit, static_argnames=("dim_in", "dim_hidden", "dim_meta", "row_tile"))
def gru_cell_forward(x, state, x_meta, packed_params, *,
                     dim_in, dim_hidden, dim_meta, row_tile=512):
    if x.ndim == 4:                                   # [B, N, 1, C] -> [B, N, C]
        x = x[:, :, 0, :]
    B, N, C = x.shape
    assert C == dim_in
    H, M = dim_hidden, dim_meta
    BN = B * N

    w1_aug, w2x_g, w2h_g, w2b_bd = packed_params
    wdt = w1_aug.dtype
    MP = w1_aug.shape[1]
    assert MP == _round_up(M + 1, 16), "packed params / dim_meta mismatch"

    # Lane-dense row tile (multiple of 128).  Aim for >= 2 grid steps when the data allows so
    # dimension_semantics=("parallel",) can engage both TensorCores on v7x; cap at row_tile
    # (512 default: per-tile VMEM is only a few MB, safe on v5e/v6e 128 MiB and v7x 64 MiB).
    row_tile = max(128, _round_up(row_tile, 128))
    TILE = max(128, min(row_tile, _round_up((BN + 1) // 2, 128)))
    BNp = _round_up(BN, TILE)                         # pad -> no dropped trailing rows
    grid = (BNp // TILE,)

    def to_lanes(a2d, dtype):
        # TODO(synk): accept feature-major inputs upstream to avoid this HBM pad+transpose.
        a = jnp.pad(a2d.astype(dtype), ((0, BNp - BN), (0, 0)))
        return a.T

    x_t = to_lanes(x.reshape(BN, C), jnp.float32)              # [C, BNp]
    h_t = to_lanes(state.reshape(BN, H), jnp.float32)          # [H, BNp]
    xm_t = to_lanes(x_meta.reshape(BN, M), wdt)                # [M, BNp] in weight dtype
    # meta + constant-one row (folds the first-layer biases); padded feature rows stay zero.
    xm_aug = jnp.zeros((MP, BNp), wdt).at[:M].set(xm_t).at[M].set(1.0)

    out_t = pl.pallas_call(
        gru_cell_kernel,
        out_shape=jax.ShapeDtypeStruct((H, BNp), jnp.float32),
        grid_spec=pltpu.PrefetchScalarGridSpec(
            num_scalar_prefetch=0,
            grid=grid,
            in_specs=[
                pl.BlockSpec((MP, TILE), lambda i: (0, i)),        # x_meta^T (+ ones row)
                pl.BlockSpec((C, TILE), lambda i: (0, i)),         # x^T
                pl.BlockSpec((H, TILE), lambda i: (0, i)),         # h_prev^T
                # constant weights: constant index maps -> fetched once
                pl.BlockSpec(w1_aug.shape, lambda i: (0, 0)),      # fused 1st layer [9*GRP, MP]
                pl.BlockSpec(w2x_g.shape, lambda i: (0, 0, 0)),    # wx 2nd layers  [3, H, C*GRP]
                pl.BlockSpec(w2h_g.shape, lambda i: (0, 0, 0)),    # wh 2nd layers  [3, H, H*GRP]
                pl.BlockSpec(w2b_bd.shape, lambda i: (0, 0)),      # b 2nd layer (block-diag)
            ],
            out_specs=pl.BlockSpec((H, TILE), lambda i: (0, i)),
            scratch_shapes=[
                pltpu.VMEM((C * GRP, TILE), wdt),                  # x outer-product slab
                pltpu.VMEM((H * GRP, TILE), wdt),                  # h / (r*h) outer-product slab
            ]),
        compiler_params=pltpu.CompilerParams(
            dimension_semantics=("parallel",),                      # shard row blocks on v7x
        ),
    )(xm_aug, x_t, h_t, w1_aug, w2x_g, w2h_g, w2b_bd)

    # Padded columns (BN..BNp) contain finite garbage; they are dropped here and must never
    # be consumed from the raw kernel output.
    return out_t.T[:BN].reshape(B, N, 1, H)


# --------------------------------------------------------------------------- params
def init_linear(key, fan_in, fan_out):
    kw, kb = jax.random.split(key)
    bound = 1.0 / jnp.sqrt(fan_in)
    w = jax.random.uniform(kw, (fan_in, fan_out), jnp.float32, -bound, bound)
    b = jax.random.uniform(kb, (fan_out,), jnp.float32, -bound, bound)
    return w, b


def init_gru_params(key, dim_in, dim_hidden, dim_meta):
    """9 meta-learners: 3x learner_wx, 3x learner_wh, 3x learner_b."""
    keys = jax.random.split(key, 18)
    wx, wh, bb = [], [], []
    k = 0
    for _ in range(3):
        w1, b1 = init_linear(keys[k], dim_meta, HID32); k += 1
        w2, b2 = init_linear(keys[k], HID32, dim_in * dim_hidden); k += 1
        wx.append((w1, b1, w2, b2))
    for _ in range(3):
        w1, b1 = init_linear(keys[k], dim_meta, HID32); k += 1
        w2, b2 = init_linear(keys[k], HID32, dim_hidden * dim_hidden); k += 1
        wh.append((w1, b1, w2, b2))
    for _ in range(3):
        w1, b1 = init_linear(keys[k], dim_meta, HID32); k += 1
        w2, b2 = init_linear(keys[k], HID32, dim_hidden); k += 1
        bb.append((w1, b1, w2, b2))
    return wx, wh, bb


def pack_params(wx, wh, bb, *, weights_dtype=jnp.bfloat16):
    """Pack the 9 meta-learners into fused, reordered, bias-folded kernel weights.

    Learner order: [wx_r, wx_z, wx_c, wh_r, wh_z, wh_c, b_r, b_z, b_c].
    weights_dtype=jnp.bfloat16 (default) runs all kernel matmuls bf16xbf16 on the MXU with
    f32 accumulation; pass jnp.float32 for a full-precision (slower) path.
    """
    H = bb[0][2].shape[1]
    C = wx[0][2].shape[1] // H
    learners = list(wx) + list(wh) + list(bb)
    M = learners[0][0].shape[0]
    MP = _round_up(M + 1, 16)

    # Fused first layer [9*GRP, MP]: group g = [w1_g^T | b1_g], a constant-one row
    # (only the bias column is 1 -> relu(1) == 1, folds every second-layer bias), zero pad.
    w1_aug = jnp.zeros((9 * GRP, MP), jnp.float32)
    for g, (w1, b1, _, _) in enumerate(learners):
        r0 = g * GRP
        w1_aug = w1_aug.at[r0:r0 + HID32, :M].set(w1.T)
        w1_aug = w1_aug.at[r0:r0 + HID32, M].set(b1)
        w1_aug = w1_aug.at[r0 + HID32, M].set(1.0)

    def reorder_second(w2, b2, k_outer):
        # [H, k_outer*GRP]; out[j, k*GRP+m] = w2[m, k*H+j] (m<32), b2[k*H+j] (m==32), 0 (pad).
        # Matches the kernel's outer-product ordering P[k*GRP+m] = a[k]*hid[m].
        blk = jnp.zeros((H, k_outer, GRP), jnp.float32)
        blk = blk.at[:, :, :HID32].set(jnp.transpose(w2.reshape(HID32, k_outer, H), (2, 1, 0)))
        blk = blk.at[:, :, HID32].set(b2.reshape(k_outer, H).T)
        return blk.reshape(H, k_outer * GRP)

    w2x_g = jnp.stack([reorder_second(p[2], p[3], C) for p in wx])   # [3, H, C*GRP]
    w2h_g = jnp.stack([reorder_second(p[2], p[3], H) for p in wh])   # [3, H, H*GRP]

    def second_layer_t(w2, b2):
        out = w2.shape[1]
        m = jnp.zeros((out, GRP), jnp.float32)
        m = m.at[:, :HID32].set(w2.T)
        m = m.at[:, HID32].set(b2)
        return m

    def block_diag(mats):
        total = sum(m.shape[0] for m in mats)
        bd = jnp.zeros((total, len(mats) * GRP), jnp.float32)
        r0 = 0
        for g, m in enumerate(mats):
            bd = bd.at[r0:r0 + m.shape[0], g * GRP:(g + 1) * GRP].set(m)
            r0 += m.shape[0]
        return bd

    w2b_bd = block_diag([second_layer_t(p[2], p[3]) for p in bb])    # [3*H, 3*GRP]

    to = lambda a: a.astype(weights_dtype)
    return (to(w1_aug), to(w2x_g), to(w2h_g), to(w2b_bd))


# --------------------------------------------------------------------------- reference
def learner_apply(xm, w1, b1, w2, b2):
    return jax.nn.relu(xm @ w1 + b1) @ w2 + b2


def ref_forward(x, state, x_meta, wx, wh, bb, dim_in, dim_hidden):
    B, N, _ = x.shape
    x4 = x[:, :, None, :]                                  # [B, N, 1, C]
    h = state                                              # [B, N, 1, H]
    gates = []
    for g in range(3):
        Wx = learner_apply(x_meta, *wx[g]).reshape(B, N, dim_in, dim_hidden)
        Wh = learner_apply(x_meta, *wh[g]).reshape(B, N, dim_hidden, dim_hidden)
        bg = learner_apply(x_meta, *bb[g]).reshape(B, N, 1, dim_hidden)
        gates.append((Wx, Wh, bg))
    (Wrx, Wrh, br), (Wzx, Wzh, bz), (Wcx, Wch, bc) = gates
    mm = lambda a, b: jnp.einsum('bnik,bnkj->bnij', a, b)
    r = jax.nn.sigmoid(mm(x4, Wrx) + mm(h, Wrh) + br)
    z = jax.nn.sigmoid(mm(x4, Wzx) + mm(h, Wzh) + bz)
    hc = jnp.tanh(mm(x4, Wcx) + mm(r * h, Wch) + bc)
    return (1.0 - z) * h + z * hc


# --------------------------------------------------------------------------- main
if __name__ == "__main__":
    dim_in, dim_hidden, dim_meta = 4, 32, 8

    key = jax.random.PRNGKey(0)
    kp, kdata = jax.random.split(key)

    wx, wh, bb = init_gru_params(kp, dim_in, dim_hidden, dim_meta)
    packed_f32 = pack_params(wx, wh, bb, weights_dtype=jnp.float32)    # exactness check
    packed_bf16 = pack_params(wx, wh, bb, weights_dtype=jnp.bfloat16)  # perf configuration

    # Case 0: tiny (single row tile).  Case 1: multiple row tiles + tail padding.
    for case, (B, N) in enumerate([(2, 4), (3, 150)]):
        kx, kh, km = jax.random.split(jax.random.fold_in(kdata, case), 3)
        x = jax.random.normal(kx, (B, N, dim_in), jnp.float32)
        state = jax.random.normal(kh, (B, N, 1, dim_hidden), jnp.float32)
        x_meta = jax.random.normal(km, (B, N, dim_meta), jnp.float32)

        h_ref = jax.block_until_ready(
            ref_forward(x, state, x_meta, wx, wh, bb, dim_in, dim_hidden))

        # f32-weight path: must match the f32 reference tightly (proves kernel math).
        h_f32 = jax.block_until_ready(
            gru_cell_forward(x, state, x_meta, packed_f32,
                             dim_in=dim_in, dim_hidden=dim_hidden, dim_meta=dim_meta))
        assert h_f32.shape == (B, N, 1, dim_hidden)
        err_f32 = float(jnp.max(jnp.abs(h_f32 - h_ref)))
        assert jnp.allclose(h_f32, h_ref, rtol=2e-3, atol=2e-3), (
            f"case {case} (f32 weights): max abs diff = {err_f32}")

        # bf16-weight path (the performance configuration): small, bounded drift from
        # bf16 weight generation / activations; accumulation stays f32.
        h_bf16 = jax.block_until_ready(
            gru_cell_forward(x, state, x_meta, packed_bf16,
                             dim_in=dim_in, dim_hidden=dim_hidden, dim_meta=dim_meta))
        assert h_bf16.shape == (B, N, 1, dim_hidden)
        err_bf16 = float(jnp.max(jnp.abs(h_bf16 - h_ref)))
        assert jnp.allclose(h_bf16, h_ref, rtol=1e-1, atol=1.2e-1), (
            f"case {case} (bf16 weights): max abs diff = {err_bf16}")

    print("KERNEL_OK")
</pallas_src>

<mosaic_0001>
module attributes {stable_mosaic.version = 11 : i64} {
  func.func @gru_cell_kernel(%arg0: i32, %arg1: memref<16x128xf32, #tpu.memory_space<vmem>>, %arg2: memref<4x128xf32, #tpu.memory_space<vmem>>, %arg3: memref<32x128xf32, #tpu.memory_space<vmem>>, %arg4: memref<432x16xf32, #tpu.memory_space<vmem>>, %arg5: memref<3x32x192xf32, #tpu.memory_space<vmem>>, %arg6: memref<3x32x1536xf32, #tpu.memory_space<vmem>>, %arg7: memref<96x144xf32, #tpu.memory_space<vmem>>, %arg8: memref<32x128xf32, #tpu.memory_space<vmem>>, %arg9: memref<192x128xf32, #tpu.memory_space<vmem>>, %arg10: memref<1536x128xf32, #tpu.memory_space<vmem>>) attributes {dimension_semantics = [#tpu.dimension_semantics<parallel>], iteration_bounds = array<i64: 1>, scalar_prefetch = 0 : i64, scratch_operands = 2 : i64, tpu.core_type = #tpu.core_type<tc>, window_params = [{transform_indices = @transform_0, window_bounds = array<i64: 16, 128>}, {transform_indices = @transform_1, window_bounds = array<i64: 4, 128>}, {transform_indices = @transform_2, window_bounds = array<i64: 32, 128>}, {pipeline_mode = #tpu.pipeline_mode<synchronous>, transform_indices = @transform_3, window_bounds = array<i64: 432, 16>}, {pipeline_mode = #tpu.pipeline_mode<synchronous>, transform_indices = @transform_4, window_bounds = array<i64: 3, 32, 192>}, {pipeline_mode = #tpu.pipeline_mode<synchronous>, transform_indices = @transform_5, window_bounds = array<i64: 3, 32, 1536>}, {pipeline_mode = #tpu.pipeline_mode<synchronous>, transform_indices = @transform_6, window_bounds = array<i64: 96, 144>}, {transform_indices = @transform_7, window_bounds = array<i64: 32, 128>}]} {
    %c0 = arith.constant 0 : index
    %c0_0 = arith.constant 0 : index
    %0 = vector.load %arg1[%c0, %c0_0] : memref<16x128xf32, #tpu.memory_space<vmem>>, vector<16x128xf32>
    %c0_1 = arith.constant 0 : index
    %c0_2 = arith.constant 0 : index
    %1 = vector.load %arg2[%c0_1, %c0_2] : memref<4x128xf32, #tpu.memory_space<vmem>>, vector<4x128xf32>
    %c0_3 = arith.constant 0 : index
    %c0_4 = arith.constant 0 : index
    %2 = vector.load %arg3[%c0_3, %c0_4] : memref<32x128xf32, #tpu.memory_space<vmem>>, vector<32x128xf32>
    %c0_5 = arith.constant 0 : index
    %c0_6 = arith.constant 0 : index
    %3 = vector.load %arg4[%c0_5, %c0_6] : memref<432x16xf32, #tpu.memory_space<vmem>>, vector<432x16xf32>
    %cst = arith.constant dense<0.000000e+00> : vector<432x128xf32>
    %4 = tpu.matmul %3, %0, %cst {dimension_numbers = #tpu.dot_dimension_numbers<[1], [0], [0], [1], [0, 0, 1, 1], [], []>} : vector<432x16xf32>, vector<16x128xf32>, vector<432x128xf32> -> vector<432x128xf32>
    %cst_7 = arith.constant 0.000000e+00 : f32
    %5 = vector.broadcast %cst_7 : f32 to vector<432x128xf32>
    %6 = arith.maximumf %4, %5 : vector<432x128xf32>
    %c0_8 = arith.constant 0 : index
    %c0_9 = arith.constant 0 : index
    %7 = vector.load %arg7[%c0_8, %c0_9] : memref<96x144xf32, #tpu.memory_space<vmem>>, vector<96x144xf32>
    %8 = vector.extract_strided_slice %6 {offsets = [288, 0], sizes = [144, 128], strides = [1, 1]} : vector<432x128xf32> to vector<144x128xf32>
    %cst_10 = arith.constant dense<0.000000e+00> : vector<96x128xf32>
    %9 = tpu.matmul %7, %8, %cst_10 {dimension_numbers = #tpu.dot_dimension_numbers<[1], [0], [0], [1], [0, 0, 1, 1], [], []>} : vector<96x144xf32>, vector<144x128xf32>, vector<96x128xf32> -> vector<96x128xf32>
    %10 = vector.extract_strided_slice %6 {offsets = [0, 0], sizes = [48, 128], strides = [1, 1]} : vector<432x128xf32> to vector<48x128xf32>
    %11 = vector.extract_strided_slice %1 {offsets = [0, 0], sizes = [1, 128], strides = [1, 1]} : vector<4x128xf32> to vector<1x128xf32>
    %12 = vector.broadcast %11 : vector<1x128xf32> to vector<48x128xf32>
    %13 = arith.mulf %12, %10 : vector<48x128xf32>
    %c0_11 = arith.constant 0 : index
    %c0_12 = arith.constant 0 : index
    %14 = vector.load %arg9[%c0_11, %c0_12] : memref<192x128xf32, #tpu.memory_space<vmem>>, vector<48x128xf32>
    tpu.vector_store %arg9[%c0_11, %c0_12], %13 {strides = array<i32>} : memref<192x128xf32, #tpu.memory_space<vmem>>, vector<48x128xf32>,
    %15 = vector.extract_strided_slice %1 {offsets = [1, 0], sizes = [1, 128], strides = [1, 1]} : vector<4x128xf32> to vector<1x128xf32>
    %16 = vector.broadcast %15 : vector<1x128xf32> to vector<48x128xf32>
    %17 = arith.mulf %16, %10 : vector<48x128xf32>
    %c48 = arith.constant 48 : index
    %c0_13 = arith.constant 0 : index
    %18 = vector.load %arg9[%c48, %c0_13] : memref<192x128xf32, #tpu.memory_space<vmem>>, vector<48x128xf32>
    tpu.vector_store %arg9[%c48, %c0_13], %17 {strides = array<i32>} : memref<192x128xf32, #tpu.memory_space<vmem>>, vector<48x128xf32>,
    %19 = vector.extract_strided_slice %1 {offsets = [2, 0], sizes = [1, 128], strides = [1, 1]} : vector<4x128xf32> to vector<1x128xf32>
    %20 = vector.broadcast %19 : vector<1x128xf32> to vector<48x128xf32>
    %21 = arith.mulf %20, %10 : vector<48x128xf32>
    %c96 = arith.constant 96 : index
    %c0_14 = arith.constant 0 : index
    %22 = vector.load %arg9[%c96, %c0_14] : memref<192x128xf32, #tpu.memory_space<vmem>>, vector<48x128xf32>
    tpu.vector_store %arg9[%c96, %c0_14], %21 {strides = array<i32>} : memref<192x128xf32, #tpu.memory_space<vmem>>, vector<48x128xf32>,
    %23 = vector.extract_strided_slice %1 {offsets = [3, 0], sizes = [1, 128], strides = [1, 1]} : vector<4x128xf32> to vector<1x128xf32>
    %24 = vector.broadcast %23 : vector<1x128xf32> to vector<48x128xf32>
    %25 = arith.mulf %24, %10 : vector<48x128xf32>
    %c144 = arith.constant 144 : index
    %c0_15 = arith.constant 0 : index
    %26 = vector.load %arg9[%c144, %c0_15] : memref<192x128xf32, #tpu.memory_space<vmem>>, vector<48x128xf32>
    tpu.vector_store %arg9[%c144, %c0_15], %25 {strides = array<i32>} : memref<192x128xf32, #tpu.memory_space<vmem>>, vector<48x128xf32>,
    %27 = vector.extract_strided_slice %6 {offsets = [144, 0], sizes = [48, 128], strides = [1, 1]} : vector<432x128xf32> to vector<48x128xf32>
    %28 = vector.extract_strided_slice %2 {offsets = [0, 0], sizes = [1, 128], strides = [1, 1]} : vector<32x128xf32> to vector<1x128xf32>
    %29 = vector.broadcast %28 : vector<1x128xf32> to vector<48x128xf32>
    %30 = arith.mulf %29, %27 : vector<48x128xf32>
    %c0_16 = arith.constant 0 : index
    %c0_17 = arith.constant 0 : index
    %31 = vector.load %arg10[%c0_16, %c0_17] : memref<1536x128xf32, #tpu.memory_space<vmem>>, vector<48x128xf32>
    tpu.vector_store %arg10[%c0_16, %c0_17], %30 {strides = array<i32>} : memref<1536x128xf32, #tpu.memory_space<vmem>>, vector<48x128xf32>,
    %32 = vector.extract_strided_slice %2 {offsets = [1, 0], sizes = [1, 128], strides = [1, 1]} : vector<32x128xf32> to vector<1x128xf32>
    %33 = vector.broadcast %32 : vector<1x128xf32> to vector<48x128xf32>
    %34 = arith.mulf %33, %27 : vector<48x128xf32>
    %c48_18 = arith.constant 48 : index
    %c0_19 = arith.constant 0 : index
    %35 = vector.load %arg10[%c48_18, %c0_19] : memref<1536x128xf32, #tpu.memory_space<vmem>>, vector<48x128xf32>
    tpu.vector_store %arg10[%c48_18, %c0_19], %34 {strides = array<i32>} : memref<1536x128xf32, #tpu.memory_space<vmem>>, vector<48x128xf32>,
    %36 = vector.extract_strided_slice %2 {offsets = [2, 0], sizes = [1, 128], strides = [1, 1]} : vector<32x128xf32> to vector<1x128xf32>
    %37 = vector.broadcast %36 : vector<1x128xf32> to vector<48x128xf32>
    %38 = arith.mulf %37, %27 : vector<48x128xf32>
    %c96_20 = arith.constant 96 : index
    %c0_21 = arith.constant 0 : index
    %39 = vector.load %arg10[%c96_20, %c0_21] : memref<1536x128xf32, #tpu.memory_space<vmem>>, vector<48x128xf32>
    tpu.vector_store %arg10[%c96_20, %c0_21], %38 {strides = array<i32>} : memref<1536x128xf32, #tpu.memory_space<vmem>>, vector<48x128xf32>,
    %40 = vector.extract_strided_slice %2 {offsets = [3, 0], sizes = [1, 128], strides = [1, 1]} : vector<32x128xf32> to vector<1x128xf32>
    %41 = vector.broadcast %40 : vector<1x128xf32> to vector<48x128xf32>
    %42 = arith.mulf %41, %27 : vector<48x128xf32>
    %c144_22 = arith.constant 144 : index
    %c0_23 = arith.constant 0 : index
    %43 = vector.load %arg10[%c144_22, %c0_23] : memref<1536x128xf32, #tpu.memory_space<vmem>>, vector<48x128xf32>
    tpu.vector_store %arg10[%c144_22, %c0_23], %42 {strides = array<i32>} : memref<1536x128xf32, #tpu.memory_space<vmem>>, vector<48x128xf32>,
    %44 = vector.extract_strided_slice %2 {offsets = [4, 0], sizes = [1, 128], strides = [1, 1]} : vector<32x128xf32> to vector<1x128xf32>
    %45 = vector.broadcast %44 : vector<1x128xf32> to vector<48x128xf32>
    %46 = arith.mulf %45, %27 : vector<48x128xf32>
    %c192 = arith.constant 192 : index
    %c0_24 = arith.constant 0 : index
    %47 = vector.load %arg10[%c192, %c0_24] : memref<1536x128xf32, #tpu.memory_space<vmem>>, vector<48x128xf32>
    tpu.vector_store %arg10[%c192, %c0_24], %46 {strides = array<i32>} : memref<1536x128xf32, #tpu.memory_space<vmem>>, vector<48x128xf32>,
    %48 = vector.extract_strided_slice %2 {offsets = [5, 0], sizes = [1, 128], strides = [1, 1]} : vector<32x128xf32> to vector<1x128xf32>
    %49 = vector.broadcast %48 : vector<1x128xf32> to vector<48x128xf32>
    %50 = arith.mulf %49, %27 : vector<48x128xf32>
    %c240 = arith.constant 240 : index
    %c0_25 = arith.constant 0 : index
    %51 = vector.load %arg10[%c240, %c0_25] : memref<1536x128xf32, #tpu.memory_space<vmem>>, vector<48x128xf32>
    tpu.vector_store %arg10[%c240, %c0_25], %50 {strides = array<i32>} : memref<1536x128xf32, #tpu.memory_space<vmem>>, vector<48x128xf32>,
    %52 = vector.extract_strided_slice %2 {offsets = [6, 0], sizes = [1, 128], strides = [1, 1]} : vector<32x128xf32> to vector<1x128xf32>
    %53 = vector.broadcast %52 : vector<1x128xf32> to vector<48x128xf32>
    %54 = arith.mulf %53, %27 : vector<48x128xf32>
    %c288 = arith.constant 288 : index
    %c0_26 = arith.constant 0 : index
    %55 = vector.load %arg10[%c288, %c0_26] : memref<1536x128xf32, #tpu.memory_space<vmem>>, vector<48x128xf32>
    tpu.vector_store %arg10[%c288, %c0_26], %54 {strides = array<i32>} : memref<1536x128xf32, #tpu.memory_space<vmem>>, vector<48x128xf32>,
    %56 = vector.extract_strided_slice %2 {offsets = [7, 0], sizes = [1, 128], strides = [1, 1]} : vector<32x128xf32> to vector<1x128xf32>
    %57 = vector.broadcast %56 : vector<1x128xf32> to vector<48x128xf32>
    %58 = arith.mulf %57, %27 : vector<48x128xf32>
    %c336 = arith.constant 336 : index
    %c0_27 = arith.constant 0 : index
    %59 = vector.load %arg10[%c336, %c0_27] : memref<1536x128xf32, #tpu.memory_space<vmem>>, vector<48x128xf32>
    tpu.vector_store %arg10[%c336, %c0_27], %58 {strides = array<i32>} : memref<1536x128xf32, #tpu.memory_space<vmem>>, vector<48x128xf32>,
    %60 = vector.extract_strided_slice %2 {offsets = [8, 0], sizes = [1, 128], strides = [1, 1]} : vector<32x128xf32> to vector<1x128xf32>
    %61 = vector.broadcast %60 : vector<1x128xf32> to vector<48x128xf32>
    %62 = arith.mulf %61, %27 : vector<48x128xf32>
    %c384 = arith.constant 384 : index
    %c0_28 = arith.constant 0 : index
    %63 = vector.load %arg10[%c384, %c0_28] : memref<1536x128xf32, #tpu.memory_space<vmem>>, vector<48x128xf32>
    tpu.vector_store %arg10[%c384, %c0_28], %62 {strides = array<i32>} : memref<1536x128xf32, #tpu.memory_space<vmem>>, vector<48x128xf32>,
    %64 = vector.extract_strided_slice %2 {offsets = [9, 0], sizes = [1, 128], strides = [1, 1]} : vector<32x128xf32> to vector<1x128xf32>
    %65 = vector.broadcast %64 : vector<1x128xf32> to vector<48x128xf32>
    %66 = arith.mulf %65, %27 : vector<48x128xf32>
    %c432 = arith.constant 432 : index
    %c0_29 = arith.constant 0 : index
    %67 = vector.load %arg10[%c432, %c0_29] : memref<1536x128xf32, #tpu.memory_space<vmem>>, vector<48x128xf32>
    tpu.vector_store %arg10[%c432, %c0_29], %66 {strides = array<i32>} : memref<1536x128xf32, #tpu.memory_space<vmem>>, vector<48x128xf32>,
    %68 = vector.extract_strided_slice %2 {offsets = [10, 0], sizes = [1, 128], strides = [1, 1]} : vector<32x128xf32> to vector<1x128xf32>
    %69 = vector.broadcast %68 : vector<1x128xf32> to vector<48x128xf32>
    %70 = arith.mulf %69, %27 : vector<48x128xf32>
    %c480 = arith.constant 480 : index
    %c0_30 = arith.constant 0 : index
    %71 = vector.load %arg10[%c480, %c0_30] : memref<1536x128xf32, #tpu.memory_space<vmem>>, vector<48x128xf32>
    tpu.vector_store %arg10[%c480, %c0_30], %70 {strides = array<i32>} : memref<1536x128xf32, #tpu.memory_space<vmem>>, vector<48x128xf32>,
    %72 = vector.extract_strided_slice %2 {offsets = [11, 0], sizes = [1, 128], strides = [1, 1]} : vector<32x128xf32> to vector<1x128xf32>
    %73 = vector.broadcast %72 : vector<1x128xf32> to vector<48x128xf32>
    %74 = arith.mulf %73, %27 : vector<48x128xf32>
    %c528 = arith.constant 528 : index
    %c0_31 = arith.constant 0 : index
    %75 = vector.load %arg10[%c528, %c0_31] : memref<1536x128xf32, #tpu.memory_space<vmem>>, vector<48x128xf32>
    tpu.vector_store %arg10[%c528, %c0_31], %74 {strides = array<i32>} : memref<1536x128xf32, #tpu.memory_space<vmem>>, vector<48x128xf32>,
    %76 = vector.extract_strided_slice %2 {offsets = [12, 0], sizes = [1, 128], strides = [1, 1]} : vector<32x128xf32> to vector<1x128xf32>
    %77 = vector.broadcast %76 : vector<1x128xf32> to vector<48x128xf32>
    %78 = arith.mulf %77, %27 : vector<48x128xf32>
    %c576 = arith.constant 576 : index
    %c0_32 = arith.constant 0 : index
    %79 = vector.load %arg10[%c576, %c0_32] : memref<1536x128xf32, #tpu.memory_space<vmem>>, vector<48x128xf32>
    tpu.vector_store %arg10[%c576, %c0_32], %78 {strides = array<i32>} : memref<1536x128xf32, #tpu.memory_space<vmem>>, vector<48x128xf32>,
    %80 = vector.extract_strided_slice %2 {offsets = [13, 0], sizes = [1, 128], strides = [1, 1]} : vector<32x128xf32> to vector<1x128xf32>
    %81 = vector.broadcast %80 : vector<1x128xf32> to vector<48x128xf32>
    %82 = arith.mulf %81, %27 : vector<48x128xf32>
    %c624 = arith.constant 624 : index
    %c0_33 = arith.constant 0 : index
    %83 = vector.load %arg10[%c624, %c0_33] : memref<1536x128xf32, #tpu.memory_space<vmem>>, vector<48x128xf32>
    tpu.vector_store %arg10[%c624, %c0_33], %82 {strides = array<i32>} : memref<1536x128xf32, #tpu.memory_space<vmem>>, vector<48x128xf32>,
    %84 = vector.extract_strided_slice %2 {offsets = [14, 0], sizes = [1, 128], strides = [1, 1]} : vector<32x128xf32> to vector<1x128xf32>
    %85 = vector.broadcast %84 : vector<1x128xf32> to vector<48x128xf32>
    %86 = arith.mulf %85, %27 : vector<48x128xf32>
    %c672 = arith.constant 672 : index
    %c0_34 = arith.constant 0 : index
    %87 = vector.load %arg10[%c672, %c0_34] : memref<1536x128xf32, #tpu.memory_space<vmem>>, vector<48x128xf32>
    tpu.vector_store %arg10[%c672, %c0_34], %86 {strides = array<i32>} : memref<1536x128xf32, #tpu.memory_space<vmem>>, vector<48x128xf32>,
    %88 = vector.extract_strided_slice %2 {offsets = [15, 0], sizes = [1, 128], strides = [1, 1]} : vector<32x128xf32> to vector<1x128xf32>
    %89 = vector.broadcast %88 : vector<1x128xf32> to vector<48x128xf32>
    %90 = arith.mulf %89, %27 : vector<48x128xf32>
    %c720 = arith.constant 720 : index
    %c0_35 = arith.constant 0 : index
    %91 = vector.load %arg10[%c720, %c0_35] : memref<1536x128xf32, #tpu.memory_space<vmem>>, vector<48x128xf32>
    tpu.vector_store %arg10[%c720, %c0_35], %90 {strides = array<i32>} : memref<1536x128xf32, #tpu.memory_space<vmem>>, vector<48x128xf32>,
    %92 = vector.extract_strided_slice %2 {offsets = [16, 0], sizes = [1, 128], strides = [1, 1]} : vector<32x128xf32> to vector<1x128xf32>
    %93 = vector.broadcast %92 : vector<1x128xf32> to vector<48x128xf32>
    %94 = arith.mulf %93, %27 : vector<48x128xf32>
    %c768 = arith.constant 768 : index
    %c0_36 = arith.constant 0 : index
    %95 = vector.load %arg10[%c768, %c0_36] : memref<1536x128xf32, #tpu.memory_space<vmem>>, vector<48x128xf32>
    tpu.vector_store %arg10[%c768, %c0_36], %94 {strides = array<i32>} : memref<1536x128xf32, #tpu.memory_space<vmem>>, vector<48x128xf32>,
    %96 = vector.extract_strided_slice %2 {offsets = [17, 0], sizes = [1, 128], strides = [1, 1]} : vector<32x128xf32> to vector<1x128xf32>
    %97 = vector.broadcast %96 : vector<1x128xf32> to vector<48x128xf32>
    %98 = arith.mulf %97, %27 : vector<48x128xf32>
    %c816 = arith.constant 816 : index
    %c0_37 = arith.constant 0 : index
    %99 = vector.load %arg10[%c816, %c0_37] : memref<1536x128xf32, #tpu.memory_space<vmem>>, vector<48x128xf32>
    tpu.vector_store %arg10[%c816, %c0_37], %98 {strides = array<i32>} : memref<1536x128xf32, #tpu.memory_space<vmem>>, vector<48x128xf32>,
    %100 = vector.extract_strided_slice %2 {offsets = [18, 0], sizes = [1, 128], strides = [1, 1]} : vector<32x128xf32> to vector<1x128xf32>
    %101 = vector.broadcast %100 : vector<1x128xf32> to vector<48x128xf32>
    %102 = arith.mulf %101, %27 : vector<48x128xf32>
    %c864 = arith.constant 864 : index
    %c0_38 = arith.constant 0 : index
    %103 = vector.load %arg10[%c864, %c0_38] : memref<1536x128xf32, #tpu.memory_space<vmem>>, vector<48x128xf32>
    tpu.vector_store %arg10[%c864, %c0_38], %102 {strides = array<i32>} : memref<1536x128xf32, #tpu.memory_space<vmem>>, vector<48x128xf32>,
    %104 = vector.extract_strided_slice %2 {offsets = [19, 0], sizes = [1, 128], strides = [1, 1]} : vector<32x128xf32> to vector<1x128xf32>
    %105 = vector.broadcast %104 : vector<1x128xf32> to vector<48x128xf32>
    %106 = arith.mulf %105, %27 : vector<48x128xf32>
    %c912 = arith.constant 912 : index
    %c0_39 = arith.constant 0 : index
    %107 = vector.load %arg10[%c912, %c0_39] : memref<1536x128xf32, #tpu.memory_space<vmem>>, vector<48x128xf32>
    tpu.vector_store %arg10[%c912, %c0_39], %106 {strides = array<i32>} : memref<1536x128xf32, #tpu.memory_space<vmem>>, vector<48x128xf32>,
    %108 = vector.extract_strided_slice %2 {offsets = [20, 0], sizes = [1, 128], strides = [1, 1]} : vector<32x128xf32> to vector<1x128xf32>
    %109 = vector.broadcast %108 : vector<1x128xf32> to vector<48x128xf32>
    %110 = arith.mulf %109, %27 : vector<48x128xf32>
    %c960 = arith.constant 960 : index
    %c0_40 = arith.constant 0 : index
    %111 = vector.load %arg10[%c960, %c0_40] : memref<1536x128xf32, #tpu.memory_space<vmem>>, vector<48x128xf32>
    tpu.vector_store %arg10[%c960, %c0_40], %110 {strides = array<i32>} : memref<1536x128xf32, #tpu.memory_space<vmem>>, vector<48x128xf32>,
    %112 = vector.extract_strided_slice %2 {offsets = [21, 0], sizes = [1, 128], strides = [1, 1]} : vector<32x128xf32> to vector<1x128xf32>
    %113 = vector.broadcast %112 : vector<1x128xf32> to vector<48x128xf32>
    %114 = arith.mulf %113, %27 : vector<48x128xf32>
    %c1008 = arith.constant 1008 : index
    %c0_41 = arith.constant 0 : index
    %115 = vector.load %arg10[%c1008, %c0_41] : memref<1536x128xf32, #tpu.memory_space<vmem>>, vector<48x128xf32>
    tpu.vector_store %arg10[%c1008, %c0_41], %114 {strides = array<i32>} : memref<1536x128xf32, #tpu.memory_space<vmem>>, vector<48x128xf32>,
    %116 = vector.extract_strided_slice %2 {offsets = [22, 0], sizes = [1, 128], strides = [1, 1]} : vector<32x128xf32> to vector<1x128xf32>
    %117 = vector.broadcast %116 : vector<1x128xf32> to vector<48x128xf32>
    %118 = arith.mulf %117, %27 : vector<48x128xf32>
    %c1056 = arith.constant 1056 : index
    %c0_42 = arith.constant 0 : index
    %119 = vector.load %arg10[%c1056, %c0_42] : memref<1536x128xf32, #tpu.memory_space<vmem>>, vector<48x128xf32>
    tpu.vector_store %arg10[%c1056, %c0_42], %118 {strides = array<i32>} : memref<1536x128xf32, #tpu.memory_space<vmem>>, vector<48x128xf32>,
    %120 = vector.extract_strided_slice %2 {offsets = [23, 0], sizes = [1, 128], strides = [1, 1]} : vector<32x128xf32> to vector<1x128xf32>
    %121 = vector.broadcast %120 : vector<1x128xf32> to vector<48x128xf32>
    %122 = arith.mulf %121, %27 : vector<48x128xf32>
    %c1104 = arith.constant 1104 : index
    %c0_43 = arith.constant 0 : index
    %123 = vector.load %arg10[%c1104, %c0_43] : memref<1536x128xf32, #tpu.memory_space<vmem>>, vector<48x128xf32>
    tpu.vector_store %arg10[%c1104, %c0_43], %122 {strides = array<i32>} : memref<1536x128xf32, #tpu.memory_space<vmem>>, vector<48x128xf32>,
    %124 = vector.extract_strided_slice %2 {offsets = [24, 0], sizes = [1, 128], strides = [1, 1]} : vector<32x128xf32> to vector<1x128xf32>
    %125 = vector.broadcast %124 : vector<1x128xf32> to vector<48x128xf32>
    %126 = arith.mulf %125, %27 : vector<48x128xf32>
    %c1152 = arith.constant 1152 : index
    %c0_44 = arith.constant 0 : index
    %127 = vector.load %arg10[%c1152, %c0_44] : memref<1536x128xf32, #tpu.memory_space<vmem>>, vector<48x128xf32>
    tpu.vector_store %arg10[%c1152, %c0_44], %126 {strides = array<i32>} : memref<1536x128xf32, #tpu.memory_space<vmem>>, vector<48x128xf32>,
    %128 = vector.extract_strided_slice %2 {offsets = [25, 0], sizes = [1, 128], strides = [1, 1]} : vector<32x128xf32> to vector<1x128xf32>
    %129 = vector.broadcast %128 : vector<1x128xf32> to vector<48x128xf32>
    %130 = arith.mulf %129, %27 : vector<48x128xf32>
    %c1200 = arith.constant 1200 : index
    %c0_45 = arith.constant 0 : index
    %131 = vector.load %arg10[%c1200, %c0_45] : memref<1536x128xf32, #tpu.memory_space<vmem>>, vector<48x128xf32>
    tpu.vector_store %arg10[%c1200, %c0_45], %130 {strides = array<i32>} : memref<1536x128xf32, #tpu.memory_space<vmem>>, vector<48x128xf32>,
    %132 = vector.extract_strided_slice %2 {offsets = [26, 0], sizes = [1, 128], strides = [1, 1]} : vector<32x128xf32> to vector<1x128xf32>
    %133 = vector.broadcast %132 : vector<1x128xf32> to vector<48x128xf32>
    %134 = arith.mulf %133, %27 : vector<48x128xf32>
    %c1248 = arith.constant 1248 : index
    %c0_46 = arith.constant 0 : index
    %135 = vector.load %arg10[%c1248, %c0_46] : memref<1536x128xf32, #tpu.memory_space<vmem>>, vector<48x128xf32>
    tpu.vector_store %arg10[%c1248, %c0_46], %134 {strides = array<i32>} : memref<1536x128xf32, #tpu.memory_space<vmem>>, vector<48x128xf32>,
    %136 = vector.extract_strided_slice %2 {offsets = [27, 0], sizes = [1, 128], strides = [1, 1]} : vector<32x128xf32> to vector<1x128xf32>
    %137 = vector.broadcast %136 : vector<1x128xf32> to vector<48x128xf32>
    %138 = arith.mulf %137, %27 : vector<48x128xf32>
    %c1296 = arith.constant 1296 : index
    %c0_47 = arith.constant 0 : index
    %139 = vector.load %arg10[%c1296, %c0_47] : memref<1536x128xf32, #tpu.memory_space<vmem>>, vector<48x128xf32>
    tpu.vector_store %arg10[%c1296, %c0_47], %138 {strides = array<i32>} : memref<1536x128xf32, #tpu.memory_space<vmem>>, vector<48x128xf32>,
    %140 = vector.extract_strided_slice %2 {offsets = [28, 0], sizes = [1, 128], strides = [1, 1]} : vector<32x128xf32> to vector<1x128xf32>
    %141 = vector.broadcast %140 : vector<1x128xf32> to vector<48x128xf32>
    %142 = arith.mulf %141, %27 : vector<48x128xf32>
    %c1344 = arith.constant 1344 : index
    %c0_48 = arith.constant 0 : index
    %143 = vector.load %arg10[%c1344, %c0_48] : memref<1536x128xf32, #tpu.memory_space<vmem>>, vector<48x128xf32>
    tpu.vector_store %arg10[%c1344, %c0_48], %142 {strides = array<i32>} : memref<1536x128xf32, #tpu.memory_space<vmem>>, vector<48x128xf32>,
    %144 = vector.extract_strided_slice %2 {offsets = [29, 0], sizes = [1, 128], strides = [1, 1]} : vector<32x128xf32> to vector<1x128xf32>
    %145 = vector.broadcast %144 : vector<1x128xf32> to vector<48x128xf32>
    %146 = arith.mulf %145, %27 : vector<48x128xf32>
    %c1392 = arith.constant 1392 : index
    %c0_49 = arith.constant 0 : index
    %147 = vector.load %arg10[%c1392, %c0_49] : memref<1536x128xf32, #tpu.memory_space<vmem>>, vector<48x128xf32>
    tpu.vector_store %arg10[%c1392, %c0_49], %146 {strides = array<i32>} : memref<1536x128xf32, #tpu.memory_space<vmem>>, vector<48x128xf32>,
    %148 = vector.extract_strided_slice %2 {offsets = [30, 0], sizes = [1, 128], strides = [1, 1]} : vector<32x128xf32> to vector<1x128xf32>
    %149 = vector.broadcast %148 : vector<1x128xf32> to vector<48x128xf32>
    %150 = arith.mulf %149, %27 : vector<48x128xf32>
    %c1440 = arith.constant 1440 : index
    %c0_50 = arith.constant 0 : index
    %151 = vector.load %arg10[%c1440, %c0_50] : memref<1536x128xf32, #tpu.memory_space<vmem>>, vector<48x128xf32>
    tpu.vector_store %arg10[%c1440, %c0_50], %150 {strides = array<i32>} : memref<1536x128xf32, #tpu.memory_space<vmem>>, vector<48x128xf32>,
    %152 = vector.extract_strided_slice %2 {offsets = [31, 0], sizes = [1, 128], strides = [1, 1]} : vector<32x128xf32> to vector<1x128xf32>
    %153 = vector.broadcast %152 : vector<1x128xf32> to vector<48x128xf32>
    %154 = arith.mulf %153, %27 : vector<48x128xf32>
    %c1488 = arith.constant 1488 : index
    %c0_51 = arith.constant 0 : index
    %155 = vector.load %arg10[%c1488, %c0_51] : memref<1536x128xf32, #tpu.memory_space<vmem>>, vector<48x128xf32>
    tpu.vector_store %arg10[%c1488, %c0_51], %154 {strides = array<i32>} : memref<1536x128xf32, #tpu.memory_space<vmem>>, vector<48x128xf32>,
    %c0_52 = arith.constant 0 : index
    %c0_53 = arith.constant 0 : index
    %c0_54 = arith.constant 0 : index
    %156 = vector.load %arg5[%c0_52, %c0_53, %c0_54] : memref<3x32x192xf32, #tpu.memory_space<vmem>>, vector<1x32x192xf32>
    %157 = vector.shape_cast %156 : vector<1x32x192xf32> to vector<32x192xf32>
    %c0_55 = arith.constant 0 : index
    %c0_56 = arith.constant 0 : index
    %158 = vector.load %arg9[%c0_55, %c0_56] : memref<192x128xf32, #tpu.memory_space<vmem>>, vector<192x128xf32>
    %cst_57 = arith.constant dense<0.000000e+00> : vector<32x128xf32>
    %159 = tpu.matmul %157, %158, %cst_57 {dimension_numbers = #tpu.dot_dimension_numbers<[1], [0], [0], [1], [0, 0, 1, 1], [], []>} : vector<32x192xf32>, vector<192x128xf32>, vector<32x128xf32> -> vector<32x128xf32>
    %c0_58 = arith.constant 0 : index
    %c0_59 = arith.constant 0 : index
    %c0_60 = arith.constant 0 : index
    %160 = vector.load %arg6[%c0_58, %c0_59, %c0_60] : memref<3x32x1536xf32, #tpu.memory_space<vmem>>, vector<1x32x1536xf32>
    %161 = vector.shape_cast %160 : vector<1x32x1536xf32> to vector<32x1536xf32>
    %c0_61 = arith.constant 0 : index
    %c0_62 = arith.constant 0 : index
    %162 = vector.load %arg10[%c0_61, %c0_62] : memref<1536x128xf32, #tpu.memory_space<vmem>>, vector<1536x128xf32>
    %cst_63 = arith.constant dense<0.000000e+00> : vector<32x128xf32>
    %163 = tpu.matmul %161, %162, %cst_63 {dimension_numbers = #tpu.dot_dimension_numbers<[1], [0], [0], [1], [0, 0, 1, 1], [], []>} : vector<32x1536xf32>, vector<1536x128xf32>, vector<32x128xf32> -> vector<32x128xf32>
    %164 = arith.addf %159, %163 : vector<32x128xf32>
    %165 = vector.extract_strided_slice %9 {offsets = [0, 0], sizes = [32, 128], strides = [1, 1]} : vector<96x128xf32> to vector<32x128xf32>
    %166 = arith.addf %164, %165 : vector<32x128xf32>
    %167 = arith.negf %166 : vector<32x128xf32>
    %168 = math.exp %167 : vector<32x128xf32>
    %cst_64 = arith.constant 1.000000e+00 : f32
    %169 = vector.broadcast %cst_64 : f32 to vector<32x128xf32>
    %170 = arith.addf %169, %168 : vector<32x128xf32>
    %171 = arith.divf %169, %170 : vector<32x128xf32>
    %172 = vector.extract_strided_slice %6 {offsets = [48, 0], sizes = [48, 128], strides = [1, 1]} : vector<432x128xf32> to vector<48x128xf32>
    %173 = vector.extract_strided_slice %1 {offsets = [0, 0], sizes = [1, 128], strides = [1, 1]} : vector<4x128xf32> to vector<1x128xf32>
    %174 = vector.broadcast %173 : vector<1x128xf32> to vector<48x128xf32>
    %175 = arith.mulf %174, %172 : vector<48x128xf32>
    %c0_65 = arith.constant 0 : index
    %c0_66 = arith.constant 0 : index
    %176 = vector.load %arg9[%c0_65, %c0_66] : memref<192x128xf32, #tpu.memory_space<vmem>>, vector<48x128xf32>
    tpu.vector_store %arg9[%c0_65, %c0_66], %175 {strides = array<i32>} : memref<192x128xf32, #tpu.memory_space<vmem>>, vector<48x128xf32>,
    %177 = vector.extract_strided_slice %1 {offsets = [1, 0], sizes = [1, 128], strides = [1, 1]} : vector<4x128xf32> to vector<1x128xf32>
    %178 = vector.broadcast %177 : vector<1x128xf32> to vector<48x128xf32>
    %179 = arith.mulf %178, %172 : vector<48x128xf32>
    %c48_67 = arith.constant 48 : index
    %c0_68 = arith.constant 0 : index
    %180 = vector.load %arg9[%c48_67, %c0_68] : memref<192x128xf32, #tpu.memory_space<vmem>>, vector<48x128xf32>
    tpu.vector_store %arg9[%c48_67, %c0_68], %179 {strides = array<i32>} : memref<192x128xf32, #tpu.memory_space<vmem>>, vector<48x128xf32>,
    %181 = vector.extract_strided_slice %1 {offsets = [2, 0], sizes = [1, 128], strides = [1, 1]} : vector<4x128xf32> to vector<1x128xf32>
    %182 = vector.broadcast %181 : vector<1x128xf32> to vector<48x128xf32>
    %183 = arith.mulf %182, %172 : vector<48x128xf32>
    %c96_69 = arith.constant 96 : index
    %c0_70 = arith.constant 0 : index
    %184 = vector.load %arg9[%c96_69, %c0_70] : memref<192x128xf32, #tpu.memory_space<vmem>>, vector<48x128xf32>
    tpu.vector_store %arg9[%c96_69, %c0_70], %183 {strides = array<i32>} : memref<192x128xf32, #tpu.memory_space<vmem>>, vector<48x128xf32>,
    %185 = vector.extract_strided_slice %1 {offsets = [3, 0], sizes = [1, 128], strides = [1, 1]} : vector<4x128xf32> to vector<1x128xf32>
    %186 = vector.broadcast %185 : vector<1x128xf32> to vector<48x128xf32>
    %187 = arith.mulf %186, %172 : vector<48x128xf32>
    %c144_71 = arith.constant 144 : index
    %c0_72 = arith.constant 0 : index
    %188 = vector.load %arg9[%c144_71, %c0_72] : memref<192x128xf32, #tpu.memory_space<vmem>>, vector<48x128xf32>
    tpu.vector_store %arg9[%c144_71, %c0_72], %187 {strides = array<i32>} : memref<192x128xf32, #tpu.memory_space<vmem>>, vector<48x128xf32>,
    %189 = vector.extract_strided_slice %6 {offsets = [192, 0], sizes = [48, 128], strides = [1, 1]} : vector<432x128xf32> to vector<48x128xf32>
    %190 = vector.extract_strided_slice %2 {offsets = [0, 0], sizes = [1, 128], strides = [1, 1]} : vector<32x128xf32> to vector<1x128xf32>
    %191 = vector.broadcast %190 : vector<1x128xf32> to vector<48x128xf32>
    %192 = arith.mulf %191, %189 : vector<48x128xf32>
    %c0_73 = arith.constant 0 : index
    %c0_74 = arith.constant 0 : index
    %193 = vector.load %arg10[%c0_73, %c0_74] : memref<1536x128xf32, #tpu.memory_space<vmem>>, vector<48x128xf32>
    tpu.vector_store %arg10[%c0_73, %c0_74], %192 {strides = array<i32>} : memref<1536x128xf32, #tpu.memory_space<vmem>>, vector<48x128xf32>,
    %194 = vector.extract_strided_slice %2 {offsets = [1, 0], sizes = [1, 128], strides = [1, 1]} : vector<32x128xf32> to vector<1x128xf32>
    %195 = vector.broadcast %194 : vector<1x128xf32> to vector<48x128xf32>
    %196 = arith.mulf %195, %189 : vector<48x128xf32>
    %c48_75 = arith.constant 48 : index
    %c0_76 = arith.constant 0 : index
    %197 = vector.load %arg10[%c48_75, %c0_76] : memref<1536x128xf32, #tpu.memory_space<vmem>>, vector<48x128xf32>
    tpu.vector_store %arg10[%c48_75, %c0_76], %196 {strides = array<i32>} : memref<1536x128xf32, #tpu.memory_space<vmem>>, vector<48x128xf32>,
    %198 = vector.extract_strided_slice %2 {offsets = [2, 0], sizes = [1, 128], strides = [1, 1]} : vector<32x128xf32> to vector<1x128xf32>
    %199 = vector.broadcast %198 : vector<1x128xf32> to vector<48x128xf32>
    %200 = arith.mulf %199, %189 : vector<48x128xf32>
    %c96_77 = arith.constant 96 : index
    %c0_78 = arith.constant 0 : index
    %201 = vector.load %arg10[%c96_77, %c0_78] : memref<1536x128xf32, #tpu.memory_space<vmem>>, vector<48x128xf32>
    tpu.vector_store %arg10[%c96_77, %c0_78], %200 {strides = array<i32>} : memref<1536x128xf32, #tpu.memory_space<vmem>>, vector<48x128xf32>,
    %202 = vector.extract_strided_slice %2 {offsets = [3, 0], sizes = [1, 128], strides = [1, 1]} : vector<32x128xf32> to vector<1x128xf32>
    %203 = vector.broadcast %202 : vector<1x128xf32> to vector<48x128xf32>
    %204 = arith.mulf %203, %189 : vector<48x128xf32>
    %c144_79 = arith.constant 144 : index
    %c0_80 = arith.constant 0 : index
    %205 = vector.load %arg10[%c144_79, %c0_80] : memref<1536x128xf32, #tpu.memory_space<vmem>>, vector<48x128xf32>
    tpu.vector_store %arg10[%c144_79, %c0_80], %204 {strides = array<i32>} : memref<1536x128xf32, #tpu.memory_space<vmem>>, vector<48x128xf32>,
    %206 = vector.extract_strided_slice %2 {offsets = [4, 0], sizes = [1, 128], strides = [1, 1]} : vector<32x128xf32> to vector<1x128xf32>
    %207 = vector.broadcast %206 : vector<1x128xf32> to vector<48x128xf32>
    %208 = arith.mulf %207, %189 : vector<48x128xf32>
    %c192_81 = arith.constant 192 : index
    %c0_82 = arith.constant 0 : index
    %209 = vector.load %arg10[%c192_81, %c0_82] : memref<1536x128xf32, #tpu.memory_space<vmem>>, vector<48x128xf32>
    tpu.vector_store %arg10[%c192_81, %c0_82], %208 {strides = array<i32>} : memref<1536x128xf32, #tpu.memory_space<vmem>>, vector<48x128xf32>,
    %210 = vector.extract_strided_slice %2 {offsets = [5, 0], sizes = [1, 128], strides = [1, 1]} : vector<32x128xf32> to vector<1x128xf32>
    %211 = vector.broadcast %210 : vector<1x128xf32> to vector<48x128xf32>
    %212 = arith.mulf %211, %189 : vector<48x128xf32>
    %c240_83 = arith.constant 240 : index
    %c0_84 = arith.constant 0 : index
    %213 = vector.load %arg10[%c240_83, %c0_84] : memref<1536x128xf32, #tpu.memory_space<vmem>>, vector<48x128xf32>
    tpu.vector_store %arg10[%c240_83, %c0_84], %212 {strides = array<i32>} : memref<1536x128xf32, #tpu.memory_space<vmem>>, vector<48x128xf32>,
    %214 = vector.extract_strided_slice %2 {offsets = [6, 0], sizes = [1, 128], strides = [1, 1]} : vector<32x128xf32> to vector<1x128xf32>
    %215 = vector.broadcast %214 : vector<1x128xf32> to vector<48x128xf32>
    %216 = arith.mulf %215, %189 : vector<48x128xf32>
    %c288_85 = arith.constant 288 : index
    %c0_86 = arith.constant 0 : index
    %217 = vector.load %arg10[%c288_85, %c0_86] : memref<1536x128xf32, #tpu.memory_space<vmem>>, vector<48x128xf32>
    tpu.vector_store %arg10[%c288_85, %c0_86], %216 {strides = array<i32>} : memref<1536x128xf32, #tpu.memory_space<vmem>>, vector<48x128xf32>,
    %218 = vector.extract_strided_slice %2 {offsets = [7, 0], sizes = [1, 128], strides = [1, 1]} : vector<32x128xf32> to vector<1x128xf32>
    %219 = vector.broadcast %218 : vector<1x128xf32> to vector<48x128xf32>
    %220 = arith.mulf %219, %189 : vector<48x128xf32>
    %c336_87 = arith.constant 336 : index
    %c0_88 = arith.constant 0 : index
    %221 = vector.load %arg10[%c336_87, %c0_88] : memref<1536x128xf32, #tpu.memory_space<vmem>>, vector<48x128xf32>
    tpu.vector_store %arg10[%c336_87, %c0_88], %220 {strides = array<i32>} : memref<1536x128xf32, #tpu.memory_space<vmem>>, vector<48x128xf32>,
    %222 = vector.extract_strided_slice %2 {offsets = [8, 0], sizes = [1, 128], strides = [1, 1]} : vector<32x128xf32> to vector<1x128xf32>
    %223 = vector.broadcast %222 : vector<1x128xf32> to vector<48x128xf32>
    %224 = arith.mulf %223, %189 : vector<48x128xf32>
    %c384_89 = arith.constant 384 : index
    %c0_90 = arith.constant 0 : index
    %225 = vector.load %arg10[%c384_89, %c0_90] : memref<1536x128xf32, #tpu.memory_space<vmem>>, vector<48x128xf32>
    tpu.vector_store %arg10[%c384_89, %c0_90], %224 {strides = array<i32>} : memref<1536x128xf32, #tpu.memory_space<vmem>>, vector<48x128xf32>,
    %226 = vector.extract_strided_slice %2 {offsets = [9, 0], sizes = [1, 128], strides = [1, 1]} : vector<32x128xf32> to vector<1x128xf32>
    %227 = vector.broadcast %226 : vector<1x128xf32> to vector<48x128xf32>
    %228 = arith.mulf %227, %189 : vector<48x128xf32>
    %c432_91 = arith.constant 432 : index
    %c0_92 = arith.constant 0 : index
    %229 = vector.load %arg10[%c432_91, %c0_92] : memref<1536x128xf32, #tpu.memory_space<vmem>>, vector<48x128xf32>
    tpu.vector_store %arg10[%c432_91, %c0_92], %228 {strides = array<i32>} : memref<1536x128xf32, #tpu.memory_space<vmem>>, vector<48x128xf32>,
    %230 = vector.extract_strided_slice %2 {offsets = [10, 0], sizes = [1, 128], strides = [1, 1]} : vector<32x128xf32> to vector<1x128xf32>
    %231 = vector.broadcast %230 : vector<1x128xf32> to vector<48x128xf32>
    %232 = arith.mulf %231, %189 : vector<48x128xf32>
    %c480_93 = arith.constant 480 : index
    %c0_94 = arith.constant 0 : index
    %233 = vector.load %arg10[%c480_93, %c0_94] : memref<1536x128xf32, #tpu.memory_space<vmem>>, vector<48x128xf32>
    tpu.vector_store %arg10[%c480_93, %c0_94], %232 {strides = array<i32>} : memref<1536x128xf32, #tpu.memory_space<vmem>>, vector<48x128xf32>,
    %234 = vector.extract_strided_slice %2 {offsets = [11, 0], sizes = [1, 128], strides = [1, 1]} : vector<32x128xf32> to vector<1x128xf32>
    %235 = vector.broadcast %234 : vector<1x128xf32> to vector<48x128xf32>
    %236 = arith.mulf %235, %189 : vector<48x128xf32>
    %c528_95 = arith.constant 528 : index
    %c0_96 = arith.constant 0 : index
    %237 = vector.load %arg10[%c528_95, %c0_96] : memref<1536x128xf32, #tpu.memory_space<vmem>>, vector<48x128xf32>
    tpu.vector_store %arg10[%c528_95, %c0_96], %236 {strides = array<i32>} : memref<1536x128xf32, #tpu.memory_space<vmem>>, vector<48x128xf32>,
    %238 = vector.extract_strided_slice %2 {offsets = [12, 0], sizes = [1, 128], strides = [1, 1]} : vector<32x128xf32> to vector<1x128xf32>
    %239 = vector.broadcast %238 : vector<1x128xf32> to vector<48x128xf32>
    %240 = arith.mulf %239, %189 : vector<48x128xf32>
    %c576_97 = arith.constant 576 : index
    %c0_98 = arith.constant 0 : index
    %241 = vector.load %arg10[%c576_97, %c0_98] : memref<1536x128xf32, #tpu.memory_space<vmem>>, vector<48x128xf32>
    tpu.vector_store %arg10[%c576_97, %c0_98], %240 {strides = array<i32>} : memref<1536x128xf32, #tpu.memory_space<vmem>>, vector<48x128xf32>,
    %242 = vector.extract_strided_slice %2 {offsets = [13, 0], sizes = [1, 128], strides = [1, 1]} : vector<32x128xf32> to vector<1x128xf32>
    %243 = vector.broadcast %242 : vector<1x128xf32> to vector<48x128xf32>
    %244 = arith.mulf %243, %189 : vector<48x128xf32>
    %c624_99 = arith.constant 624 : index
    %c0_100 = arith.constant 0 : index
    %245 = vector.load %arg10[%c624_99, %c0_100] : memref<1536x128xf32, #tpu.memory_space<vmem>>, vector<48x128xf32>
    tpu.vector_store %arg10[%c624_99, %c0_100], %244 {strides = array<i32>} : memref<1536x128xf32, #tpu.memory_space<vmem>>, vector<48x128xf32>,
    %246 = vector.extract_strided_slice %2 {offsets = [14, 0], sizes = [1, 128], strides = [1, 1]} : vector<32x128xf32> to vector<1x128xf32>
    %247 = vector.broadcast %246 : vector<1x128xf32> to vector<48x128xf32>
    %248 = arith.mulf %247, %189 : vector<48x128xf32>
    %c672_101 = arith.constant 672 : index
    %c0_102 = arith.constant 0 : index
    %249 = vector.load %arg10[%c672_101, %c0_102] : memref<1536x128xf32, #tpu.memory_space<vmem>>, vector<48x128xf32>
    tpu.vector_store %arg10[%c672_101, %c0_102], %248 {strides = array<i32>} : memref<1536x128xf32, #tpu.memory_space<vmem>>, vector<48x128xf32>,
    %250 = vector.extract_strided_slice %2 {offsets = [15, 0], sizes = [1, 128], strides = [1, 1]} : vector<32x128xf32> to vector<1x128xf32>
    %251 = vector.broadcast %250 : vector<1x128xf32> to vector<48x128xf32>
    %252 = arith.mulf %251, %189 : vector<48x128xf32>
    %c720_103 = arith.constant 720 : index
    %c0_104 = arith.constant 0 : index
    %253 = vector.load %arg10[%c720_103, %c0_104] : memref<1536x128xf32, #tpu.memory_space<vmem>>, vector<48x128xf32>
    tpu.vector_store %arg10[%c720_103, %c0_104], %252 {strides = array<i32>} : memref<1536x128xf32, #tpu.memory_space<vmem>>, vector<48x128xf32>,
    %254 = vector.extract_strided_slice %2 {offsets = [16, 0], sizes = [1, 128], strides = [1, 1]} : vector<32x128xf32> to vector<1x128xf32>
    %255 = vector.broadcast %254 : vector<1x128xf32> to vector<48x128xf32>
    %256 = arith.mulf %255, %189 : vector<48x128xf32>
    %c768_105 = arith.constant 768 : index
    %c0_106 = arith.constant 0 : index
    %257 = vector.load %arg10[%c768_105, %c0_106] : memref<1536x128xf32, #tpu.memory_space<vmem>>, vector<48x128xf32>
    tpu.vector_store %arg10[%c768_105, %c0_106], %256 {strides = array<i32>} : memref<1536x128xf32, #tpu.memory_space<vmem>>, vector<48x128xf32>,
    %258 = vector.extract_strided_slice %2 {offsets = [17, 0], sizes = [1, 128], strides = [1, 1]} : vector<32x128xf32> to vector<1x128xf32>
    %259 = vector.broadcast %258 : vector<1x128xf32> to vector<48x128xf32>
    %260 = arith.mulf %259, %189 : vector<48x128xf32>
    %c816_107 = arith.constant 816 : index
    %c0_108 = arith.constant 0 : index
    %261 = vector.load %arg10[%c816_107, %c0_108] : memref<1536x128xf32, #tpu.memory_space<vmem>>, vector<48x128xf32>
    tpu.vector_store %arg10[%c816_107, %c0_108], %260 {strides = array<i32>} : memref<1536x128xf32, #tpu.memory_space<vmem>>, vector<48x128xf32>,
    %262 = vector.extract_strided_slice %2 {offsets = [18, 0], sizes = [1, 128], strides = [1, 1]} : vector<32x128xf32> to vector<1x128xf32>
    %263 = vector.broadcast %262 : vector<1x128xf32> to vector<48x128xf32>
    %264 = arith.mulf %263, %189 : vector<48x128xf32>
    %c864_109 = arith.constant 864 : index
    %c0_110 = arith.constant 0 : index
    %265 = vector.load %arg10[%c864_109, %c0_110] : memref<1536x128xf32, #tpu.memory_space<vmem>>, vector<48x128xf32>
    tpu.vector_store %arg10[%c864_109, %c0_110], %264 {strides = array<i32>} : memref<1536x128xf32, #tpu.memory_space<vmem>>, vector<48x128xf32>,
    %266 = vector.extract_strided_slice %2 {offsets = [19, 0], sizes = [1, 128], strides = [1, 1]} : vector<32x128xf32> to vector<1x128xf32>
    %267 = vector.broadcast %266 : vector<1x128xf32> to vector<48x128xf32>
    %268 = arith.mulf %267, %189 : vector<48x128xf32>
    %c912_111 = arith.constant 912 : index
    %c0_112 = arith.constant 0 : index
    %269 = vector.load %arg10[%c912_111, %c0_112] : memref<1536x128xf32, #tpu.memory_space<vmem>>, vector<48x128xf32>
    tpu.vector_store %arg10[%c912_111, %c0_112], %268 {strides = array<i32>} : memref<1536x128xf32, #tpu.memory_space<vmem>>, vector<48x128xf32>,
    %270 = vector.extract_strided_slice %2 {offsets = [20, 0], sizes = [1, 128], strides = [1, 1]} : vector<32x128xf32> to vector<1x128xf32>
    %271 = vector.broadcast %270 : vector<1x128xf32> to vector<48x128xf32>
    %272 = arith.mulf %271, %189 : vector<48x128xf32>
    %c960_113 = arith.constant 960 : index
    %c0_114 = arith.constant 0 : index
    %273 = vector.load %arg10[%c960_113, %c0_114] : memref<1536x128xf32, #tpu.memory_space<vmem>>, vector<48x128xf32>
    tpu.vector_store %arg10[%c960_113, %c0_114], %272 {strides = array<i32>} : memref<1536x128xf32, #tpu.memory_space<vmem>>, vector<48x128xf32>,
    %274 = vector.extract_strided_slice %2 {offsets = [21, 0], sizes = [1, 128], strides = [1, 1]} : vector<32x128xf32> to vector<1x128xf32>
    %275 = vector.broadcast %274 : vector<1x128xf32> to vector<48x128xf32>
    %276 = arith.mulf %275, %189 : vector<48x128xf32>
    %c1008_115 = arith.constant 1008 : index
    %c0_116 = arith.constant 0 : index
    %277 = vector.load %arg10[%c1008_115, %c0_116] : memref<1536x128xf32, #tpu.memory_space<vmem>>, vector<48x128xf32>
    tpu.vector_store %arg10[%c1008_115, %c0_116], %276 {strides = array<i32>} : memref<1536x128xf32, #tpu.memory_space<vmem>>, vector<48x128xf32>,
    %278 = vector.extract_strided_slice %2 {offsets = [22, 0], sizes = [1, 128], strides = [1, 1]} : vector<32x128xf32> to vector<1x128xf32>
    %279 = vector.broadcast %278 : vector<1x128xf32> to vector<48x128xf32>
    %280 = arith.mulf %279, %189 : vector<48x128xf32>
    %c1056_117 = arith.constant 1056 : index
    %c0_118 = arith.constant 0 : index
    %281 = vector.load %arg10[%c1056_117, %c0_118] : memref<1536x128xf32, #tpu.memory_space<vmem>>, vector<48x128xf32>
    tpu.vector_store %arg10[%c1056_117, %c0_118], %280 {strides = array<i32>} : memref<1536x128xf32, #tpu.memory_space<vmem>>, vector<48x128xf32>,
    %282 = vector.extract_strided_slice %2 {offsets = [23, 0], sizes = [1, 128], strides = [1, 1]} : vector<32x128xf32> to vector<1x128xf32>
    %283 = vector.broadcast %282 : vector<1x128xf32> to vector<48x128xf32>
    %284 = arith.mulf %283, %189 : vector<48x128xf32>
    %c1104_119 = arith.constant 1104 : index
    %c0_120 = arith.constant 0 : index
    %285 = vector.load %arg10[%c1104_119, %c0_120] : memref<1536x128xf32, #tpu.memory_space<vmem>>, vector<48x128xf32>
    tpu.vector_store %arg10[%c1104_119, %c0_120], %284 {strides = array<i32>} : memref<1536x128xf32, #tpu.memory_space<vmem>>, vector<48x128xf32>,
    %286 = vector.extract_strided_slice %2 {offsets = [24, 0], sizes = [1, 128], strides = [1, 1]} : vector<32x128xf32> to vector<1x128xf32>
    %287 = vector.broadcast %286 : vector<1x128xf32> to vector<48x128xf32>
    %288 = arith.mulf %287, %189 : vector<48x128xf32>
    %c1152_121 = arith.constant 1152 : index
    %c0_122 = arith.constant 0 : index
    %289 = vector.load %arg10[%c1152_121, %c0_122] : memref<1536x128xf32, #tpu.memory_space<vmem>>, vector<48x128xf32>
    tpu.vector_store %arg10[%c1152_121, %c0_122], %288 {strides = array<i32>} : memref<1536x128xf32, #tpu.memory_space<vmem>>, vector<48x128xf32>,
    %290 = vector.extract_strided_slice %2 {offsets = [25, 0], sizes = [1, 128], strides = [1, 1]} : vector<32x128xf32> to vector<1x128xf32>
    %291 = vector.broadcast %290 : vector<1x128xf32> to vector<48x128xf32>
    %292 = arith.mulf %291, %189 : vector<48x128xf32>
    %c1200_123 = arith.constant 1200 : index
    %c0_124 = arith.constant 0 : index
    %293 = vector.load %arg10[%c1200_123, %c0_124] : memref<1536x128xf32, #tpu.memory_space<vmem>>, vector<48x128xf32>
    tpu.vector_store %arg10[%c1200_123, %c0_124], %292 {strides = array<i32>} : memref<1536x128xf32, #tpu.memory_space<vmem>>, vector<48x128xf32>,
    %294 = vector.extract_strided_slice %2 {offsets = [26, 0], sizes = [1, 128], strides = [1, 1]} : vector<32x128xf32> to vector<1x128xf32>
    %295 = vector.broadcast %294 : vector<1x128xf32> to vector<48x128xf32>
    %296 = arith.mulf %295, %189 : vector<48x128xf32>
    %c1248_125 = arith.constant 1248 : index
    %c0_126 = arith.constant 0 : index
    %297 = vector.load %arg10[%c1248_125, %c0_126] : memref<1536x128xf32, #tpu.memory_space<vmem>>, vector<48x128xf32>
    tpu.vector_store %arg10[%c1248_125, %c0_126], %296 {strides = array<i32>} : memref<1536x128xf32, #tpu.memory_space<vmem>>, vector<48x128xf32>,
    %298 = vector.extract_strided_slice %2 {offsets = [27, 0], sizes = [1, 128], strides = [1, 1]} : vector<32x128xf32> to vector<1x128xf32>
    %299 = vector.broadcast %298 : vector<1x128xf32> to vector<48x128xf32>
    %300 = arith.mulf %299, %189 : vector<48x128xf32>
    %c1296_127 = arith.constant 1296 : index
    %c0_128 = arith.constant 0 : index
    %301 = vector.load %arg10[%c1296_127, %c0_128] : memref<1536x128xf32, #tpu.memory_space<vmem>>, vector<48x128xf32>
    tpu.vector_store %arg10[%c1296_127, %c0_128], %300 {strides = array<i32>} : memref<1536x128xf32, #tpu.memory_space<vmem>>, vector<48x128xf32>,
    %302 = vector.extract_strided_slice %2 {offsets = [28, 0], sizes = [1, 128], strides = [1, 1]} : vector<32x128xf32> to vector<1x128xf32>
    %303 = vector.broadcast %302 : vector<1x128xf32> to vector<48x128xf32>
    %304 = arith.mulf %303, %189 : vector<48x128xf32>
    %c1344_129 = arith.constant 1344 : index
    %c0_130 = arith.constant 0 : index
    %305 = vector.load %arg10[%c1344_129, %c0_130] : memref<1536x128xf32, #tpu.memory_space<vmem>>, vector<48x128xf32>
    tpu.vector_store %arg10[%c1344_129, %c0_130], %304 {strides = array<i32>} : memref<1536x128xf32, #tpu.memory_space<vmem>>, vector<48x128xf32>,
    %306 = vector.extract_strided_slice %2 {offsets = [29, 0], sizes = [1, 128], strides = [1, 1]} : vector<32x128xf32> to vector<1x128xf32>
    %307 = vector.broadcast %306 : vector<1x128xf32> to vector<48x128xf32>
    %308 = arith.mulf %307, %189 : vector<48x128xf32>
    %c1392_131 = arith.constant 1392 : index
    %c0_132 = arith.constant 0 : index
    %309 = vector.load %arg10[%c1392_131, %c0_132] : memref<1536x128xf32, #tpu.memory_space<vmem>>, vector<48x128xf32>
    tpu.vector_store %arg10[%c1392_131, %c0_132], %308 {strides = array<i32>} : memref<1536x128xf32, #tpu.memory_space<vmem>>, vector<48x128xf32>,
    %310 = vector.extract_strided_slice %2 {offsets = [30, 0], sizes = [1, 128], strides = [1, 1]} : vector<32x128xf32> to vector<1x128xf32>
    %311 = vector.broadcast %310 : vector<1x128xf32> to vector<48x128xf32>
    %312 = arith.mulf %311, %189 : vector<48x128xf32>
    %c1440_133 = arith.constant 1440 : index
    %c0_134 = arith.constant 0 : index
    %313 = vector.load %arg10[%c1440_133, %c0_134] : memref<1536x128xf32, #tpu.memory_space<vmem>>, vector<48x128xf32>
    tpu.vector_store %arg10[%c1440_133, %c0_134], %312 {strides = array<i32>} : memref<1536x128xf32, #tpu.memory_space<vmem>>, vector<48x128xf32>,
    %314 = vector.extract_strided_slice %2 {offsets = [31, 0], sizes = [1, 128], strides = [1, 1]} : vector<32x128xf32> to vector<1x128xf32>
    %315 = vector.broadcast %314 : vector<1x128xf32> to vector<48x128xf32>
    %316 = arith.mulf %315, %189 : vector<48x128xf32>
    %c1488_135 = arith.constant 1488 : index
    %c0_136 = arith.constant 0 : index
    %317 = vector.load %arg10[%c1488_135, %c0_136] : memref<1536x128xf32, #tpu.memory_space<vmem>>, vector<48x128xf32>
    tpu.vector_store %arg10[%c1488_135, %c0_136], %316 {strides = array<i32>} : memref<1536x128xf32, #tpu.memory_space<vmem>>, vector<48x128xf32>,
    %c1 = arith.constant 1 : index
    %c0_137 = arith.constant 0 : index
    %c0_138 = arith.constant 0 : index
    %318 = vector.load %arg5[%c1, %c0_137, %c0_138] : memref<3x32x192xf32, #tpu.memory_space<vmem>>, vector<1x32x192xf32>
    %319 = vector.shape_cast %318 : vector<1x32x192xf32> to vector<32x192xf32>
    %c0_139 = arith.constant 0 : index
    %c0_140 = arith.constant 0 : index
    %320 = vector.load %arg9[%c0_139, %c0_140] : memref<192x128xf32, #tpu.memory_space<vmem>>, vector<192x128xf32>
    %cst_141 = arith.constant dense<0.000000e+00> : vector<32x128xf32>
    %321 = tpu.matmul %319, %320, %cst_141 {dimension_numbers = #tpu.dot_dimension_numbers<[1], [0], [0], [1], [0, 0, 1, 1], [], []>} : vector<32x192xf32>, vector<192x128xf32>, vector<32x128xf32> -> vector<32x128xf32>
    %c1_142 = arith.constant 1 : index
    %c0_143 = arith.constant 0 : index
    %c0_144 = arith.constant 0 : index
    %322 = vector.load %arg6[%c1_142, %c0_143, %c0_144] : memref<3x32x1536xf32, #tpu.memory_space<vmem>>, vector<1x32x1536xf32>
    %323 = vector.shape_cast %322 : vector<1x32x1536xf32> to vector<32x1536xf32>
    %c0_145 = arith.constant 0 : index
    %c0_146 = arith.constant 0 : index
    %324 = vector.load %arg10[%c0_145, %c0_146] : memref<1536x128xf32, #tpu.memory_space<vmem>>, vector<1536x128xf32>
    %cst_147 = arith.constant dense<0.000000e+00> : vector<32x128xf32>
    %325 = tpu.matmul %323, %324, %cst_147 {dimension_numbers = #tpu.dot_dimension_numbers<[1], [0], [0], [1], [0, 0, 1, 1], [], []>} : vector<32x1536xf32>, vector<1536x128xf32>, vector<32x128xf32> -> vector<32x128xf32>
    %326 = arith.addf %321, %325 : vector<32x128xf32>
    %327 = vector.extract_strided_slice %9 {offsets = [32, 0], sizes = [32, 128], strides = [1, 1]} : vector<96x128xf32> to vector<32x128xf32>
    %328 = arith.addf %326, %327 : vector<32x128xf32>
    %329 = arith.negf %328 : vector<32x128xf32>
    %330 = math.exp %329 : vector<32x128xf32>
    %cst_148 = arith.constant 1.000000e+00 : f32
    %331 = vector.broadcast %cst_148 : f32 to vector<32x128xf32>
    %332 = arith.addf %331, %330 : vector<32x128xf32>
    %333 = arith.divf %331, %332 : vector<32x128xf32>
    %334 = arith.mulf %171, %2 : vector<32x128xf32>
    %335 = vector.extract_strided_slice %6 {offsets = [96, 0], sizes = [48, 128], strides = [1, 1]} : vector<432x128xf32> to vector<48x128xf32>
    %336 = vector.extract_strided_slice %1 {offsets = [0, 0], sizes = [1, 128], strides = [1, 1]} : vector<4x128xf32> to vector<1x128xf32>
    %337 = vector.broadcast %336 : vector<1x128xf32> to vector<48x128xf32>
    %338 = arith.mulf %337, %335 : vector<48x128xf32>
    %c0_149 = arith.constant 0 : index
    %c0_150 = arith.constant 0 : index
    %339 = vector.load %arg9[%c0_149, %c0_150] : memref<192x128xf32, #tpu.memory_space<vmem>>, vector<48x128xf32>
    tpu.vector_store %arg9[%c0_149, %c0_150], %338 {strides = array<i32>} : memref<192x128xf32, #tpu.memory_space<vmem>>, vector<48x128xf32>,
    %340 = vector.extract_strided_slice %1 {offsets = [1, 0], sizes = [1, 128], strides = [1, 1]} : vector<4x128xf32> to vector<1x128xf32>
    %341 = vector.broadcast %340 : vector<1x128xf32> to vector<48x128xf32>
    %342 = arith.mulf %341, %335 : vector<48x128xf32>
    %c48_151 = arith.constant 48 : index
    %c0_152 = arith.constant 0 : index
    %343 = vector.load %arg9[%c48_151, %c0_152] : memref<192x128xf32, #tpu.memory_space<vmem>>, vector<48x128xf32>
    tpu.vector_store %arg9[%c48_151, %c0_152], %342 {strides = array<i32>} : memref<192x128xf32, #tpu.memory_space<vmem>>, vector<48x128xf32>,
    %344 = vector.extract_strided_slice %1 {offsets = [2, 0], sizes = [1, 128], strides = [1, 1]} : vector<4x128xf32> to vector<1x128xf32>
    %345 = vector.broadcast %344 : vector<1x128xf32> to vector<48x128xf32>
    %346 = arith.mulf %345, %335 : vector<48x128xf32>
    %c96_153 = arith.constant 96 : index
    %c0_154 = arith.constant 0 : index
    %347 = vector.load %arg9[%c96_153, %c0_154] : memref<192x128xf32, #tpu.memory_space<vmem>>, vector<48x128xf32>
    tpu.vector_store %arg9[%c96_153, %c0_154], %346 {strides = array<i32>} : memref<192x128xf32, #tpu.memory_space<vmem>>, vector<48x128xf32>,
    %348 = vector.extract_strided_slice %1 {offsets = [3, 0], sizes = [1, 128], strides = [1, 1]} : vector<4x128xf32> to vector<1x128xf32>
    %349 = vector.broadcast %348 : vector<1x128xf32> to vector<48x128xf32>
    %350 = arith.mulf %349, %335 : vector<48x128xf32>
    %c144_155 = arith.constant 144 : index
    %c0_156 = arith.constant 0 : index
    %351 = vector.load %arg9[%c144_155, %c0_156] : memref<192x128xf32, #tpu.memory_space<vmem>>, vector<48x128xf32>
    tpu.vector_store %arg9[%c144_155, %c0_156], %350 {strides = array<i32>} : memref<192x128xf32, #tpu.memory_space<vmem>>, vector<48x128xf32>,
    %352 = vector.extract_strided_slice %6 {offsets = [240, 0], sizes = [48, 128], strides = [1, 1]} : vector<432x128xf32> to vector<48x128xf32>
    %353 = vector.extract_strided_slice %334 {offsets = [0, 0], sizes = [1, 128], strides = [1, 1]} : vector<32x128xf32> to vector<1x128xf32>
    %354 = vector.broadcast %353 : vector<1x128xf32> to vector<48x128xf32>
    %355 = arith.mulf %354, %352 : vector<48x128xf32>
    %c0_157 = arith.constant 0 : index
    %c0_158 = arith.constant 0 : index
    %356 = vector.load %arg10[%c0_157, %c0_158] : memref<1536x128xf32, #tpu.memory_space<vmem>>, vector<48x128xf32>
    tpu.vector_store %arg10[%c0_157, %c0_158], %355 {strides = array<i32>} : memref<1536x128xf32, #tpu.memory_space<vmem>>, vector<48x128xf32>,
    %357 = vector.extract_strided_slice %334 {offsets = [1, 0], sizes = [1, 128], strides = [1, 1]} : vector<32x128xf32> to vector<1x128xf32>
    %358 = vector.broadcast %357 : vector<1x128xf32> to vector<48x128xf32>
    %359 = arith.mulf %358, %352 : vector<48x128xf32>
    %c48_159 = arith.constant 48 : index
    %c0_160 = arith.constant 0 : index
    %360 = vector.load %arg10[%c48_159, %c0_160] : memref<1536x128xf32, #tpu.memory_space<vmem>>, vector<48x128xf32>
    tpu.vector_store %arg10[%c48_159, %c0_160], %359 {strides = array<i32>} : memref<1536x128xf32, #tpu.memory_space<vmem>>, vector<48x128xf32>,
    %361 = vector.extract_strided_slice %334 {offsets = [2, 0], sizes = [1, 128], strides = [1, 1]} : vector<32x128xf32> to vector<1x128xf32>
    %362 = vector.broadcast %361 : vector<1x128xf32> to vector<48x128xf32>
    %363 = arith.mulf %362, %352 : vector<48x128xf32>
    %c96_161 = arith.constant 96 : index
    %c0_162 = arith.constant 0 : index
    %364 = vector.load %arg10[%c96_161, %c0_162] : memref<1536x128xf32, #tpu.memory_space<vmem>>, vector<48x128xf32>
    tpu.vector_store %arg10[%c96_161, %c0_162], %363 {strides = array<i32>} : memref<1536x128xf32, #tpu.memory_space<vmem>>, vector<48x128xf32>,
    %365 = vector.extract_strided_slice %334 {offsets = [3, 0], sizes = [1, 128], strides = [1, 1]} : vector<32x128xf32> to vector<1x128xf32>
    %366 = vector.broadcast %365 : vector<1x128xf32> to vector<48x128xf32>
    %367 = arith.mulf %366, %352 : vector<48x128xf32>
    %c144_163 = arith.constant 144 : index
    %c0_164 = arith.constant 0 : index
    %368 = vector.load %arg10[%c144_163, %c0_164] : memref<1536x128xf32, #tpu.memory_space<vmem>>, vector<48x128xf32>
    tpu.vector_store %arg10[%c144_163, %c0_164], %367 {strides = array<i32>} : memref<1536x128xf32, #tpu.memory_space<vmem>>, vector<48x128xf32>,
    %369 = vector.extract_strided_slice %334 {offsets = [4, 0], sizes = [1, 128], strides = [1, 1]} : vector<32x128xf32> to vector<1x128xf32>
    %370 = vector.broadcast %369 : vector<1x128xf32> to vector<48x128xf32>
    %371 = arith.mulf %370, %352 : vector<48x128xf32>
    %c192_165 = arith.constant 192 : index
    %c0_166 = arith.constant 0 : index
    %372 = vector.load %arg10[%c192_165, %c0_166] : memref<1536x128xf32, #tpu.memory_space<vmem>>, vector<48x128xf32>
    tpu.vector_store %arg10[%c192_165, %c0_166], %371 {strides = array<i32>} : memref<1536x128xf32, #tpu.memory_space<vmem>>, vector<48x128xf32>,
    %373 = vector.extract_strided_slice %334 {offsets = [5, 0], sizes = [1, 128], strides = [1, 1]} : vector<32x128xf32> to vector<1x128xf32>
    %374 = vector.broadcast %373 : vector<1x128xf32> to vector<48x128xf32>
    %375 = arith.mulf %374, %352 : vector<48x128xf32>
    %c240_167 = arith.constant 240 : index
    %c0_168 = arith.constant 0 : index
    %376 = vector.load %arg10[%c240_167, %c0_168] : memref<1536x128xf32, #tpu.memory_space<vmem>>, vector<48x128xf32>
    tpu.vector_store %arg10[%c240_167, %c0_168], %375 {strides = array<i32>} : memref<1536x128xf32, #tpu.memory_space<vmem>>, vector<48x128xf32>,
    %377 = vector.extract_strided_slice %334 {offsets = [6, 0], sizes = [1, 128], strides = [1, 1]} : vector<32x128xf32> to vector<1x128xf32>
    %378 = vector.broadcast %377 : vector<1x128xf32> to vector<48x128xf32>
    %379 = arith.mulf %378, %352 : vector<48x128xf32>
    %c288_169 = arith.constant 288 : index
    %c0_170 = arith.constant 0 : index
    %380 = vector.load %arg10[%c288_169, %c0_170] : memref<1536x128xf32, #tpu.memory_space<vmem>>, vector<48x128xf32>
    tpu.vector_store %arg10[%c288_169, %c0_170], %379 {strides = array<i32>} : memref<1536x128xf32, #tpu.memory_space<vmem>>, vector<48x128xf32>,
    %381 = vector.extract_strided_slice %334 {offsets = [7, 0], sizes = [1, 128], strides = [1, 1]} : vector<32x128xf32> to vector<1x128xf32>
    %382 = vector.broadcast %381 : vector<1x128xf32> to vector<48x128xf32>
    %383 = arith.mulf %382, %352 : vector<48x128xf32>
    %c336_171 = arith.constant 336 : index
    %c0_172 = arith.constant 0 : index
    %384 = vector.load %arg10[%c336_171, %c0_172] : memref<1536x128xf32, #tpu.memory_space<vmem>>, vector<48x128xf32>
    tpu.vector_store %arg10[%c336_171, %c0_172], %383 {strides = array<i32>} : memref<1536x128xf32, #tpu.memory_space<vmem>>, vector<48x128xf32>,
    %385 = vector.extract_strided_slice %334 {offsets = [8, 0], sizes = [1, 128], strides = [1, 1]} : vector<32x128xf32> to vector<1x128xf32>
    %386 = vector.broadcast %385 : vector<1x128xf32> to vector<48x128xf32>
    %387 = arith.mulf %386, %352 : vector<48x128xf32>
    %c384_173 = arith.constant 384 : index
    %c0_174 = arith.constant 0 : index
    %388 = vector.load %arg10[%c384_173, %c0_174] : memref<1536x128xf32, #tpu.memory_space<vmem>>, vector<48x128xf32>
    tpu.vector_store %arg10[%c384_173, %c0_174], %387 {strides = array<i32>} : memref<1536x128xf32, #tpu.memory_space<vmem>>, vector<48x128xf32>,
    %389 = vector.extract_strided_slice %334 {offsets = [9, 0], sizes = [1, 128], strides = [1, 1]} : vector<32x128xf32> to vector<1x128xf32>
    %390 = vector.broadcast %389 : vector<1x128xf32> to vector<48x128xf32>
    %391 = arith.mulf %390, %352 : vector<48x128xf32>
    %c432_175 = arith.constant 432 : index
    %c0_176 = arith.constant 0 : index
    %392 = vector.load %arg10[%c432_175, %c0_176] : memref<1536x128xf32, #tpu.memory_space<vmem>>, vector<48x128xf32>
    tpu.vector_store %arg10[%c432_175, %c0_176], %391 {strides = array<i32>} : memref<1536x128xf32, #tpu.memory_space<vmem>>, vector<48x128xf32>,
    %393 = vector.extract_strided_slice %334 {offsets = [10, 0], sizes = [1, 128], strides = [1, 1]} : vector<32x128xf32> to vector<1x128xf32>
    %394 = vector.broadcast %393 : vector<1x128xf32> to vector<48x128xf32>
    %395 = arith.mulf %394, %352 : vector<48x128xf32>
    %c480_177 = arith.constant 480 : index
    %c0_178 = arith.constant 0 : index
    %396 = vector.load %arg10[%c480_177, %c0_178] : memref<1536x128xf32, #tpu.memory_space<vmem>>, vector<48x128xf32>
    tpu.vector_store %arg10[%c480_177, %c0_178], %395 {strides = array<i32>} : memref<1536x128xf32, #tpu.memory_space<vmem>>, vector<48x128xf32>,
    %397 = vector.extract_strided_slice %334 {offsets = [11, 0], sizes = [1, 128], strides = [1, 1]} : vector<32x128xf32> to vector<1x128xf32>
    %398 = vector.broadcast %397 : vector<1x128xf32> to vector<48x128xf32>
    %399 = arith.mulf %398, %352 : vector<48x128xf32>
    %c528_179 = arith.constant 528 : index
    %c0_180 = arith.constant 0 : index
    %400 = vector.load %arg10[%c528_179, %c0_180] : memref<1536x128xf32, #tpu.memory_space<vmem>>, vector<48x128xf32>
    tpu.vector_store %arg10[%c528_179, %c0_180], %399 {strides = array<i32>} : memref<1536x128xf32, #tpu.memory_space<vmem>>, vector<48x128xf32>,
    %401 = vector.extract_strided_slice %334 {offsets = [12, 0], sizes = [1, 128], strides = [1, 1]} : vector<32x128xf32> to vector<1x128xf32>
    %402 = vector.broadcast %401 : vector<1x128xf32> to vector<48x128xf32>
    %403 = arith.mulf %402, %352 : vector<48x128xf32>
    %c576_181 = arith.constant 576 : index
    %c0_182 = arith.constant 0 : index
    %404 = vector.load %arg10[%c576_181, %c0_182] : memref<1536x128xf32, #tpu.memory_space<vmem>>, vector<48x128xf32>
    tpu.vector_store %arg10[%c576_181, %c0_182], %403 {strides = array<i32>} : memref<1536x128xf32, #tpu.memory_space<vmem>>, vector<48x128xf32>,
    %405 = vector.extract_strided_slice %334 {offsets = [13, 0], sizes = [1, 128], strides = [1, 1]} : vector<32x128xf32> to vector<1x128xf32>
    %406 = vector.broadcast %405 : vector<1x128xf32> to vector<48x128xf32>
    %407 = arith.mulf %406, %352 : vector<48x128xf32>
    %c624_183 = arith.constant 624 : index
    %c0_184 = arith.constant 0 : index
    %408 = vector.load %arg10[%c624_183, %c0_184] : memref<1536x128xf32, #tpu.memory_space<vmem>>, vector<48x128xf32>
    tpu.vector_store %arg10[%c624_183, %c0_184], %407 {strides = array<i32>} : memref<1536x128xf32, #tpu.memory_space<vmem>>, vector<48x128xf32>,
    %409 = vector.extract_strided_slice %334 {offsets = [14, 0], sizes = [1, 128], strides = [1, 1]} : vector<32x128xf32> to vector<1x128xf32>
    %410 = vector.broadcast %409 : vector<1x128xf32> to vector<48x128xf32>
    %411 = arith.mulf %410, %352 : vector<48x128xf32>
    %c672_185 = arith.constant 672 : index
    %c0_186 = arith.constant 0 : index
    %412 = vector.load %arg10[%c672_185, %c0_186] : memref<1536x128xf32, #tpu.memory_space<vmem>>, vector<48x128xf32>
    tpu.vector_store %arg10[%c672_185, %c0_186], %411 {strides = array<i32>} : memref<1536x128xf32, #tpu.memory_space<vmem>>, vector<48x128xf32>,
    %413 = vector.extract_strided_slice %334 {offsets = [15, 0], sizes = [1, 128], strides = [1, 1]} : vector<32x128xf32> to vector<1x128xf32>
    %414 = vector.broadcast %413 : vector<1x128xf32> to vector<48x128xf32>
    %415 = arith.mulf %414, %352 : vector<48x128xf32>
    %c720_187 = arith.constant 720 : index
    %c0_188 = arith.constant 0 : index
    %416 = vector.load %arg10[%c720_187, %c0_188] : memref<1536x128xf32, #tpu.memory_space<vmem>>, vector<48x128xf32>
    tpu.vector_store %arg10[%c720_187, %c0_188], %415 {strides = array<i32>} : memref<1536x128xf32, #tpu.memory_space<vmem>>, vector<48x128xf32>,
    %417 = vector.extract_strided_slice %334 {offsets = [16, 0], sizes = [1, 128], strides = [1, 1]} : vector<32x128xf32> to vector<1x128xf32>
    %418 = vector.broadcast %417 : vector<1x128xf32> to vector<48x128xf32>
    %419 = arith.mulf %418, %352 : vector<48x128xf32>
    %c768_189 = arith.constant 768 : index
    %c0_190 = arith.constant 0 : index
    %420 = vector.load %arg10[%c768_189, %c0_190] : memref<1536x128xf32, #tpu.memory_space<vmem>>, vector<48x128xf32>
    tpu.vector_store %arg10[%c768_189, %c0_190], %419 {strides = array<i32>} : memref<1536x128xf32, #tpu.memory_space<vmem>>, vector<48x128xf32>,
    %421 = vector.extract_strided_slice %334 {offsets = [17, 0], sizes = [1, 128], strides = [1, 1]} : vector<32x128xf32> to vector<1x128xf32>
    %422 = vector.broadcast %421 : vector<1x128xf32> to vector<48x128xf32>
    %423 = arith.mulf %422, %352 : vector<48x128xf32>
    %c816_191 = arith.constant 816 : index
    %c0_192 = arith.constant 0 : index
    %424 = vector.load %arg10[%c816_191, %c0_192] : memref<1536x128xf32, #tpu.memory_space<vmem>>, vector<48x128xf32>
    tpu.vector_store %arg10[%c816_191, %c0_192], %423 {strides = array<i32>} : memref<1536x128xf32, #tpu.memory_space<vmem>>, vector<48x128xf32>,
    %425 = vector.extract_strided_slice %334 {offsets = [18, 0], sizes = [1, 128], strides = [1, 1]} : vector<32x128xf32> to vector<1x128xf32>
    %426 = vector.broadcast %425 : vector<1x128xf32> to vector<48x128xf32>
    %427 = arith.mulf %426, %352 : vector<48x128xf32>
    %c864_193 = arith.constant 864 : index
    %c0_194 = arith.constant 0 : index
    %428 = vector.load %arg10[%c864_193, %c0_194] : memref<1536x128xf32, #tpu.memory_space<vmem>>, vector<48x128xf32>
    tpu.vector_store %arg10[%c864_193, %c0_194], %427 {strides = array<i32>} : memref<1536x128xf32, #tpu.memory_space<vmem>>, vector<48x128xf32>,
    %429 = vector.extract_strided_slice %334 {offsets = [19, 0], sizes = [1, 128], strides = [1, 1]} : vector<32x128xf32> to vector<1x128xf32>
    %430 = vector.broadcast %429 : vector<1x128xf32> to vector<48x128xf32>
    %431 = arith.mulf %430, %352 : vector<48x128xf32>
    %c912_195 = arith.constant 912 : index
    %c0_196 = arith.constant 0 : index
    %432 = vector.load %arg10[%c912_195, %c0_196] : memref<1536x128xf32, #tpu.memory_space<vmem>>, vector<48x128xf32>
    tpu.vector_store %arg10[%c912_195, %c0_196], %431 {strides = array<i32>} : memref<1536x128xf32, #tpu.memory_space<vmem>>, vector<48x128xf32>,
    %433 = vector.extract_strided_slice %334 {offsets = [20, 0], sizes = [1, 128], strides = [1, 1]} : vector<32x128xf32> to vector<1x128xf32>
    %434 = vector.broadcast %433 : vector<1x128xf32> to vector<48x128xf32>
    %435 = arith.mulf %434, %352 : vector<48x128xf32>
    %c960_197 = arith.constant 960 : index
    %c0_198 = arith.constant 0 : index
    %436 = vector.load %arg10[%c960_197, %c0_198] : memref<1536x128xf32, #tpu.memory_space<vmem>>, vector<48x128xf32>
    tpu.vector_store %arg10[%c960_197, %c0_198], %435 {strides = array<i32>} : memref<1536x128xf32, #tpu.memory_space<vmem>>, vector<48x128xf32>,
    %437 = vector.extract_strided_slice %334 {offsets = [21, 0], sizes = [1, 128], strides = [1, 1]} : vector<32x128xf32> to vector<1x128xf32>
    %438 = vector.broadcast %437 : vector<1x128xf32> to vector<48x128xf32>
    %439 = arith.mulf %438, %352 : vector<48x128xf32>
    %c1008_199 = arith.constant 1008 : index
    %c0_200 = arith.constant 0 : index
    %440 = vector.load %arg10[%c1008_199, %c0_200] : memref<1536x128xf32, #tpu.memory_space<vmem>>, vector<48x128xf32>
    tpu.vector_store %arg10[%c1008_199, %c0_200], %439 {strides = array<i32>} : memref<1536x128xf32, #tpu.memory_space<vmem>>, vector<48x128xf32>,
    %441 = vector.extract_strided_slice %334 {offsets = [22, 0], sizes = [1, 128], strides = [1, 1]} : vector<32x128xf32> to vector<1x128xf32>
    %442 = vector.broadcast %441 : vector<1x128xf32> to vector<48x128xf32>
    %443 = arith.mulf %442, %352 : vector<48x128xf32>
    %c1056_201 = arith.constant 1056 : index
    %c0_202 = arith.constant 0 : index
    %444 = vector.load %arg10[%c1056_201, %c0_202] : memref<1536x128xf32, #tpu.memory_space<vmem>>, vector<48x128xf32>
    tpu.vector_store %arg10[%c1056_201, %c0_202], %443 {strides = array<i32>} : memref<1536x128xf32, #tpu.memory_space<vmem>>, vector<48x128xf32>,
    %445 = vector.extract_strided_slice %334 {offsets = [23, 0], sizes = [1, 128], strides = [1, 1]} : vector<32x128xf32> to vector<1x128xf32>
    %446 = vector.broadcast %445 : vector<1x128xf32> to vector<48x128xf32>
    %447 = arith.mulf %446, %352 : vector<48x128xf32>
    %c1104_203 = arith.constant 1104 : index
    %c0_204 = arith.constant 0 : index
    %448 = vector.load %arg10[%c1104_203, %c0_204] : memref<1536x128xf32, #tpu.memory_space<vmem>>, vector<48x128xf32>
    tpu.vector_store %arg10[%c1104_203, %c0_204], %447 {strides = array<i32>} : memref<1536x128xf32, #tpu.memory_space<vmem>>, vector<48x128xf32>,
    %449 = vector.extract_strided_slice %334 {offsets = [24, 0], sizes = [1, 128], strides = [1, 1]} : vector<32x128xf32> to vector<1x128xf32>
    %450 = vector.broadcast %449 : vector<1x128xf32> to vector<48x128xf32>
    %451 = arith.mulf %450, %352 : vector<48x128xf32>
    %c1152_205 = arith.constant 1152 : index
    %c0_206 = arith.constant 0 : index
    %452 = vector.load %arg10[%c1152_205, %c0_206] : memref<1536x128xf32, #tpu.memory_space<vmem>>, vector<48x128xf32>
    tpu.vector_store %arg10[%c1152_205, %c0_206], %451 {strides = array<i32>} : memref<1536x128xf32, #tpu.memory_space<vmem>>, vector<48x128xf32>,
    %453 = vector.extract_strided_slice %334 {offsets = [25, 0], sizes = [1, 128], strides = [1, 1]} : vector<32x128xf32> to vector<1x128xf32>
    %454 = vector.broadcast %453 : vector<1x128xf32> to vector<48x128xf32>
    %455 = arith.mulf %454, %352 : vector<48x128xf32>
    %c1200_207 = arith.constant 1200 : index
    %c0_208 = arith.constant 0 : index
    %456 = vector.load %arg10[%c1200_207, %c0_208] : memref<1536x128xf32, #tpu.memory_space<vmem>>, vector<48x128xf32>
    tpu.vector_store %arg10[%c1200_207, %c0_208], %455 {strides = array<i32>} : memref<1536x128xf32, #tpu.memory_space<vmem>>, vector<48x128xf32>,
    %457 = vector.extract_strided_slice %334 {offsets = [26, 0], sizes = [1, 128], strides = [1, 1]} : vector<32x128xf32> to vector<1x128xf32>
    %458 = vector.broadcast %457 : vector<1x128xf32> to vector<48x128xf32>
    %459 = arith.mulf %458, %352 : vector<48x128xf32>
    %c1248_209 = arith.constant 1248 : index
    %c0_210 = arith.constant 0 : index
    %460 = vector.load %arg10[%c1248_209, %c0_210] : memref<1536x128xf32, #tpu.memory_space<vmem>>, vector<48x128xf32>
    tpu.vector_store %arg10[%c1248_209, %c0_210], %459 {strides = array<i32>} : memref<1536x128xf32, #tpu.memory_space<vmem>>, vector<48x128xf32>,
    %461 = vector.extract_strided_slice %334 {offsets = [27, 0], sizes = [1, 128], strides = [1, 1]} : vector<32x128xf32> to vector<1x128xf32>
    %462 = vector.broadcast %461 : vector<1x128xf32> to vector<48x128xf32>
    %463 = arith.mulf %462, %352 : vector<48x128xf32>
    %c1296_211 = arith.constant 1296 : index
    %c0_212 = arith.constant 0 : index
    %464 = vector.load %arg10[%c1296_211, %c0_212] : memref<1536x128xf32, #tpu.memory_space<vmem>>, vector<48x128xf32>
    tpu.vector_store %arg10[%c1296_211, %c0_212], %463 {strides = array<i32>} : memref<1536x128xf32, #tpu.memory_space<vmem>>, vector<48x128xf32>,
    %465 = vector.extract_strided_slice %334 {offsets = [28, 0], sizes = [1, 128], strides = [1, 1]} : vector<32x128xf32> to vector<1x128xf32>
    %466 = vector.broadcast %465 : vector<1x128xf32> to vector<48x128xf32>
    %467 = arith.mulf %466, %352 : vector<48x128xf32>
    %c1344_213 = arith.constant 1344 : index
    %c0_214 = arith.constant 0 : index
    %468 = vector.load %arg10[%c1344_213, %c0_214] : memref<1536x128xf32, #tpu.memory_space<vmem>>, vector<48x128xf32>
    tpu.vector_store %arg10[%c1344_213, %c0_214], %467 {strides = array<i32>} : memref<1536x128xf32, #tpu.memory_space<vmem>>, vector<48x128xf32>,
    %469 = vector.extract_strided_slice %334 {offsets = [29, 0], sizes = [1, 128], strides = [1, 1]} : vector<32x128xf32> to vector<1x128xf32>
    %470 = vector.broadcast %469 : vector<1x128xf32> to vector<48x128xf32>
    %471 = arith.mulf %470, %352 : vector<48x128xf32>
    %c1392_215 = arith.constant 1392 : index
    %c0_216 = arith.constant 0 : index
    %472 = vector.load %arg10[%c1392_215, %c0_216] : memref<1536x128xf32, #tpu.memory_space<vmem>>, vector<48x128xf32>
    tpu.vector_store %arg10[%c1392_215, %c0_216], %471 {strides = array<i32>} : memref<1536x128xf32, #tpu.memory_space<vmem>>, vector<48x128xf32>,
    %473 = vector.extract_strided_slice %334 {offsets = [30, 0], sizes = [1, 128], strides = [1, 1]} : vector<32x128xf32> to vector<1x128xf32>
    %474 = vector.broadcast %473 : vector<1x128xf32> to vector<48x128xf32>
    %475 = arith.mulf %474, %352 : vector<48x128xf32>
    %c1440_217 = arith.constant 1440 : index
    %c0_218 = arith.constant 0 : index
    %476 = vector.load %arg10[%c1440_217, %c0_218] : memref<1536x128xf32, #tpu.memory_space<vmem>>, vector<48x128xf32>
    tpu.vector_store %arg10[%c1440_217, %c0_218], %475 {strides = array<i32>} : memref<1536x128xf32, #tpu.memory_space<vmem>>, vector<48x128xf32>,
    %477 = vector.extract_strided_slice %334 {offsets = [31, 0], sizes = [1, 128], strides = [1, 1]} : vector<32x128xf32> to vector<1x128xf32>
    %478 = vector.broadcast %477 : vector<1x128xf32> to vector<48x128xf32>
    %479 = arith.mulf %478, %352 : vector<48x128xf32>
    %c1488_219 = arith.constant 1488 : index
    %c0_220 = arith.constant 0 : index
    %480 = vector.load %arg10[%c1488_219, %c0_220] : memref<1536x128xf32, #tpu.memory_space<vmem>>, vector<48x128xf32>
    tpu.vector_store %arg10[%c1488_219, %c0_220], %479 {strides = array<i32>} : memref<1536x128xf32, #tpu.memory_space<vmem>>, vector<48x128xf32>,
    %c2 = arith.constant 2 : index
    %c0_221 = arith.constant 0 : index
    %c0_222 = arith.constant 0 : index
    %481 = vector.load %arg5[%c2, %c0_221, %c0_222] : memref<3x32x192xf32, #tpu.memory_space<vmem>>, vector<1x32x192xf32>
    %482 = vector.shape_cast %481 : vector<1x32x192xf32> to vector<32x192xf32>
    %c0_223 = arith.constant 0 : index
    %c0_224 = arith.constant 0 : index
    %483 = vector.load %arg9[%c0_223, %c0_224] : memref<192x128xf32, #tpu.memory_space<vmem>>, vector<192x128xf32>
    %cst_225 = arith.constant dense<0.000000e+00> : vector<32x128xf32>
    %484 = tpu.matmul %482, %483, %cst_225 {dimension_numbers = #tpu.dot_dimension_numbers<[1], [0], [0], [1], [0, 0, 1, 1], [], []>} : vector<32x192xf32>, vector<192x128xf32>, vector<32x128xf32> -> vector<32x128xf32>
    %c2_226 = arith.constant 2 : index
    %c0_227 = arith.constant 0 : index
    %c0_228 = arith.constant 0 : index
    %485 = vector.load %arg6[%c2_226, %c0_227, %c0_228] : memref<3x32x1536xf32, #tpu.memory_space<vmem>>, vector<1x32x1536xf32>
    %486 = vector.shape_cast %485 : vector<1x32x1536xf32> to vector<32x1536xf32>
    %c0_229 = arith.constant 0 : index
    %c0_230 = arith.constant 0 : index
    %487 = vector.load %arg10[%c0_229, %c0_230] : memref<1536x128xf32, #tpu.memory_space<vmem>>, vector<1536x128xf32>
    %cst_231 = arith.constant dense<0.000000e+00> : vector<32x128xf32>
    %488 = tpu.matmul %486, %487, %cst_231 {dimension_numbers = #tpu.dot_dimension_numbers<[1], [0], [0], [1], [0, 0, 1, 1], [], []>} : vector<32x1536xf32>, vector<1536x128xf32>, vector<32x128xf32> -> vector<32x128xf32>
    %489 = arith.addf %484, %488 : vector<32x128xf32>
    %490 = vector.extract_strided_slice %9 {offsets = [64, 0], sizes = [32, 128], strides = [1, 1]} : vector<96x128xf32> to vector<32x128xf32>
    %491 = arith.addf %489, %490 : vector<32x128xf32>
    %492 = math.tanh %491 : vector<32x128xf32>
    %cst_232 = arith.constant 1.000000e+00 : f32
    %493 = vector.broadcast %cst_232 : f32 to vector<32x128xf32>
    %494 = arith.subf %493, %333 : vector<32x128xf32>
    %495 = arith.mulf %494, %2 : vector<32x128xf32>
    %496 = arith.mulf %333, %492 : vector<32x128xf32>
    %497 = arith.addf %495, %496 : vector<32x128xf32>
    %c0_233 = arith.constant 0 : index
    %c0_234 = arith.constant 0 : index
    %498 = vector.load %arg8[%c0_233, %c0_234] : memref<32x128xf32, #tpu.memory_space<vmem>>, vector<32x128xf32>
    tpu.vector_store %arg8[%c0_233, %c0_234], %497 {strides = array<i32>} : memref<32x128xf32, #tpu.memory_space<vmem>>, vector<32x128xf32>,
    return
  }
  func.func @transform_0(%arg0: i32) -> (i32, i32) {
    %c0_i32 = arith.constant 0 : i32
    %c0_i32_0 = arith.constant 0 : i32
    return %c0_i32, %arg0 : i32, i32
  }
  func.func @transform_1(%arg0: i32) -> (i32, i32) {
    %c0_i32 = arith.constant 0 : i32
    %c0_i32_0 = arith.constant 0 : i32
    return %c0_i32, %arg0 : i32, i32
  }
  func.func @transform_2(%arg0: i32) -> (i32, i32) {
    %c0_i32 = arith.constant 0 : i32
    %c0_i32_0 = arith.constant 0 : i32
    return %c0_i32, %arg0 : i32, i32
  }
  func.func @transform_3(%arg0: i32) -> (i32, i32) {
    %c0_i32 = arith.constant 0 : i32
    %c0_i32_0 = arith.constant 0 : i32
    %c0_i32_1 = arith.constant 0 : i32
    return %c0_i32, %c0_i32_0 : i32, i32
  }
  func.func @transform_4(%arg0: i32) -> (i32, i32, i32) {
    %c0_i32 = arith.constant 0 : i32
    %c0_i32_0 = arith.constant 0 : i32
    %c0_i32_1 = arith.constant 0 : i32
    %c0_i32_2 = arith.constant 0 : i32
    return %c0_i32, %c0_i32_0, %c0_i32_1 : i32, i32, i32
  }
  func.func @transform_5(%arg0: i32) -> (i32, i32, i32) {
    %c0_i32 = arith.constant 0 : i32
    %c0_i32_0 = arith.constant 0 : i32
    %c0_i32_1 = arith.constant 0 : i32
    %c0_i32_2 = arith.constant 0 : i32
    return %c0_i32, %c0_i32_0, %c0_i32_1 : i32, i32, i32
  }
  func.func @transform_6(%arg0: i32) -> (i32, i32) {
    %c0_i32 = arith.constant 0 : i32
    %c0_i32_0 = arith.constant 0 : i32
    %c0_i32_1 = arith.constant 0 : i32
    return %c0_i32, %c0_i32_0 : i32, i32
  }
  func.func @transform_7(%arg0: i32) -> (i32, i32) {
    %c0_i32 = arith.constant 0 : i32
    %c0_i32_0 = arith.constant 0 : i32
    return %c0_i32, %arg0 : i32, i32
  }
}

</mosaic_0001>

<bundles_post_ra>
// kernel: gru_cell_forward.1
= control target key start
LH: loop header
LB: loop body
LE: loop exit
PB: predicated region body
PF: predicated region fallthrough
CT: control target
= control target key end

     0   :  { %12 = vsyncpa [#allocation5], 0  ;;  %s7003_s24 = smov [#allocation4]   ;;  %s9509_s0 = inlined_call_operand.vmem [shape: f32[16,128], index: 0, kind: input, shape index: {}]   ;;  %s9510_s1 = inlined_call_operand.vmem [shape: f32[4,128], index: 1, kind: input, shape index: {}]   ;;  %s9511_s2 = inlined_call_operand.vmem [shape: f32[32,128], index: 2, kind: input, shape index: {}]   ;;  %s9512_s3 = inlined_call_operand.vmem [shape: f32[432,16], index: 3, kind: input, shape index: {}]   ;;  %s9513_s4 = inlined_call_operand.vmem [shape: f32[3,32,192], index: 4, kind: input, shape index: {}]   ;;  %s9514_s5 = inlined_call_operand.hbm [shape: f32[3,32,1536], index: 5, kind: input, shape index: {}]   ;;  %s9515_s6 = inlined_call_operand.vmem [shape: f32[96,144], index: 6, kind: input, shape index: {}]   ;;  %s9516_s7 = inlined_call_operand.vmem [shape: f32[32,128], index: 7, kind: output, shape index: {}]  }
   0x1   :  { %s28_s25 = sshll.u32 %s7003_s24, 4  ;;  %s6979_s28 = scalar_lea.hbm %s9514_s5, 18432  ;;  %s29_s25 = int_to_ptr.vmem [resolvable:$true] %s28_s25 }
   0x2   :  { %p6980_p0 = scmp.ne.s32.totalorder %s9514_s5, %s6979_s28  ;;  %p6983_p1 = scmp.lt.u32.totalorder %s6979_s28, %s9514_s5 }
   0x4   :  { %p6985_p2 = pnand %p6983_p1, %p6980_p0 }
   0x6   :  { %6988 = shalt.err (!%p6985_p2)
}
   0x7   :  { %s6989_s10 = scalar_lea.vmem %s29_s25, 18432  ;;  %p6994_p4 = scmp.lt.s32.totalorder %s29_s25, %s29_s25 }
   0x8   :  { %p6990_p3 = scmp.ne.s32.totalorder %s29_s25, %s6989_s10  ;;  %p6995_p5 = scmp.lt.s32.totalorder %s6989_s10, %s6989_s10 }
   0xa   :  { %p6996_p6 = por %p6995_p5, %p6994_p4 }
   0xc   :  { %p6997_p7 = pnand %p6996_p6, %p6990_p3 }
   0xe   :  { %7000 = shalt.err (!%p6997_p7)
}
   0xf   :  { %s7004_s11 = smov 1536   ;;  %s7005_s12 = smov 96  }
  0x10   :  { %34 = dma.hbm_to_vmem [thread:$0]  %s9514_s5, 18432, %s29_s25, [#allocation5], %s7004_s11, %s7004_s11, %s7005_s12  }
  0x11   :  { %7001 = dma.done.wait [#allocation5], 18432  }
  0x12   :  { %7002 = vsyncadd [#allocation5], 4294948864  ;;  %vm101_vm0 = vcmask 130048   ;;  %v40_v0 = vld [vmem:[%s9509_s0] sm:$0xff]  ;;  %v41_v1 = vld [vmem:[%s9509_s0 + $0x8] sm:$0xff]  ;;  %v9517_v57 = vmov 0.0|0.0   ;;  %v838_v60 = vlaneseq }
  0x13   :  { %v47_v2 = vld [vmem:[%s9512_s3] sm:$0xff]  ;;  %v6176_v3 = vpack.c.bf16 %v41_v1, %v40_v0  ;;  %v48_v4 = vld [vmem:[%s9512_s3 + $0x8] sm:$0xff]  ;;  %v49_v5 = vld [vmem:[%s9512_s3 + $0x10] sm:$0xff]  ;;  %6180 = vmatprep.subr.bf16.mxu1 %v9517_v57  ;;  %vm2196_vm1 = vcmask 523264  }
  0x14   :  { %6095 = vmatprep.mubr.msk.f32.mxu0 %vm101_vm0, %v47_v2  ;;  %v50_v6 = vld [vmem:[%s9512_s3 + $0x18] sm:$0xff]  ;;  %v51_v7 = vld [vmem:[%s9512_s3 + $0x20] sm:$0xff]  ;;  %v52_v8 = vld [vmem:[%s9512_s3 + $0x28] sm:$0xff]  ;;  %v7286_v61 = vshrl.u32 %v838_v60, 7 }
  0x15   :  { %6177 = vmatprep.subr.bf16.mxu0 %v6176_v3  ;;  %v53_v9 = vld [vmem:[%s9512_s3 + $0x30] sm:$0xff]  ;;  %v54_v10 = vld [vmem:[%s9512_s3 + $0x38] sm:$0xff]  ;;  %v55_v11 = vld [vmem:[%s9512_s3 + $0x40] sm:$0xff] }
  0x16   :  { %6179 = vmatpush3.bf16.msra.mxu0 %v6176_v3  ;;  %v56_v12 = vld [vmem:[%s9512_s3 + $0x48] sm:$0xff]  ;;  %v57_v13 = vld [vmem:[%s9512_s3 + $0x50] sm:$0xff]  ;;  %v58_v14 = vld [vmem:[%s9512_s3 + $0x58] sm:$0xff]  ;;  %v7289_v62 = vsub.s32 0, %v7286_v61  ;;  %v7292_v63 = vsub.s32 1, %v7286_v61  ;;  %v7295_v0 = vsub.s32 2, %v7286_v61 }
  0x17   :  { %v59_v15 = vld [vmem:[%s9512_s3 + $0x60] sm:$0xff]  ;;  %v60_v16 = vld [vmem:[%s9512_s3 + $0x68] sm:$0xff]  ;;  %v61_v17 = vld [vmem:[%s9512_s3 + $0x70] sm:$0xff]  ;;  %v7301_v2 = vsub.s32 3, %v7286_v61 }
  0x18   :  { %v62_v18 = vld [vmem:[%s9512_s3 + $0x78] sm:$0xff]  ;;  %v63_v19 = vld [vmem:[%s9512_s3 + $0x80] sm:$0xff]  ;;  %v64_v20 = vld [vmem:[%s9512_s3 + $0x88] sm:$0xff]  ;;  %9631 = vst [vmem:[#allocation7_spill] sm:$0xff] %v7289_v62 }
  0x19   :  { %6096 = vmatmul.mubr.msk.f32.vlgmr.msra.gmra.mrb[0].mxu0 %vm101_vm0, %v48_v4  ;;  %v65_v21 = vld [vmem:[%s9512_s3 + $0x90] sm:$0xff]  ;;  %v66_v22 = vld [vmem:[%s9512_s3 + $0x98] sm:$0xff]  ;;  %v67_v23 = vld [vmem:[%s9512_s3 + $0xa0] sm:$0xff]  ;;  %9632 = vst [vmem:[#allocation8_spill] sm:$0xff] %v7292_v63 }
  0x1a   :  { %6098 = vmatprep.mubr.msk.f32.mxu0 %vm101_vm0, %v49_v5  ;;  %v68_v24 = vld [vmem:[%s9512_s3 + $0xa8] sm:$0xff]  ;;  %v69_v25 = vld [vmem:[%s9512_s3 + $0xb0] sm:$0xff]  ;;  %v70_v26 = vld [vmem:[%s9512_s3 + $0xb8] sm:$0xff]  ;;  %9633 = vst [vmem:[#allocation9_spill] sm:$0xff] %v7295_v0 }
  0x1b   :  { %v71_v27 = vld [vmem:[%s9512_s3 + $0xc0] sm:$0xff]  ;;  %v72_v28 = vld [vmem:[%s9512_s3 + $0xc8] sm:$0xff]  ;;  %v73_v29 = vld [vmem:[%s9512_s3 + $0xd0] sm:$0xff]  ;;  %9634 = vst [vmem:[#allocation10_spill] sm:$0xff] %v7301_v2 }
  0x1c   :  { %v74_v30 = vld [vmem:[%s9512_s3 + $0xd8] sm:$0xff]  ;;  %v75_v31 = vld [vmem:[%s9512_s3 + $0xe0] sm:$0xff]  ;;  %v76_v32 = vld [vmem:[%s9512_s3 + $0xe8] sm:$0xff] }
  0x1d   :  { %6099 = vmatmul.mubr.msk.f32.gmra.mrb[2].mxu0 %vm101_vm0, %v50_v6  ;;  %v77_v33 = vld [vmem:[%s9512_s3 + $0xf0] sm:$0xff]  ;;  %v78_v34 = vld [vmem:[%s9512_s3 + $0xf8] sm:$0xff]  ;;  %v79_v35 = vld [vmem:[%s9512_s3 + $0x100] sm:$0xff] }
  0x1e   :  { %6101 = vmatprep.mubr.msk.f32.mxu0 %vm101_vm0, %v51_v7  ;;  %v80_v36 = vld [vmem:[%s9512_s3 + $0x108] sm:$0xff]  ;;  %v81_v37 = vld [vmem:[%s9512_s3 + $0x110] sm:$0xff]  ;;  %v82_v38 = vld [vmem:[%s9512_s3 + $0x118] sm:$0xff] }
  0x1f   :  { %v83_v39 = vld [vmem:[%s9512_s3 + $0x120] sm:$0xff]  ;;  %v84_v40 = vld [vmem:[%s9512_s3 + $0x128] sm:$0xff]  ;;  %v85_v41 = vld [vmem:[%s9512_s3 + $0x130] sm:$0xff] }
  0x20   :  { %v86_v42 = vld [vmem:[%s9512_s3 + $0x138] sm:$0xff]  ;;  %v87_v43 = vld [vmem:[%s9512_s3 + $0x140] sm:$0xff]  ;;  %v88_v44 = vld [vmem:[%s9512_s3 + $0x148] sm:$0xff] }
  0x21   :  { %6102 = vmatmul.mubr.msk.f32.gmra.mrb[4].mxu0 %vm101_vm0, %v52_v8  ;;  %v89_v45 = vld [vmem:[%s9512_s3 + $0x150] sm:$0xff]  ;;  %v90_v46 = vld [vmem:[%s9512_s3 + $0x158] sm:$0xff]  ;;  %v91_v47 = vld [vmem:[%s9512_s3 + $0x160] sm:$0xff] }
  0x22   :  { %6104 = vmatprep.mubr.msk.f32.mxu0 %vm101_vm0, %v53_v9  ;;  %v92_v48 = vld [vmem:[%s9512_s3 + $0x168] sm:$0xff]  ;;  %v93_v49 = vld [vmem:[%s9512_s3 + $0x170] sm:$0xff]  ;;  %v94_v50 = vld [vmem:[%s9512_s3 + $0x178] sm:$0xff] }
  0x23   :  { %v95_v51 = vld [vmem:[%s9512_s3 + $0x180] sm:$0xff]  ;;  %v96_v52 = vld [vmem:[%s9512_s3 + $0x188] sm:$0xff]  ;;  %v97_v53 = vld [vmem:[%s9512_s3 + $0x190] sm:$0xff] }
  0x24   :  { %v98_v54 = vld [vmem:[%s9512_s3 + $0x198] sm:$0xff]  ;;  %v99_v55 = vld [vmem:[%s9512_s3 + $0x1a0] sm:$0xff]  ;;  %v100_v56 = vld [vmem:[%s9512_s3 + $0x1a8] sm:$0xff] }
  0x25   :  { %6105 = vmatmul.mubr.msk.f32.gmra.mrb[6].mxu0 %vm101_vm0, %v54_v10  ;;  %v1447_v58 = vld [vmem:[#allocation4 + $0x8] sm:$0xff]  ;;  %v42_v1 = vld [vmem:[%s9510_s1] sm:$0xf] }
  0x26   :  { %6107 = vmatprep.mubr.msk.f32.mxu0 %vm101_vm0, %v55_v11  ;;  %v654_v59 = vld [vmem:[%s9515_s6 + $0x8] sm:$0xff]  ;;  %v7304_v3 = vrot.slane %v42_v1, %v7289_v62  ;;  %v7307_v4 = vrot.slane %v42_v1, %v7292_v63  ;;  %v7310_v5 = vrot.slane %v42_v1, %v7295_v0  ;;  %v7313_v8 = vrot.slane %v42_v1, %v7301_v2 }
  0x27   :  { %5195 = vmatprep.mubr.msk.f32.mxu1 %vm101_vm0, %v654_v59 }
  0x29   :  { %6108 = vmatmul.mubr.msk.f32.gmra.mrb[8].mxu0 %vm101_vm0, %v56_v12 }
  0x2a   :  { %6110 = vmatprep.mubr.msk.f32.mxu0 %vm101_vm0, %v57_v13 }
  0x2d   :  { %6111 = vmatmul.mubr.msk.f32.gmra.mrb[10].mxu0 %vm101_vm0, %v58_v14 }
  0x2e   :  { %6113 = vmatprep.mubr.msk.f32.mxu0 %vm101_vm0, %v59_v15 }
  0x31   :  { %6114 = vmatmul.mubr.msk.f32.gmra.mrb[12].mxu0 %vm101_vm0, %v60_v16 }
  0x32   :  { %6116 = vmatprep.mubr.msk.f32.mxu0 %vm101_vm0, %v61_v17 }
  0x35   :  { %6117 = vmatmul.mubr.msk.f32.gmra.mrb[14].mxu0 %vm101_vm0, %v62_v18 }
  0x36   :  { %6119 = vmatprep.mubr.msk.f32.mxu0 %vm101_vm0, %v63_v19 }
  0x39   :  { %6120 = vmatmul.mubr.msk.f32.gmra.mrb[16].mxu0 %vm101_vm0, %v64_v20 }
  0x3a   :  { %6122 = vmatprep.mubr.msk.f32.mxu0 %vm101_vm0, %v65_v21 }
  0x3d   :  { %6123 = vmatmul.mubr.msk.f32.gmra.mrb[18].mxu0 %vm101_vm0, %v66_v22 }
  0x3e   :  { %6125 = vmatprep.mubr.msk.f32.mxu0 %vm101_vm0, %v67_v23 }
  0x41   :  { %6126 = vmatmul.mubr.msk.f32.gmra.mrb[20].mxu0 %vm101_vm0, %v68_v24 }
  0x42   :  { %6128 = vmatprep.mubr.msk.f32.mxu0 %vm101_vm0, %v69_v25 }
  0x45   :  { %6129 = vmatmul.mubr.msk.f32.gmra.mrb[22].mxu0 %vm101_vm0, %v70_v26 }
  0x46   :  { %6131 = vmatprep.mubr.msk.f32.mxu0 %vm101_vm0, %v71_v27 }
  0x49   :  { %6132 = vmatmul.mubr.msk.f32.gmra.mrb[24].mxu0 %vm101_vm0, %v72_v28 }
  0x4a   :  { %6134 = vmatprep.mubr.msk.f32.mxu0 %vm101_vm0, %v73_v29 }
  0x4d   :  { %6135 = vmatmul.mubr.msk.f32.gmra.mrb[26].mxu0 %vm101_vm0, %v74_v30 }
  0x4e   :  { %6137 = vmatprep.mubr.msk.f32.mxu0 %vm101_vm0, %v75_v31 }
  0x51   :  { %6138 = vmatmul.mubr.msk.f32.gmra.mrb[28].mxu0 %vm101_vm0, %v76_v32 }
  0x52   :  { %6140 = vmatprep.mubr.msk.f32.mxu0 %vm101_vm0, %v77_v33 }
  0x55   :  { %6141 = vmatmul.mubr.msk.f32.gmra.mrb[30].mxu0 %vm101_vm0, %v78_v34 }
  0x56   :  { %6143 = vmatprep.mubr.msk.f32.mxu0 %vm101_vm0, %v79_v35 }
  0x59   :  { %6144 = vmatmul.mubr.msk.f32.gmra.mrb[32].mxu0 %vm101_vm0, %v80_v36 }
  0x5a   :  { %6146 = vmatprep.mubr.msk.f32.mxu0 %vm101_vm0, %v81_v37 }
  0x5d   :  { %6147 = vmatmul.mubr.msk.f32.gmra.mrb[34].mxu0 %vm101_vm0, %v82_v38 }
  0x5e   :  { %6149 = vmatprep.mubr.msk.f32.mxu0 %vm101_vm0, %v83_v39 }
  0x61   :  { %6150 = vmatmul.mubr.msk.f32.gmra.mrb[36].mxu0 %vm101_vm0, %v84_v40 }
  0x62   :  { %6152 = vmatprep.mubr.msk.f32.mxu0 %vm101_vm0, %v85_v41 }
  0x65   :  { %6153 = vmatmul.mubr.msk.f32.gmra.mrb[38].mxu0 %vm101_vm0, %v86_v42 }
  0x66   :  { %6155 = vmatprep.mubr.msk.f32.mxu0 %vm101_vm0, %v87_v43 }
  0x69   :  { %6156 = vmatmul.mubr.msk.f32.gmra.mrb[40].mxu0 %vm101_vm0, %v88_v44 }
  0x6a   :  { %6158 = vmatprep.mubr.msk.f32.mxu0 %vm101_vm0, %v89_v45 }
  0x6d   :  { %6159 = vmatmul.mubr.msk.f32.gmra.mrb[42].mxu0 %vm101_vm0, %v90_v46 }
  0x6e   :  { %6161 = vmatprep.mubr.msk.f32.mxu0 %vm101_vm0, %v91_v47 }
  0x71   :  { %6162 = vmatmul.mubr.msk.f32.gmra.mrb[44].mxu0 %vm101_vm0, %v92_v48 }
  0x72   :  { %6164 = vmatprep.mubr.msk.f32.mxu0 %vm101_vm0, %v93_v49 }
  0x75   :  { %6165 = vmatmul.mubr.msk.f32.gmra.mrb[46].mxu0 %vm101_vm0, %v94_v50 }
  0x76   :  { %6167 = vmatprep.mubr.msk.f32.mxu0 %vm101_vm0, %v95_v51 }
  0x79   :  { %6168 = vmatmul.mubr.msk.f32.gmra.mrb[48].mxu0 %vm101_vm0, %v96_v52 }
  0x7a   :  { %6170 = vmatprep.mubr.msk.f32.mxu0 %vm101_vm0, %v97_v53 }
  0x7d   :  { %6171 = vmatmul.mubr.msk.f32.gmra.mrb[50].mxu0 %vm101_vm0, %v98_v54 }
  0x7e   :  { %6173 = vmatprep.mubr.msk.f32.mxu0 %vm101_vm0, %v99_v55 }
  0x81   :  { %6174 = vmatmul.mubr.msk.f32.gmra.mrb[52].mxu0 %vm101_vm0, %v100_v56 }
  0x82   :  { %1750 = vmatprep.mubr.f32.mxu0 %v1447_v58 }
  0xec   :  { %v6097_v6 = vpop.f32.mrb[0].mxu0 }
  0xed   :  { %v600_v7 = vmax.f32 %v6097_v6, 0.0  ;;  %v330_v9 = vpop.f32.mrb[1].mxu0 }
  0xee   :  { %v599_v10 = vmax.f32 %v330_v9, 0.0 }
  0xef   :  { %v7316_v11 = vmul.f32 %v7304_v3, %v600_v7  ;;  %v7319_v12 = vmul.f32 %v7307_v4, %v600_v7  ;;  %v7322_v13 = vmul.f32 %v7310_v5, %v600_v7  ;;  %v7334_v18 = vmul.f32 %v7313_v8, %v600_v7 }
  0xf0   :  { %v7325_v14 = vmul.f32 %v7304_v3, %v599_v10  ;;  %v7328_v15 = vmul.f32 %v7307_v4, %v599_v10  ;;  %v7331_v16 = vmul.f32 %v7310_v5, %v599_v10  ;;  %v6100_v17 = vpop.f32.mrb[2].mxu0  ;;  %v7337_v19 = vmul.f32 %v7313_v8, %v599_v10 }
  0xf1   :  { %9635 = vst [vmem:[#allocation11_spill] sm:$0xff] %v7319_v12  ;;  %9636 = vst [vmem:[#allocation12_spill] sm:$0xff] %v7322_v13  ;;  %v602_v20 = vmax.f32 %v6100_v17, 0.0  ;;  %v340_v21 = vpop.f32.mrb[3].mxu0 }
  0xf2   :  { %9637 = vst [vmem:[#allocation13_spill] sm:$0xff] %v7328_v15  ;;  %9638 = vst [vmem:[#allocation14_spill] sm:$0xff] %v7331_v16  ;;  %v601_v22 = vmax.f32 %v340_v21, 0.0 }
  0xf3   :  { %9639 = vst [vmem:[#allocation15_spill] sm:$0xff] %v7334_v18  ;;  %9640 = vst [vmem:[#allocation16_spill] sm:$0xff] %v7337_v19  ;;  %v7346_v26 = vmul.f32 %v7304_v3, %v602_v20  ;;  %v7349_v27 = vmul.f32 %v7307_v4, %v602_v20  ;;  %v7352_v28 = vmul.f32 %v7310_v5, %v602_v20 }
  0xf4   :  { %v7355_v29 = vmul.f32 %v7304_v3, %v601_v22  ;;  %v7358_v30 = vmul.f32 %v7307_v4, %v601_v22  ;;  %v7361_v31 = vmul.f32 %v7310_v5, %v601_v22  ;;  %v6103_v32 = vpop.f32.mrb[4].mxu0  ;;  %v7364_v33 = vmul.f32 %v7313_v8, %v602_v20 }
  0xf5   :  { %9641 = vst [vmem:[#allocation17_spill] sm:$0xff] %v7349_v27  ;;  %9642 = vst [vmem:[#allocation18_spill] sm:$0xff] %v7352_v28  ;;  %v7367_v34 = vmul.f32 %v7313_v8, %v601_v22  ;;  %v604_v35 = vmax.f32 %v6103_v32, 0.0  ;;  %v350_v36 = vpop.f32.mrb[5].mxu0 }
  0xf6   :  { %9643 = vst [vmem:[#allocation19_spill] sm:$0xff] %v7358_v30  ;;  %9644 = vst [vmem:[#allocation20_spill] sm:$0xff] %v7361_v31  ;;  %v603_v38 = vmax.f32 %v350_v36, 0.0  ;;  %v1458_v30 = vld [vmem:[#allocation4 + $0x60] sm:$0xff] }
  0xf7   :  { %9645 = vst [vmem:[#allocation21_spill] sm:$0xff] %v7364_v33  ;;  %9646 = vst [vmem:[#allocation22_spill] sm:$0xff] %v7367_v34  ;;  %v7378_v42 = vmul.f32 %v7304_v3, %v604_v35  ;;  %v7381_v43 = vmul.f32 %v7307_v4, %v604_v35  ;;  %v7384_v44 = vmul.f32 %v7310_v5, %v604_v35 }
  0xf8   :  { %v7387_v45 = vmul.f32 %v7304_v3, %v603_v38  ;;  %v7390_v46 = vmul.f32 %v7307_v4, %v603_v38  ;;  %v7393_v47 = vmul.f32 %v7310_v5, %v603_v38  ;;  %v6106_v48 = vpop.f32.mrb[6].mxu0  ;;  %v7396_v49 = vmul.f32 %v7313_v8, %v604_v35 }
  0xf9   :  { %9647 = vst [vmem:[#allocation23_spill] sm:$0xff] %v7378_v42  ;;  %9648 = vst [vmem:[#allocation24_spill] sm:$0xff] %v7381_v43  ;;  %v7399_v50 = vmul.f32 %v7313_v8, %v603_v38  ;;  %v606_v51 = vmax.f32 %v6106_v48, 0.0  ;;  %v360_v52 = vpop.f32.mrb[7].mxu0 }
  0xfa   :  { %9649 = vst [vmem:[#allocation25_spill] sm:$0xff] %v7384_v44  ;;  %9650 = vst [vmem:[#allocation26_spill] sm:$0xff] %v7387_v45  ;;  %v605_v54 = vmax.f32 %v360_v52, 0.0  ;;  %v658_v45 = vld [vmem:[%s9515_s6 + $0x28] sm:$0xff] }
  0xfb   :  { %9651 = vst [vmem:[#allocation27_spill] sm:$0xff] %v7390_v46  ;;  %9652 = vst [vmem:[#allocation28_spill] sm:$0xff] %v7393_v47  ;;  %v7410_v59 = vmul.f32 %v7304_v3, %v606_v51  ;;  %v7413_v60 = vmul.f32 %v7307_v4, %v606_v51  ;;  %v7416_v1 = vmul.f32 %v7310_v5, %v606_v51 }
  0xfc   :  { %9653 = vst [vmem:[#allocation29_spill] sm:$0xff] %v7396_v49  ;;  %9654 = vst [vmem:[#allocation30_spill] sm:$0xff] %v7399_v50  ;;  %v7419_v6 = vmul.f32 %v7313_v8, %v606_v51  ;;  %v7422_v7 = vmul.f32 %v7304_v3, %v605_v54  ;;  %v7425_v9 = vmul.f32 %v7307_v4, %v605_v54  ;;  %v6109_v20 = vpop.f32.mrb[8].mxu0 }
  0xfd   :  { %9655 = vst [vmem:[#allocation31_spill] sm:$0xff] %v7410_v59  ;;  %9656 = vst [vmem:[#allocation32_spill] sm:$0xff] %v7413_v60  ;;  %v7428_v10 = vmul.f32 %v7310_v5, %v605_v54  ;;  %v7431_v17 = vmul.f32 %v7313_v8, %v605_v54  ;;  %v608_v21 = vmax.f32 %v6109_v20, 0.0  ;;  %v370_v22 = vpop.f32.mrb[9].mxu0  ;;  %v1446_v60 = vld [vmem:[#allocation4] sm:$0xff] }
  0xfe   :  { %9657 = vst [vmem:[#allocation33_spill] sm:$0xff] %v7416_v1  ;;  %9658 = vst [vmem:[#allocation34_spill] sm:$0xff] %v7419_v6  ;;  %v607_v35 = vmax.f32 %v370_v22, 0.0 }
  0xff   :  { %9659 = vst [vmem:[#allocation35_spill] sm:$0xff] %v7422_v7  ;;  %9660 = vst [vmem:[#allocation36_spill] sm:$0xff] %v7425_v9  ;;  %v7436_v36 = vmul.f32 %v7304_v3, %v608_v21  ;;  %v7439_v38 = vmul.f32 %v7307_v4, %v608_v21  ;;  %v7442_v48 = vmul.f32 %v7310_v5, %v608_v21 }
 0x100   :  { %9661 = vst [vmem:[#allocation37_spill] sm:$0xff] %v7428_v10  ;;  %9662 = vst [vmem:[#allocation38_spill] sm:$0xff] %v7431_v17  ;;  %v7445_v51 = vmul.f32 %v7313_v8, %v608_v21  ;;  %v7448_v52 = vmul.f32 %v7304_v3, %v607_v35  ;;  %v7451_v54 = vmul.f32 %v7307_v4, %v607_v35  ;;  %v6112_v32 = vpop.f32.mrb[10].mxu0 }
 0x101   :  { %9663 = vst [vmem:[#allocation39_spill] sm:$0xff] %v7436_v36  ;;  %9664 = vst [vmem:[#allocation40_spill] sm:$0xff] %v7439_v38  ;;  %v7454_v20 = vmul.f32 %v7310_v5, %v607_v35  ;;  %v7457_v22 = vmul.f32 %v7313_v8, %v607_v35  ;;  %v610_v53 = vmax.f32 %v6112_v32, 0.0  ;;  %v380_v37 = vpop.f32.mrb[11].mxu0 }
 0x102   :  { %9665 = vst [vmem:[#allocation41_spill] sm:$0xff] %v7442_v48  ;;  %9666 = vst [vmem:[#allocation42_spill] sm:$0xff] %v7445_v51  ;;  %v609_v58 = vmax.f32 %v380_v37, 0.0 }
 0x103   :  { %9667 = vst [vmem:[#allocation43_spill] sm:$0xff] %v7448_v52  ;;  %9668 = vst [vmem:[#allocation44_spill] sm:$0xff] %v7451_v54  ;;  %v7460_v41 = vmul.f32 %v7304_v3, %v610_v53  ;;  %v7463_v21 = vmul.f32 %v7307_v4, %v610_v53  ;;  %v7466_v25 = vmul.f32 %v7310_v5, %v610_v53 }
 0x104   :  { %9669 = vst [vmem:[#allocation45_spill] sm:$0xff] %v7454_v20  ;;  %9670 = vst [vmem:[#allocation46_spill] sm:$0xff] %v7457_v22  ;;  %v7469_v56 = vmul.f32 %v7313_v8, %v610_v53  ;;  %v7472_v40 = vmul.f32 %v7304_v3, %v609_v58  ;;  %v7475_v35 = vmul.f32 %v7307_v4, %v609_v58  ;;  %v6115_v24 = vpop.f32.mrb[12].mxu0 }
 0x105   :  { %9671 = vst [vmem:[#allocation47_spill] sm:$0xff] %v7460_v41  ;;  %9672 = vst [vmem:[#allocation48_spill] sm:$0xff] %v7463_v21  ;;  %v7478_v37 = vmul.f32 %v7310_v5, %v609_v58  ;;  %v7481_v32 = vmul.f32 %v7313_v8, %v609_v58  ;;  %v612_v55 = vmax.f32 %v6115_v24, 0.0  ;;  %v390_v39 = vpop.f32.mrb[13].mxu0  ;;  %v1471_v41 = vld [vmem:[#allocation4 + $0xc8] sm:$0xff] }
 0x106   :  { %9673 = vst [vmem:[#allocation49_spill] sm:$0xff] %v7466_v25  ;;  %9674 = vst [vmem:[#allocation50_spill] sm:$0xff] %v7469_v56  ;;  %v611_v23 = vmax.f32 %v390_v39, 0.0 }
 0x107   :  { %9675 = vst [vmem:[#allocation51_spill] sm:$0xff] %v7472_v40  ;;  %9676 = vst [vmem:[#allocation52_spill] sm:$0xff] %v7475_v35  ;;  %v7484_v57 = vmul.f32 %v7304_v3, %v612_v55  ;;  %v7487_v53 = vmul.f32 %v7307_v4, %v612_v55  ;;  %v7490_v50 = vmul.f32 %v7310_v5, %v612_v55 }
 0x108   :  { %9677 = vst [vmem:[#allocation53_spill] sm:$0xff] %v7478_v37  ;;  %9678 = vst [vmem:[#allocation54_spill] sm:$0xff] %v7481_v32  ;;  %v7493_v49 = vmul.f32 %v7313_v8, %v612_v55  ;;  %v7496_v34 = vmul.f32 %v7304_v3, %v611_v23  ;;  %v7499_v58 = vmul.f32 %v7307_v4, %v611_v23  ;;  %v6118_v33 = vpop.f32.mrb[14].mxu0  ;;  %v7611_v32 = vsub.s32 4, %v7286_v61 }
 0x109   :  { %9679 = vst [vmem:[#allocation55_spill] sm:$0xff] %v7484_v57  ;;  %9680 = vst [vmem:[#allocation56_spill] sm:$0xff] %v7487_v53  ;;  %v7502_v24 = vmul.f32 %v7310_v5, %v611_v23  ;;  %v7505_v39 = vmul.f32 %v7313_v8, %v611_v23  ;;  %v614_v19 = vmax.f32 %v6118_v33, 0.0  ;;  %v400_v18 = vpop.f32.mrb[15].mxu0 }
 0x10a   :  { %9681 = vst [vmem:[#allocation57_spill] sm:$0xff] %v7490_v50  ;;  %9682 = vst [vmem:[#allocation58_spill] sm:$0xff] %v7493_v49  ;;  %v613_v47 = vmax.f32 %v400_v18, 0.0 }
 0x10b   :  { %9683 = vst [vmem:[#allocation59_spill] sm:$0xff] %v7496_v34  ;;  %9684 = vst [vmem:[#allocation60_spill] sm:$0xff] %v7499_v58  ;;  %v7508_v44 = vmul.f32 %v7304_v3, %v614_v19  ;;  %v7511_v55 = vmul.f32 %v7307_v4, %v614_v19  ;;  %v7514_v31 = vmul.f32 %v7310_v5, %v614_v19 }
 0x10c   :  { %9685 = vst [vmem:[#allocation61_spill] sm:$0xff] %v7502_v24  ;;  %9686 = vst [vmem:[#allocation62_spill] sm:$0xff] %v7505_v39  ;;  %v7517_v28 = vmul.f32 %v7313_v8, %v614_v19  ;;  %v7520_v16 = vmul.f32 %v7304_v3, %v613_v47  ;;  %v7523_v23 = vmul.f32 %v7307_v4, %v613_v47  ;;  %v6121_v13 = vpop.f32.mrb[16].mxu0 }
 0x10d   :  { %9687 = vst [vmem:[#allocation63_spill] sm:$0xff] %v7508_v44  ;;  %9688 = vst [vmem:[#allocation64_spill] sm:$0xff] %v7511_v55  ;;  %v7526_v18 = vmul.f32 %v7310_v5, %v613_v47  ;;  %v7529_v33 = vmul.f32 %v7313_v8, %v613_v47  ;;  %v616_v49 = vmax.f32 %v6121_v13, 0.0  ;;  %v410_v39 = vpop.f32.mrb[17].mxu0 }
 0x10e   :  { %9689 = vst [vmem:[#allocation65_spill] sm:$0xff] %v7514_v31  ;;  %9690 = vst [vmem:[#allocation66_spill] sm:$0xff] %v7517_v28  ;;  %v615_v50 = vmax.f32 %v410_v39, 0.0 }
 0x10f   :  { %9691 = vst [vmem:[#allocation67_spill] sm:$0xff] %v7520_v16  ;;  %9692 = vst [vmem:[#allocation68_spill] sm:$0xff] %v7523_v23  ;;  %v7532_v31 = vmul.f32 %v7304_v3, %v616_v49  ;;  %v7535_v19 = vmul.f32 %v7307_v4, %v616_v49  ;;  %v7538_v28 = vmul.f32 %v7310_v5, %v616_v49 }
 0x110   :  { %9693 = vst [vmem:[#allocation69_spill] sm:$0xff] %v7526_v18  ;;  %9694 = vst [vmem:[#allocation70_spill] sm:$0xff] %v7529_v33  ;;  %v7541_v24 = vmul.f32 %v7313_v8, %v616_v49  ;;  %v7544_v18 = vmul.f32 %v7304_v3, %v615_v50  ;;  %v7547_v47 = vmul.f32 %v7307_v4, %v615_v50  ;;  %v6124_v33 = vpop.f32.mrb[18].mxu0 }
 0x111   :  { %9695 = vst [vmem:[#allocation71_spill] sm:$0xff] %v7532_v31  ;;  %9696 = vst [vmem:[#allocation72_spill] sm:$0xff] %v7535_v19  ;;  %v7550_v13 = vmul.f32 %v7310_v5, %v615_v50  ;;  %v7553_v39 = vmul.f32 %v7313_v8, %v615_v50  ;;  %v420_v19 = vpop.f32.mrb[19].mxu0  ;;  %v7560_v3 = vmax.f32 %v6124_v33, 0.0 }
 0x112   :  { %9697 = vst [vmem:[#allocation73_spill] sm:$0xff] %v7538_v28  ;;  %9698 = vst [vmem:[#allocation74_spill] sm:$0xff] %v7541_v24  ;;  %v7558_v28 = vld [vmem:[%s9511_s2] sm:$0xff]  ;;  %v7566_v5 = vmax.f32 %v420_v19, 0.0 }
 0x113   :  { %9699 = vst [vmem:[#allocation75_spill] sm:$0xff] %v7544_v18  ;;  %9700 = vst [vmem:[#allocation76_spill] sm:$0xff] %v7547_v47  ;;  %v7564_v4 = vrot.slane %v7558_v28, %v7289_v62  ;;  %v7570_v8 = vrot.slane %v7558_v28, %v7301_v2  ;;  %v7576_v47 = vrot.slane %v7558_v28, %v7295_v0 }
 0x114   :  { %9701 = vst [vmem:[#allocation77_spill] sm:$0xff] %v7550_v13  ;;  %9702 = vst [vmem:[#allocation78_spill] sm:$0xff] %v7553_v39  ;;  %v6127_v49 = vpop.f32.mrb[20].mxu0 }
 0x115   :  { %v430_v24 = vpop.f32.mrb[21].mxu0  ;;  %v907_v55 = vmul.f32 %v7564_v4, %v7560_v3  ;;  %v7582_v23 = vmax.f32 %v6127_v49, 0.0  ;;  %v955_v46 = vmul.f32 %v7570_v8, %v7560_v3  ;;  %9703 = vst [vmem:[#allocation79_spill] sm:$0xff] %v7611_v32 }
 0x116   :  { %v7584_v19 = vmax.f32 %v430_v24, 0.0 }
 0x117   :  { %v909_v44 = vmul.f32 %v7564_v4, %v7582_v23  ;;  %v957_v34 = vmul.f32 %v7570_v8, %v7582_v23 }
 0x118   :  { %v6130_v13 = vpop.f32.mrb[22].mxu0  ;;  %v908_v18 = vmul.f32 %v7564_v4, %v7584_v19  ;;  %v956_v57 = vmul.f32 %v7570_v8, %v7584_v19  ;;  %v940_v10 = vmul.f32 %v7576_v47, %v7584_v19 }
 0x119   :  { %v7572_v50 = vmax.f32 %v6130_v13, 0.0  ;;  %v440_v39 = vpop.f32.mrb[23].mxu0  ;;  %v906_v13 = vmul.f32 %v7564_v4, %v7566_v5 }
 0x11a   :  { %v7578_v33 = vmax.f32 %v440_v39, 0.0  ;;  %v954_v39 = vmul.f32 %v7570_v8, %v7566_v5 }
 0x11b   :  { %v943_v53 = vmul.f32 %v7576_v47, %v7572_v50  ;;  %v6209_v31 = vpack.c.bf16 %v907_v55, %v906_v13  ;;  %v7621_v13 = vrot.slane %v7558_v28, %v7292_v63 }
 0x11c   :  { %v942_v58 = vmul.f32 %v7576_v47, %v7578_v33  ;;  %v7596_v43 = vpop.f32.mrb[24].mxu0  ;;  %v6211_v16 = vpack.c.bf16 %v955_v46, %v954_v39  ;;  %v910_v55 = vmul.f32 %v7564_v4, %v7578_v33  ;;  %v911_v46 = vmul.f32 %v7564_v4, %v7572_v50 }
 0x11d   :  { %v7598_v49 = vpop.f32.mrb[25].mxu0  ;;  %v6215_v39 = vpack.c.bf16 %v957_v34, %v956_v57  ;;  %v922_v57 = vmul.f32 %v7621_v13, %v7566_v5  ;;  %v923_v34 = vmul.f32 %v7621_v13, %v7560_v3 }
 0x11e   :  { %v6207_v24 = vpack.c.bf16 %v943_v53, %v942_v58  ;;  %v6213_v58 = vpack.c.bf16 %v909_v44, %v908_v18  ;;  %v6217_v18 = vpack.c.bf16 %v911_v46, %v910_v55  ;;  %v924_v46 = vmul.f32 %v7621_v13, %v7584_v19 }
 0x11f   :  { %v6221_v55 = vpack.c.bf16 %v923_v34, %v922_v57  ;;  %v926_v34 = vmul.f32 %v7621_v13, %v7578_v33 }
 0x120   :  { %6208 = vmatprep.subr.bf16.mxu0 %v6207_v24  ;;  %v7608_v56 = vpop.f32.mrb[26].mxu0  ;;  %v958_v24 = vmul.f32 %v7570_v8, %v7578_v33 }
 0x121   :  { %6210 = vmatpush3.bf16.msra.mxu0 %v6209_v31  ;;  %v7613_v53 = vpop.f32.mrb[27].mxu0  ;;  %v959_v31 = vmul.f32 %v7570_v8, %v7572_v50 }
 0x122   :  { %6212 = vmatprep.subr.bf16.mxu0 %v6211_v16  ;;  %v7631_v16 = vrot.slane %v7558_v28, %v7611_v32 }
 0x123   :  { %v6219_v22 = vpack.c.bf16 %v959_v31, %v958_v24 }
 0x124   :  { %v7627_v51 = vpop.f32.mrb[28].mxu0  ;;  %v970_v17 = vmul.f32 %v7631_v16, %v7566_v5  ;;  %v971_v25 = vmul.f32 %v7631_v16, %v7560_v3  ;;  %v973_v37 = vmul.f32 %v7631_v16, %v7582_v23  ;;  %v975_v48 = vmul.f32 %v7631_v16, %v7572_v50 }
 0x125   :  { %6214 = vmatpush3.bf16.msra.mxu0 %v6213_v58  ;;  %v7633_v44 = vpop.f32.mrb[29].mxu0 }
 0x126   :  { %6216 = vmatprep.subr.bf16.mxu0 %v6215_v39  ;;  %v925_v39 = vmul.f32 %v7621_v13, %v7582_v23  ;;  %v6223_v24 = vpack.c.bf16 %v971_v25, %v970_v17  ;;  %v927_v25 = vmul.f32 %v7621_v13, %v7572_v50 }
 0x128   :  { %v7639_v6 = vpop.f32.mrb[30].mxu0  ;;  %v6225_v57 = vpack.c.bf16 %v925_v39, %v924_v46  ;;  %v7681_v39 = vld [vmem:[%s9511_s2 + $0x8] sm:$0xff] }
 0x129   :  { %9704 = vst [vmem:[#allocation80_spill] sm:$0xff] %v7639_v6  ;;  %6218 = vmatpush3.bf16.msra.mxu0 %v6217_v18  ;;  %v7645_v58 = vpop.f32.mrb[31].mxu0  ;;  %v972_v6 = vmul.f32 %v7631_v16, %v7584_v19  ;;  %v7658_v18 = vsub.s32 5, %v7286_v61  ;;  %v7693_v20 = vrot.slane %v7681_v39, %v7289_v62 }
 0x12a   :  { %9705 = vst [vmem:[#allocation81_spill] sm:$0xff] %v7645_v58  ;;  %6220 = vmatprep.subr.bf16.mxu0 %v6219_v22  ;;  %v974_v58 = vmul.f32 %v7631_v16, %v7578_v33 }
 0x12b   :  { %9707 = vst [vmem:[#allocation83_spill] sm:$0xff] %v7658_v18  ;;  %9711 = vst [vmem:[#allocation87_spill] sm:$0xff] %v7693_v20  ;;  %v1034_v38 = vmul.f32 %v7693_v20, %v7566_v5 }
 0x12c   :  { %v7651_v31 = vpop.f32.mrb[32].mxu0 }
 0x12d   :  { %9706 = vst [vmem:[#allocation82_spill] sm:$0xff] %v7651_v31  ;;  %6222 = vmatpush3.bf16.msra.mxu0 %v6221_v55  ;;  %v7660_v22 = vpop.f32.mrb[33].mxu0  ;;  %v6227_v31 = vpack.c.bf16 %v973_v37, %v972_v6  ;;  %v7674_v55 = vrot.slane %v7558_v28, %v7658_v18  ;;  %v6229_v6 = vpack.c.bf16 %v927_v25, %v926_v34 }
 0x12e   :  { %9708 = vst [vmem:[#allocation84_spill] sm:$0xff] %v7660_v22  ;;  %6224 = vmatprep.subr.bf16.mxu0 %v6223_v24  ;;  %v938_v37 = vmul.f32 %v7576_v47, %v7566_v5  ;;  %v939_v24 = vmul.f32 %v7576_v47, %v7560_v3 }
 0x130   :  { %v7666_v17 = vpop.f32.mrb[34].mxu0  ;;  %v6233_v1 = vpack.c.bf16 %v939_v24, %v938_v37  ;;  %v7704_v37 = vsub.s32 6, %v7286_v61  ;;  %v9713_v24 = vmov 0.0|0.0  }
 0x131   :  { %9709 = vst [vmem:[#allocation85_spill] sm:$0xff] %v7666_v17  ;;  %6226 = vmatpush3.bf16.msra.mxu0 %v6225_v57  ;;  %v7676_v46 = vpop.f32.mrb[35].mxu0  ;;  %v6231_v17 = vpack.c.bf16 %v975_v48, %v974_v58  ;;  %v986_v57 = vmul.f32 %v7674_v55, %v7566_v5  ;;  %v941_v48 = vmul.f32 %v7576_v47, %v7582_v23 }
 0x132   :  { %9710 = vst [vmem:[#allocation86_spill] sm:$0xff] %v7676_v46  ;;  %6228 = vmatprep.subr.bf16.mxu0 %v6227_v31  ;;  %v987_v46 = vmul.f32 %v7674_v55, %v7560_v3  ;;  %9712 = vst [vmem:[#allocation88_spill] sm:$0xff] %v7704_v37  ;;  %v7836_v52 = vrot.slane %v7681_v39, %v7704_v37 }
 0x134   :  { %v6151_v22 = vpop.f32.mrb[36].mxu0  ;;  %v6235_v35 = vpack.c.bf16 %v987_v46, %v986_v57  ;;  %v988_v46 = vmul.f32 %v7674_v55, %v7584_v19  ;;  %v989_v57 = vmul.f32 %v7674_v55, %v7582_v23  ;;  %v1132_v42 = vmul.f32 %v7836_v52, %v7584_v19 }
 0x135   :  { %v636_v31 = vmax.f32 %v6151_v22, 0.0  ;;  %v510_v34 = vpop.f32.mrb[37].mxu0  ;;  %6230 = vmatpush3.bf16.msra.mxu0 %v6229_v6  ;;  %v1035_v22 = vmul.f32 %v7693_v20, %v7560_v3 }
 0x136   :  { %v635_v25 = vmax.f32 %v510_v34, 0.0  ;;  %6232 = vmatprep.subr.bf16.mxu0 %v6231_v17  ;;  %v6237_v34 = vpack.c.bf16 %v941_v48, %v940_v10  ;;  %v7717_v48 = vrot.slane %v7558_v28, %v7704_v37 }
 0x138   :  { %v6154_v58 = vpop.f32.mrb[38].mxu0  ;;  %v6181_v21 = vpack.c.bf16 %v636_v31, %v635_v25  ;;  %9714 = vst [vmem:[#allocation89_spill] sm:$0xff] %v7717_v48 }
 0x139   :  { %v638_v54 = vmax.f32 %v6154_v58, 0.0  ;;  %v520_v6 = vpop.f32.mrb[39].mxu0  ;;  %6234 = vmatpush3.bf16.msra.mxu0 %v6233_v1  ;;  %v6239_v58 = vpack.c.bf16 %v1035_v22, %v1034_v38  ;;  %v1036_v1 = vmul.f32 %v7693_v20, %v7584_v19  ;;  %v6241_v38 = vpack.c.bf16 %v989_v57, %v988_v46 }
 0x13a   :  { %v637_v17 = vmax.f32 %v520_v6, 0.0  ;;  %6182 = vmatpush1.bf16.msra.mxu1 %v6181_v21  ;;  %6236 = vmatprep.subr.bf16.mxu0 %v6235_v35  ;;  %v1037_v21 = vmul.f32 %v7693_v20, %v7582_v23  ;;  %v990_v22 = vmul.f32 %v7674_v55, %v7578_v33  ;;  %v1039_v46 = vmul.f32 %v7693_v20, %v7572_v50 }
 0x13b   :  { %6183 = vmatprep.subr.bf16.mxu1 %v9713_v24 }
 0x13c   :  { %v6184_v31 = vpack.c.bf16 %v638_v54, %v637_v17  ;;  %v6157_v25 = vpop.f32.mrb[40].mxu0  ;;  %v1459_v54 = vld [vmem:[#allocation4 + $0x68] sm:$0xff]  ;;  %v991_v17 = vmul.f32 %v7674_v55, %v7572_v50 }
 0x13d   :  { %v640_v35 = vmax.f32 %v6157_v25, 0.0  ;;  %v530_v6 = vpop.f32.mrb[41].mxu0  ;;  %6238 = vmatpush3.bf16.msra.mxu0 %v6237_v34  ;;  %v7726_v34 = vrot.slane %v7681_v39, %v7292_v63 }
 0x13e   :  { %v639_v10 = vmax.f32 %v530_v6, 0.0  ;;  %6185 = vmatpush1.bf16.msra.mxu1 %v6184_v31  ;;  %6240 = vmatprep.subr.bf16.mxu0 %v6239_v58  ;;  %v6243_v58 = vpack.c.bf16 %v1037_v21, %v1036_v1  ;;  %v1038_v6 = vmul.f32 %v7693_v20, %v7578_v33  ;;  %v1003_v1 = vmul.f32 %v7717_v48, %v7560_v3 }
 0x13f   :  { %6186 = vmatprep.subr.bf16.mxu1 %v9713_v24  ;;  %9715 = vst [vmem:[#allocation90_spill] sm:$0xff] %v7726_v34 }
 0x140   :  { %v6187_v31 = vpack.c.bf16 %v640_v35, %v639_v10  ;;  %v6160_v25 = vpop.f32.mrb[42].mxu0  ;;  %1751 = vmatmul.mubr.f32.vlgmr.msra.gmra.mrb[54].mxu0 %v1446_v60  ;;  %v6245_v35 = vpack.c.bf16 %v991_v17, %v990_v22  ;;  %v1002_v60 = vmul.f32 %v7717_v48, %v7566_v5  ;;  %v1470_v22 = vld [vmem:[#allocation4 + $0xc0] sm:$0xff] }
 0x141   :  { %v642_v57 = vmax.f32 %v6160_v25, 0.0  ;;  %v540_v9 = vpop.f32.mrb[43].mxu0  ;;  %6242 = vmatpush3.bf16.msra.mxu0 %v6241_v38  ;;  %1755 = vmatprep.mubr.f32.mxu0 %v1459_v54  ;;  %v6247_v25 = vpack.c.bf16 %v1039_v46, %v1038_v6  ;;  %v1050_v54 = vmul.f32 %v7726_v34, %v7566_v5  ;;  %v1004_v46 = vmul.f32 %v7717_v48, %v7584_v19 }
 0x142   :  { %v641_v27 = vmax.f32 %v540_v9, 0.0  ;;  %6188 = vmatpush1.bf16.msra.mxu1 %v6187_v31  ;;  %6244 = vmatprep.subr.bf16.mxu0 %v6243_v58  ;;  %v1051_v9 = vmul.f32 %v7726_v34, %v7560_v3  ;;  %v7742_v58 = vsub.s32 7, %v7286_v61  ;;  %v6249_v6 = vpack.c.bf16 %v1003_v1, %v1002_v60  ;;  %v1482_v60 = vld [vmem:[#allocation4 + $0x120] sm:$0xff] }
 0x143   :  { %6189 = vmatprep.subr.bf16.mxu1 %v9713_v24  ;;  %v1053_v61 = vmul.f32 %v7726_v34, %v7582_v23 }
 0x144   :  { %v6190_v21 = vpack.c.bf16 %v642_v57, %v641_v27  ;;  %v6163_v10 = vpop.f32.mrb[44].mxu0  ;;  %1756 = vmatmul.mubr.f32.gmra.mrb[56].mxu0 %v1458_v30  ;;  %9716 = vst [vmem:[#allocation91_spill] sm:$0xff] %v7742_v58  ;;  %v1483_v27 = vld [vmem:[#allocation4 + $0x128] sm:$0xff]  ;;  %v1005_v30 = vmul.f32 %v7717_v48, %v7582_v23 }
 0x145   :  { %v644_v38 = vmax.f32 %v6163_v10, 0.0  ;;  %v550_v31 = vpop.f32.mrb[45].mxu0  ;;  %6246 = vmatpush3.bf16.msra.mxu0 %v6245_v35  ;;  %1760 = vmatprep.mubr.f32.mxu0 %v1471_v41  ;;  %v6251_v41 = vpack.c.bf16 %v1051_v9, %v1050_v54  ;;  %v1449_v54 = vld [vmem:[#allocation4 + $0x18] sm:$0xff] }
 0x146   :  { %v643_v17 = vmax.f32 %v550_v31, 0.0  ;;  %6191 = vmatpush1.bf16.msra.mxu1 %v6190_v21  ;;  %6248 = vmatprep.subr.bf16.mxu0 %v6247_v25  ;;  %v1052_v21 = vmul.f32 %v7726_v34, %v7584_v19  ;;  %v6253_v9 = vpack.c.bf16 %v1005_v30, %v1004_v46  ;;  %v1006_v31 = vmul.f32 %v7717_v48, %v7578_v33 }
 0x147   :  { %6192 = vmatprep.subr.bf16.mxu1 %v9713_v24 }
 0x148   :  { %v6193_v57 = vpack.c.bf16 %v644_v38, %v643_v17  ;;  %v6166_v35 = vpop.f32.mrb[46].mxu0  ;;  %1761 = vmatmul.mubr.f32.gmra.mrb[58].mxu0 %v1470_v22  ;;  %v7755_v38 = vrot.slane %v7558_v28, %v7742_v58  ;;  %v1007_v22 = vmul.f32 %v7717_v48, %v7572_v50  ;;  %v7764_v17 = vrot.slane %v7681_v39, %v7295_v0 }
 0x149   :  { %v646_v10 = vmax.f32 %v6166_v35, 0.0  ;;  %v560_v25 = vpop.f32.mrb[47].mxu0  ;;  %6250 = vmatpush3.bf16.msra.mxu0 %v6249_v6  ;;  %1765 = vmatprep.mubr.f32.mxu0 %v1483_v27  ;;  %v1054_v28 = vmul.f32 %v7726_v34, %v7578_v33  ;;  %v1055_v35 = vmul.f32 %v7726_v34, %v7572_v50 }
 0x14a   :  { %v645_v1 = vmax.f32 %v560_v25, 0.0  ;;  %6194 = vmatpush1.bf16.msra.mxu1 %v6193_v57  ;;  %6252 = vmatprep.subr.bf16.mxu0 %v6251_v41  ;;  %9717 = vst [vmem:[#allocation92_spill] sm:$0xff] %v7755_v38  ;;  %9718 = vst [vmem:[#allocation93_spill] sm:$0xff] %v7764_v17  ;;  %v6255_v57 = vpack.c.bf16 %v1053_v61, %v1052_v21  ;;  %v6257_v25 = vpack.c.bf16 %v1007_v22, %v1006_v31 }
 0x14b   :  { %6195 = vmatprep.subr.bf16.mxu1 %v9713_v24  ;;  %v1018_v21 = vmul.f32 %v7755_v38, %v7566_v5  ;;  %v1019_v61 = vmul.f32 %v7755_v38, %v7560_v3  ;;  %v6259_v34 = vpack.c.bf16 %v1055_v35, %v1054_v28  ;;  %v7790_v28 = vrot.slane %v7681_v39, %v7658_v18 }
 0x14c   :  { %v6196_v27 = vpack.c.bf16 %v646_v10, %v645_v1  ;;  %v6169_v6 = vpop.f32.mrb[48].mxu0  ;;  %1766 = vmatmul.mubr.f32.gmra.mrb[60].mxu0 %v1482_v60  ;;  %v1066_v60 = vmul.f32 %v7764_v17, %v7566_v5  ;;  %v1022_v40 = vmul.f32 %v7755_v38, %v7578_v33 }
 0x14d   :  { %v648_v46 = vmax.f32 %v6169_v6, 0.0  ;;  %v570_v30 = vpop.f32.mrb[49].mxu0  ;;  %6254 = vmatpush3.bf16.msra.mxu0 %v6253_v9  ;;  %1835 = vmatprep.mubr.f32.mxu0 %v1449_v54  ;;  %v1067_v54 = vmul.f32 %v7764_v17, %v7560_v3  ;;  %v7782_v9 = vld [vmem:[%s9511_s2 + $0x10] sm:$0xff]  ;;  %v1021_v6 = vmul.f32 %v7755_v38, %v7582_v23  ;;  %v6261_v35 = vpack.c.bf16 %v1019_v61, %v1018_v21 }
 0x14e   :  { %v647_v41 = vmax.f32 %v570_v30, 0.0  ;;  %6197 = vmatpush1.bf16.msra.mxu1 %v6196_v27  ;;  %6256 = vmatprep.subr.bf16.mxu0 %v6255_v57  ;;  %v1020_v27 = vmul.f32 %v7755_v38, %v7584_v19  ;;  %v7797_v30 = vrot.slane %v7782_v9, %v7295_v0  ;;  %v1116_v21 = vmul.f32 %v7790_v28, %v7584_v19 }
 0x14f   :  { %6198 = vmatprep.subr.bf16.mxu1 %v9713_v24  ;;  %v1117_v20 = vmul.f32 %v7790_v28, %v7582_v23  ;;  %v7840_v59 = vrot.slane %v7782_v9, %v7292_v63 }
 0x150   :  { %v6199_v10 = vpack.c.bf16 %v648_v46, %v647_v41  ;;  %v6172_v1 = vpop.f32.mrb[50].mxu0  ;;  %v1068_v46 = vmul.f32 %v7764_v17, %v7584_v19  ;;  %v7801_v41 = vrot.slane %v7782_v9, %v7289_v62  ;;  %v6265_v48 = vpack.c.bf16 %v1021_v6, %v1020_v27 }
 0x151   :  { %v650_v31 = vmax.f32 %v6172_v1, 0.0  ;;  %v580_v22 = vpop.f32.mrb[51].mxu0  ;;  %6258 = vmatpush3.bf16.msra.mxu0 %v6257_v25  ;;  %v1069_v1 = vmul.f32 %v7764_v17, %v7582_v23  ;;  %v1198_v27 = vmul.f32 %v7797_v30, %v7578_v33  ;;  %v1199_v6 = vmul.f32 %v7797_v30, %v7572_v50  ;;  %9720 = vst [vmem:[#allocation95_spill] sm:$0xff] %v7840_v59 }
 0x152   :  { %v649_v57 = vmax.f32 %v580_v22, 0.0  ;;  %6200 = vmatpush1.bf16.msra.mxu1 %v6199_v10  ;;  %6260 = vmatprep.subr.bf16.mxu0 %v6259_v34  ;;  %v6263_v10 = vpack.c.bf16 %v1067_v54, %v1066_v60  ;;  %v1023_v60 = vmul.f32 %v7755_v38, %v7572_v50  ;;  %v1070_v54 = vmul.f32 %v7764_v17, %v7578_v33 }
 0x153   :  { %6201 = vmatprep.subr.bf16.mxu1 %v9713_v24  ;;  %v6271_v38 = vpack.c.bf16 %v1117_v20, %v1116_v21  ;;  %v7849_v20 = vrot.slane %v7681_v39, %v7611_v32  ;;  %v6303_v21 = vpack.c.bf16 %v1199_v6, %v1198_v27  ;;  %v1131_v27 = vmul.f32 %v7836_v52, %v7560_v3 }
 0x154   :  { %v6202_v25 = vpack.c.bf16 %v650_v31, %v649_v57  ;;  %v6175_v34 = vpop.f32.mrb[52].mxu0  ;;  %v1071_v31 = vmul.f32 %v7764_v17, %v7572_v50  ;;  %v1118_v57 = vmul.f32 %v7790_v28, %v7578_v33  ;;  %v1164_v6 = vmul.f32 %v7801_v41, %v7584_v19 }
 0x155   :  { %v652_v61 = vmax.f32 %v6175_v34, 0.0  ;;  %v590_v22 = vpop.f32.mrb[53].mxu0  ;;  %6262 = vmatpush3.bf16.msra.mxu0 %v6261_v35  ;;  %v1119_v35 = vmul.f32 %v7790_v28, %v7572_v50  ;;  %v6267_v34 = vpack.c.bf16 %v1069_v1, %v1068_v46  ;;  %v6269_v46 = vpack.c.bf16 %v1023_v60, %v1022_v40 }
 0x156   :  { %v651_v36 = vmax.f32 %v590_v22, 0.0  ;;  %6203 = vmatpush1.bf16.msra.mxu1 %v6202_v25  ;;  %6264 = vmatprep.subr.bf16.mxu0 %v6263_v10  ;;  %v7828_v10 = vrot.slane %v7681_v39, %v7301_v2  ;;  %v7832_v22 = vrot.slane %v7782_v9, %v7301_v2  ;;  %v1162_v1 = vmul.f32 %v7801_v41, %v7566_v5 }
 0x157   :  { %6204 = vmatprep.subr.bf16.mxu1 %v9713_v24 }
 0x158   :  { %v6205_v25 = vpack.c.bf16 %v652_v61, %v651_v36  ;;  %9719 = vst [vmem:[#allocation94_spill] sm:$0xff] %v7832_v22  ;;  %v653_v36 = vld [vmem:[%s9515_s6] sm:$0xff]  ;;  %v6275_v61 = vpack.c.bf16 %v1119_v35, %v1118_v57  ;;  %v1082_v40 = vmul.f32 %v7828_v10, %v7566_v5  ;;  %v1083_v60 = vmul.f32 %v7828_v10, %v7560_v3  ;;  %v655_v57 = vld [vmem:[%s9515_s6 + $0x10] sm:$0xff] }
 0x159   :  { %6266 = vmatpush3.bf16.msra.mxu0 %v6265_v48  ;;  %v6273_v48 = vpack.c.bf16 %v1071_v31, %v1070_v54  ;;  %v1210_v7 = vmul.f32 %v7832_v22, %v7566_v5  ;;  %v1448_v54 = vld [vmem:[#allocation4 + $0x10] sm:$0xff]  ;;  %v1130_v31 = vmul.f32 %v7836_v52, %v7566_v5  ;;  %v1165_v35 = vmul.f32 %v7801_v41, %v7582_v23 }
 0x15a   :  { %6206 = vmatpush1.bf16.msra.mxu1 %v6205_v25  ;;  %6268 = vmatprep.subr.bf16.mxu0 %v6267_v34  ;;  %v1163_v25 = vmul.f32 %v7801_v41, %v7560_v3  ;;  %v656_v34 = vld [vmem:[%s9515_s6 + $0x18] sm:$0xff]  ;;  %v6277_v12 = vpack.c.bf16 %v1083_v60, %v1082_v40  ;;  %v657_v40 = vld [vmem:[%s9515_s6 + $0x20] sm:$0xff] }
 0x15b   :  { %6272 = vmatprep.subr.bf16.mxu1 %v6271_v38  ;;  %v1211_v38 = vmul.f32 %v7832_v22, %v7560_v3  ;;  %v6309_v60 = vpack.c.bf16 %v1165_v35, %v1164_v6  ;;  %v1214_v6 = vmul.f32 %v7832_v22, %v7578_v33  ;;  %v1178_v35 = vmul.f32 %v7840_v59, %v7566_v5 }
 0x15c   :  { %v6305_v15 = vpack.c.bf16 %v1163_v25, %v1162_v1  ;;  %v6279_v1 = vpack.c.bf16 %v1131_v27, %v1130_v31  ;;  %v7893_v25 = vrot.slane %v7782_v9, %v7611_v32  ;;  %v660_v31 = vld [vmem:[%s9515_s6 + $0x38] sm:$0xff]  ;;  %v1087_v27 = vmul.f32 %v7828_v10, %v7572_v50 }
 0x15d   :  { %778 = vmatmul.mubr.f32.vlgmr.msra.gmra.mrb[0].mxu1 %v653_v36  ;;  %6270 = vmatpush3.bf16.msra.mxu0 %v6269_v46  ;;  %v1084_v36 = vmul.f32 %v7828_v10, %v7584_v19  ;;  %v1085_v46 = vmul.f32 %v7828_v10, %v7582_v23  ;;  %v6307_v17 = vpack.c.bf16 %v1211_v38, %v1210_v7 }
 0x15e   :  { %6274 = vmatpush3.bf16.msra.mxu1 %v6273_v48  ;;  %6304 = vmatprep.subr.bf16.mxu0 %v6303_v21  ;;  %v1212_v48 = vmul.f32 %v7832_v22, %v7584_v19  ;;  %v1213_v21 = vmul.f32 %v7832_v22, %v7582_v23  ;;  %9721 = vst [vmem:[#allocation96_spill] sm:$0xff] %v7893_v25 }
 0x15f   :  { %6276 = vmatprep.subr.bf16.mxu1 %v6275_v61  ;;  %5196 = vmatprep.mubr.msk.f32.mxu1 %vm101_vm0, %v656_v34  ;;  %v1133_v61 = vmul.f32 %v7836_v52, %v7582_v23  ;;  %v7897_v7 = vrot.slane %v7681_v39, %v7742_v58  ;;  %v1461_v34 = vld [vmem:[#allocation4 + $0x78] sm:$0xff]  ;;  %v6281_v38 = vpack.c.bf16 %v1085_v46, %v1084_v36  ;;  %v1460_v36 = vld [vmem:[#allocation4 + $0x70] sm:$0xff] }
 0x160   :  { %1836 = vmatmul.mubr.f32.vlgmr.msra.gmra.mrb[62].mxu0 %v1448_v54  ;;  %v6311_v54 = vpack.c.bf16 %v1213_v21, %v1212_v48  ;;  %v1167_v39 = vmul.f32 %v7801_v41, %v7572_v50  ;;  %v659_v46 = vld [vmem:[%s9515_s6 + $0x30] sm:$0xff]  ;;  %v1179_v48 = vmul.f32 %v7840_v59, %v7560_v3  ;;  %v1098_v21 = vmul.f32 %v7849_v20, %v7566_v5 }
 0x161   :  { %783 = vmatmul.mubr.f32.gmra.mrb[2].mxu1 %v655_v57  ;;  %6306 = vmatpush3.bf16.msra.mxu0 %v6305_v15  ;;  %v1166_v15 = vmul.f32 %v7801_v41, %v7578_v33  ;;  %v1134_v57 = vmul.f32 %v7836_v52, %v7578_v33 }
 0x162   :  { %6278 = vmatpush3.bf16.msra.mxu1 %v6277_v12  ;;  %6308 = vmatprep.subr.bf16.mxu0 %v6307_v17  ;;  %v1086_v12 = vmul.f32 %v7828_v10, %v7578_v33  ;;  %v6283_v17 = vpack.c.bf16 %v1133_v61, %v1132_v42  ;;  %v1135_v42 = vmul.f32 %v7836_v52, %v7572_v50 }
 0x163   :  { %6280 = vmatprep.subr.bf16.mxu1 %v6279_v1  ;;  %5197 = vmatprep.mubr.msk.f32.mxu1 %vm101_vm0, %v658_v45  ;;  %v1215_v45 = vmul.f32 %v7832_v22, %v7572_v50  ;;  %v1099_v61 = vmul.f32 %v7849_v20, %v7560_v3  ;;  %v6313_v1 = vpack.c.bf16 %v1167_v39, %v1166_v15  ;;  %v1473_v39 = vld [vmem:[#allocation4 + $0xd8] sm:$0xff] }
 0x164   :  { %1840 = vmatprep.mubr.f32.mxu0 %v1461_v34  ;;  %v1226_v34 = vmul.f32 %v7893_v25, %v7566_v5  ;;  %v1146_v22 = vmul.f32 %v7897_v7, %v7566_v5  ;;  %v6287_v15 = vpack.c.bf16 %v1135_v42, %v1134_v57  ;;  %v1100_v57 = vmul.f32 %v7849_v20, %v7584_v19 }
 0x165   :  { %788 = vmatmul.mubr.f32.gmra.mrb[4].mxu1 %v657_v40  ;;  %6310 = vmatpush3.bf16.msra.mxu0 %v6309_v60  ;;  %v1227_v40 = vmul.f32 %v7893_v25, %v7560_v3  ;;  %v6285_v60 = vpack.c.bf16 %v1087_v27, %v1086_v12  ;;  %v661_v12 = vld [vmem:[%s9515_s6 + $0x40] sm:$0xff]  ;;  %v6289_v27 = vpack.c.bf16 %v1099_v61, %v1098_v21 }
 0x166   :  { %6282 = vmatpush3.bf16.msra.mxu1 %v6281_v38  ;;  %6312 = vmatprep.subr.bf16.mxu0 %v6311_v54  ;;  %v6315_v38 = vpack.c.bf16 %v1215_v45, %v1214_v6  ;;  %v662_v54 = vld [vmem:[%s9515_s6 + $0x48] sm:$0xff]  ;;  %v1180_v6 = vmul.f32 %v7840_v59, %v7584_v19  ;;  %v1229_v21 = vmul.f32 %v7893_v25, %v7582_v23 }
 0x167   :  { %6284 = vmatprep.subr.bf16.mxu1 %v6283_v17  ;;  %5198 = vmatprep.mubr.msk.f32.mxu1 %vm101_vm0, %v660_v31  ;;  %v1147_v17 = vmul.f32 %v7897_v7, %v7560_v3  ;;  %v6317_v31 = vpack.c.bf16 %v1179_v48, %v1178_v35  ;;  %v6319_v45 = vpack.c.bf16 %v1227_v40, %v1226_v34  ;;  %v1472_v34 = vld [vmem:[#allocation4 + $0xd0] sm:$0xff]  ;;  %v7973_v40 = vld [vmem:[%s9511_s2 + $0x18] sm:$0xff] }
 0x168   :  { %1841 = vmatmul.mubr.f32.gmra.mrb[64].mxu0 %v1460_v36  ;;  %v1181_v36 = vmul.f32 %v7840_v59, %v7582_v23  ;;  %v1101_v35 = vmul.f32 %v7849_v20, %v7582_v23  ;;  %v1228_v48 = vmul.f32 %v7893_v25, %v7584_v19  ;;  %v1148_v61 = vmul.f32 %v7897_v7, %v7584_v19 }
 0x169   :  { %793 = vmatmul.mubr.f32.gmra.mrb[6].mxu1 %v659_v46  ;;  %6314 = vmatpush3.bf16.msra.mxu0 %v6313_v1  ;;  %v6291_v42 = vpack.c.bf16 %v1147_v17, %v1146_v22  ;;  %v664_v46 = vld [vmem:[%s9515_s6 + $0x58] sm:$0xff]  ;;  %v1149_v22 = vmul.f32 %v7897_v7, %v7582_v23  ;;  %v1182_v1 = vmul.f32 %v7840_v59, %v7578_v33 }
 0x16a   :  { %6286 = vmatpush3.bf16.msra.mxu1 %v6285_v60  ;;  %6316 = vmatprep.subr.bf16.mxu0 %v6315_v38  ;;  %v663_v60 = vld [vmem:[%s9515_s6 + $0x50] sm:$0xff]  ;;  %v1183_v38 = vmul.f32 %v7840_v59, %v7572_v50  ;;  %v1103_v17 = vmul.f32 %v7849_v20, %v7572_v50  ;;  %v7994_v59 = vrot.slane %v7782_v9, %v7658_v18 }
 0x16b   :  { %6288 = vmatprep.subr.bf16.mxu1 %v6287_v15  ;;  %5199 = vmatprep.mubr.msk.f32.mxu1 %vm101_vm0, %v662_v54  ;;  %v1102_v54 = vmul.f32 %v7849_v20, %v7578_v33  ;;  %v6321_v15 = vpack.c.bf16 %v1181_v36, %v1180_v6  ;;  %v7998_v6 = vrot.slane %v7973_v40, %v7289_v62 }
 0x16c   :  { %1845 = vmatprep.mubr.f32.mxu0 %v1473_v39  ;;  %v1230_v39 = vmul.f32 %v7893_v25, %v7578_v33  ;;  %v6295_v36 = vpack.c.bf16 %v1149_v22, %v1148_v61  ;;  %v1194_v61 = vmul.f32 %v7797_v30, %v7566_v5  ;;  %v1195_v22 = vmul.f32 %v7797_v30, %v7560_v3 }
 0x16d   :  { %798 = vmatmul.mubr.f32.gmra.mrb[8].mxu1 %v661_v12  ;;  %6318 = vmatpush3.bf16.msra.mxu0 %v6317_v31  ;;  %v1231_v12 = vmul.f32 %v7893_v25, %v7572_v50  ;;  %v6293_v31 = vpack.c.bf16 %v1101_v35, %v1100_v57  ;;  %v1150_v57 = vmul.f32 %v7897_v7, %v7578_v33  ;;  %v665_v35 = vld [vmem:[%s9515_s6 + $0x60] sm:$0xff] }
 0x16e   :  { %6290 = vmatpush3.bf16.msra.mxu1 %v6289_v27  ;;  %6320 = vmatprep.subr.bf16.mxu0 %v6319_v45  ;;  %v6323_v27 = vpack.c.bf16 %v1229_v21, %v1228_v48  ;;  %v666_v45 = vld [vmem:[%s9515_s6 + $0x68] sm:$0xff]  ;;  %v6325_v48 = vpack.c.bf16 %v1183_v38, %v1182_v1  ;;  %v6297_v21 = vpack.c.bf16 %v1103_v17, %v1102_v54 }
 0x16f   :  { %6292 = vmatprep.subr.bf16.mxu1 %v6291_v42  ;;  %5200 = vmatprep.mubr.msk.f32.mxu1 %vm101_vm0, %v664_v46  ;;  %v1151_v42 = vmul.f32 %v7897_v7, %v7572_v50  ;;  %v1485_v46 = vld [vmem:[#allocation4 + $0x138] sm:$0xff]  ;;  %v1115_v1 = vmul.f32 %v7790_v28, %v7560_v3  ;;  %v1242_v38 = vmul.f32 %v7994_v59, %v7566_v5 }
 0x170   :  { %1846 = vmatmul.mubr.f32.gmra.mrb[66].mxu0 %v1472_v34  ;;  %v6327_v34 = vpack.c.bf16 %v1231_v12, %v1230_v39  ;;  %v1243_v54 = vmul.f32 %v7994_v59, %v7560_v3  ;;  %v1290_v39 = vmul.f32 %v7998_v6, %v7566_v5  ;;  %v1291_v12 = vmul.f32 %v7998_v6, %v7560_v3 }
 0x171   :  { %803 = vmatmul.mubr.f32.gmra.mrb[10].mxu1 %v663_v60  ;;  %6322 = vmatpush3.bf16.msra.mxu0 %v6321_v15  ;;  %v668_v60 = vld [vmem:[%s9515_s6 + $0x78] sm:$0xff]  ;;  %v1114_v15 = vmul.f32 %v7790_v28, %v7566_v5  ;;  %v6299_v17 = vpack.c.bf16 %v1151_v42, %v1150_v57  ;;  %v1196_v57 = vmul.f32 %v7797_v30, %v7584_v19 }
 0x172   :  { %6294 = vmatpush3.bf16.msra.mxu1 %v6293_v31  ;;  %6324 = vmatprep.subr.bf16.mxu0 %v6323_v27  ;;  %v1484_v31 = vld [vmem:[#allocation4 + $0x130] sm:$0xff]  ;;  %v1197_v42 = vmul.f32 %v7797_v30, %v7582_v23  ;;  %v1246_v62 = vmul.f32 %v7994_v59, %v7578_v33  ;;  %v1295_v25 = vmul.f32 %v7998_v6, %v7572_v50 }
 0x173   :  { %6296 = vmatprep.subr.bf16.mxu1 %v6295_v36  ;;  %5201 = vmatprep.mubr.msk.f32.mxu1 %vm101_vm0, %v666_v45  ;;  %v667_v27 = vld [vmem:[%s9515_s6 + $0x70] sm:$0xff]  ;;  %v8032_v45 = vrot.slane %v7973_v40, %v7658_v18  ;;  %v6329_v36 = vpack.c.bf16 %v1195_v22, %v1194_v61  ;;  %v6335_v61 = vpack.c.bf16 %v1291_v12, %v1290_v39  ;;  %v1453_v22 = vld [vmem:[#allocation4 + $0x38] sm:$0xff] }
 0x174   :  { %1850 = vmatprep.mubr.f32.mxu0 %v1485_v46  ;;  %v6301_v46 = vpack.c.bf16 %v1115_v1, %v1114_v15  ;;  %v669_v15 = vld [vmem:[%s9515_s6 + $0x80] sm:$0xff]  ;;  %v8055_v1 = vrot.slane %v7973_v40, %v7301_v2  ;;  %v1293_v18 = vmul.f32 %v7998_v6, %v7582_v23 }
 0x175   :  { %808 = vmatmul.mubr.f32.gmra.mrb[12].mxu1 %v665_v35  ;;  %6326 = vmatpush3.bf16.msra.mxu0 %v6325_v48  ;;  %v6331_v35 = vpack.c.bf16 %v1243_v54, %v1242_v38  ;;  %v670_v48 = vld [vmem:[%s9515_s6 + $0x88] sm:$0xff]  ;;  %v6333_v38 = vpack.c.bf16 %v1197_v42, %v1196_v57  ;;  %v672_v54 = vld [vmem:[%s9515_s6 + $0x98] sm:$0xff]  ;;  %v1452_v57 = vld [vmem:[#allocation4 + $0x30] sm:$0xff] }
 0x176   :  { %6298 = vmatpush3.bf16.msra.mxu1 %v6297_v21  ;;  %6328 = vmatprep.subr.bf16.mxu0 %v6327_v34  ;;  %v1372_v21 = vmul.f32 %v8032_v45, %v7584_v19  ;;  %v1373_v34 = vmul.f32 %v8032_v45, %v7582_v23  ;;  %9722 = vst [vmem:[#allocation97_spill] sm:$0xff] %v8055_v1  ;;  %v671_v42 = vld [vmem:[%s9515_s6 + $0x90] sm:$0xff] }
 0x177   :  { %6300 = vmatprep.subr.bf16.mxu1 %v6299_v17  ;;  %5202 = vmatprep.mubr.msk.f32.mxu1 %vm101_vm0, %v668_v60  ;;  %v8048_v60 = vrot.slane %v7973_v40, %v7295_v0  ;;  %v1247_v0 = vmul.f32 %v7994_v59, %v7572_v50 }
 0x178   :  { %1851 = vmatmul.mubr.f32.gmra.mrb[68].mxu0 %v1484_v31  ;;  %v6367_v12 = vpack.c.bf16 %v1373_v34, %v1372_v21  ;;  %v1374_v31 = vmul.f32 %v8032_v45, %v7578_v33  ;;  %v1339_v21 = vmul.f32 %v8055_v1, %v7560_v3 }
 0x179   :  { %813 = vmatmul.mubr.f32.gmra.mrb[14].mxu1 %v667_v27  ;;  %6330 = vmatpush3.bf16.msra.mxu0 %v6329_v36  ;;  %v1326_v17 = vmul.f32 %v8048_v60, %v7578_v33  ;;  %v1327_v39 = vmul.f32 %v8048_v60, %v7572_v50  ;;  %v1375_v27 = vmul.f32 %v8032_v45, %v7572_v50 }
 0x17a   :  { %6302 = vmatpush3.bf16.msra.mxu1 %v6301_v46  ;;  %6332 = vmatprep.subr.bf16.mxu0 %v6331_v35  ;;  %v8071_v36 = vrot.slane %v7973_v40, %v7704_v37  ;;  %v674_v35 = vld [vmem:[%s9515_s6 + $0xa8] sm:$0xff] }
 0x17b   :  { %6336 = vmatprep.subr.bf16.mxu1 %v6335_v61  ;;  %5203 = vmatprep.mubr.msk.f32.mxu1 %vm101_vm0, %v670_v48  ;;  %v6369_v46 = vpack.c.bf16 %v1327_v39, %v1326_v17  ;;  %v1338_v48 = vmul.f32 %v8055_v1, %v7566_v5  ;;  %v6371_v34 = vpack.c.bf16 %v1375_v27, %v1374_v31 }
 0x17c   :  { %2005 = vmatprep.mubr.f32.mxu0 %v1453_v22  ;;  %9723 = vst [vmem:[#allocation98_spill] sm:$0xff] %v8071_v36  ;;  %v1386_v61 = vmul.f32 %v8071_v36, %v7566_v5  ;;  %v1387_v22 = vmul.f32 %v8071_v36, %v7560_v3  ;;  %v1340_v17 = vmul.f32 %v8055_v1, %v7584_v19 }
 0x17d   :  { %818 = vmatmul.mubr.f32.gmra.mrb[16].mxu1 %v669_v15  ;;  %6334 = vmatpush3.bf16.msra.mxu0 %v6333_v38  ;;  %v1465_v15 = vld [vmem:[#allocation4 + $0x98] sm:$0xff]  ;;  %v1464_v38 = vld [vmem:[#allocation4 + $0x90] sm:$0xff]  ;;  %v6373_v39 = vpack.c.bf16 %v1339_v21, %v1338_v48  ;;  %v1341_v31 = vmul.f32 %v8055_v1, %v7582_v23  ;;  %v1388_v27 = vmul.f32 %v8071_v36, %v7584_v19 }
 0x17e   :  { %6368 = vmatprep.subr.bf16.mxu0 %v6367_v12  ;;  %5204 = vmatprep.mubr.msk.f32.mxu1 %vm101_vm0, %v672_v54  ;;  %v673_v54 = vld [vmem:[%s9515_s6 + $0xa0] sm:$0xff]  ;;  %v676_v12 = vld [vmem:[%s9515_s6 + $0xb8] sm:$0xff]  ;;  %v1476_v48 = vld [vmem:[#allocation4 + $0xf0] sm:$0xff] }
 0x17f   :  { %v675_v21 = vld [vmem:[%s9515_s6 + $0xb0] sm:$0xff] }
 0x180   :  { %2006 = vmatmul.mubr.f32.vlgmr.msra.gmra.mrb[70].mxu0 %v1452_v57  ;;  %v1389_v57 = vmul.f32 %v8071_v36, %v7582_v23 }
 0x181   :  { %823 = vmatmul.mubr.f32.gmra.mrb[18].mxu1 %v671_v42  ;;  %6370 = vmatpush3.bf16.msra.mxu0 %v6369_v46  ;;  %v6375_v42 = vpack.c.bf16 %v1387_v22, %v1386_v61  ;;  %v1477_v46 = vld [vmem:[#allocation4 + $0xf8] sm:$0xff]  ;;  %v1343_v61 = vmul.f32 %v8055_v1, %v7572_v50  ;;  %v8117_v22 = vrot.slane %v7973_v40, %v7742_v58 }
 0x182   :  { %6372 = vmatprep.subr.bf16.mxu0 %v6371_v34  ;;  %5205 = vmatprep.mubr.msk.f32.mxu1 %vm101_vm0, %v674_v35  ;;  %v8105_v35 = vrot.slane %v7973_v40, %v7611_v32  ;;  %v1342_v34 = vmul.f32 %v8055_v1, %v7578_v33  ;;  %v1390_v32 = vmul.f32 %v8071_v36, %v7578_v33 }
 0x183   :  { %2010 = vmatprep.mubr.f32.mxu0 %v1465_v15  ;;  %v6377_v15 = vpack.c.bf16 %v1341_v31, %v1340_v17  ;;  %v1391_v17 = vmul.f32 %v8071_v36, %v7572_v50  ;;  %v1489_v31 = vld [vmem:[#allocation4 + $0x158] sm:$0xff]  ;;  %v1463_v36 = vld [vmem:[#allocation4 + $0x88] sm:$0xff]  ;;  %v1294_v1 = vmul.f32 %v7998_v6, %v7578_v33 }
 0x184   :  { %2011 = vmatmul.mubr.f32.gmra.mrb[72].mxu0 %v1464_v38  ;;  %v6379_v38 = vpack.c.bf16 %v1389_v57, %v1388_v27  ;;  %v8133_v27 = vrot.slane %v7782_v9, %v7704_v37  ;;  %v1488_v57 = vld [vmem:[#allocation4 + $0x150] sm:$0xff]  ;;  %v6381_v2 = vpack.c.bf16 %v1343_v61, %v1342_v34  ;;  %v8149_v37 = vrot.slane %v7973_v40, %v7292_v63  ;;  %v1462_v40 = vld [vmem:[#allocation4 + $0x80] sm:$0xff]  ;;  %v1475_v63 = vld [vmem:[#allocation4 + $0xe8] sm:$0xff] }
 0x185   :  { %828 = vmatmul.mubr.f32.gmra.mrb[20].mxu1 %v673_v54  ;;  %6374 = vmatpush3.bf16.msra.mxu0 %v6373_v39  ;;  %v1451_v54 = vld [vmem:[#allocation4 + $0x28] sm:$0xff]  ;;  %v1244_v39 = vmul.f32 %v7994_v59, %v7584_v19 }
 0x186   :  { %6376 = vmatprep.subr.bf16.mxu0 %v6375_v42  ;;  %5206 = vmatprep.mubr.msk.f32.mxu1 %vm101_vm0, %v676_v12  ;;  %v1245_v12 = vmul.f32 %v7994_v59, %v7582_v23  ;;  %v1292_v42 = vmul.f32 %v7998_v6, %v7584_v19 }
 0x187   :  { %2015 = vmatprep.mubr.f32.mxu0 %v1477_v46  ;;  %v1450_v46 = vld [vmem:[#allocation4 + $0x20] sm:$0xff] }
 0x188   :  { %2016 = vmatmul.mubr.f32.gmra.mrb[74].mxu0 %v1476_v48  ;;  %v1354_v48 = vmul.f32 %v8105_v35, %v7566_v5  ;;  %v6337_v34 = vpack.c.bf16 %v1245_v12, %v1244_v39  ;;  %v6339_v61 = vpack.c.bf16 %v1293_v18, %v1292_v42  ;;  %v1457_v39 = vld [vmem:[#allocation4 + $0x58] sm:$0xff]  ;;  %v1356_v18 = vmul.f32 %v8105_v35, %v7584_v19 }
 0x189   :  { %833 = vmatmul.mubr.f32.gmra.mrb[22].mxu1 %v675_v21  ;;  %6378 = vmatpush3.bf16.msra.mxu0 %v6377_v15  ;;  %v1355_v21 = vmul.f32 %v8105_v35, %v7560_v3  ;;  %v1402_v15 = vmul.f32 %v8117_v22, %v7566_v5  ;;  %v6341_v12 = vpack.c.bf16 %v1247_v0, %v1246_v62  ;;  %v8172_v62 = vmax.f32 %v7627_v51, 0.0 }
 0x18a   :  { %6380 = vmatprep.subr.bf16.mxu0 %v6379_v38  ;;  %1920 = vmatprep.mubr.f32.mxu1 %v1451_v54  ;;  %v1403_v38 = vmul.f32 %v8117_v22, %v7560_v3  ;;  %v6383_v54 = vpack.c.bf16 %v1391_v17, %v1390_v32  ;;  %v1259_v32 = vmul.f32 %v8133_v27, %v7560_v3 }
 0x18b   :  { %2020 = vmatprep.mubr.f32.mxu0 %v1489_v31  ;;  %v1258_v31 = vmul.f32 %v8133_v27, %v7566_v5  ;;  %v6385_v42 = vpack.c.bf16 %v1355_v21, %v1354_v48  ;;  %v1260_v48 = vmul.f32 %v8133_v27, %v7584_v19  ;;  %v1474_v21 = vld [vmem:[#allocation4 + $0xe0] sm:$0xff]  ;;  %v1359_v51 = vmul.f32 %v8105_v35, %v7572_v50 }
 0x18c   :  { %2021 = vmatmul.mubr.f32.gmra.mrb[76].mxu0 %v1488_v57  ;;  %v6387_v17 = vpack.c.bf16 %v1403_v38, %v1402_v15  ;;  %v1306_v57 = vmul.f32 %v8149_v37, %v7566_v5  ;;  %v8177_v15 = vmax.f32 %v7633_v44, 0.0  ;;  %v1261_v38 = vmul.f32 %v8133_v27, %v7582_v23 }
 0x18d   :  { %1921 = vmatmul.mubr.f32.vlgmr.msra.gmra.mrb[24].mxu1 %v1450_v46  ;;  %6382 = vmatpush3.bf16.msra.mxu0 %v6381_v2  ;;  %v1357_v2 = vmul.f32 %v8105_v35, %v7582_v23  ;;  %v1307_v46 = vmul.f32 %v8149_v37, %v7560_v3  ;;  %v6345_v0 = vpack.c.bf16 %v1259_v32, %v1258_v31  ;;  %v1487_v32 = vld [vmem:[#allocation4 + $0x148] sm:$0xff] }
 0x18e   :  { %6338 = vmatpush3.bf16.msra.mxu1 %v6337_v34  ;;  %6384 = vmatprep.subr.bf16.mxu0 %v6383_v54  ;;  %v1404_v34 = vmul.f32 %v8117_v22, %v7584_v19  ;;  %v1405_v54 = vmul.f32 %v8117_v22, %v7582_v23  ;;  %v1407_v44 = vmul.f32 %v8117_v22, %v7572_v50 }
 0x18f   :  { %6340 = vmatprep.subr.bf16.mxu1 %v6339_v61  ;;  %1925 = vmatprep.mubr.f32.mxu1 %v1463_v36  ;;  %v6343_v61 = vpack.c.bf16 %v1295_v25, %v1294_v1  ;;  %v6389_v36 = vpack.c.bf16 %v1357_v2, %v1356_v18  ;;  %v1358_v25 = vmul.f32 %v8105_v35, %v7578_v33 }
 0x190   :  { %2175 = vmatprep.mubr.f32.mxu0 %v1457_v39  ;;  %v6347_v1 = vpack.c.bf16 %v1307_v46, %v1306_v57  ;;  %v6391_v31 = vpack.c.bf16 %v1405_v54, %v1404_v34  ;;  %v1406_v39 = vmul.f32 %v8117_v22, %v7578_v33  ;;  %v1308_v18 = vmul.f32 %v8149_v37, %v7584_v19 }
 0x191   :  { %6386 = vmatpush3.bf16.msra.mxu0 %v6385_v42  ;;  %1926 = vmatmul.mubr.f32.gmra.mrb[26].mxu1 %v1462_v40  ;;  %v1309_v2 = vmul.f32 %v8149_v37, %v7582_v23  ;;  %v1262_v40 = vmul.f32 %v8133_v27, %v7578_v33  ;;  %v1371_v42 = vmul.f32 %v8032_v45, %v7560_v3  ;;  %v8202_v57 = vmax.f32 %v7596_v43, 0.0  ;;  %v1455_v43 = vld [vmem:[#allocation4 + $0x48] sm:$0xff] }
 0x192   :  { %6342 = vmatpush3.bf16.msra.mxu1 %v6341_v12  ;;  %6388 = vmatprep.subr.bf16.mxu0 %v6387_v17  ;;  %v1370_v12 = vmul.f32 %v8032_v45, %v7566_v5  ;;  %v1486_v17 = vld [vmem:[#allocation4 + $0x140] sm:$0xff]  ;;  %v8205_v46 = vmax.f32 %v7598_v49, 0.0  ;;  %v6393_v34 = vpack.c.bf16 %v1359_v51, %v1358_v25  ;;  %v8209_v54 = vrot.slane %v7782_v9, %v7742_v58 }
 0x193   :  { %6344 = vmatprep.subr.bf16.mxu1 %v6343_v61  ;;  %1930 = vmatprep.mubr.f32.mxu1 %v1475_v63  ;;  %v1263_v63 = vmul.f32 %v8133_v27, %v7572_v50  ;;  %v6349_v61 = vpack.c.bf16 %v1261_v38, %v1260_v48  ;;  %v1310_v49 = vmul.f32 %v8149_v37, %v7578_v33  ;;  %v8220_v9 = vmax.f32 %v7608_v56, 0.0 }
 0x194   :  { %v1311_v25 = vmul.f32 %v8149_v37, %v7572_v50  ;;  %v6397_v38 = vpack.c.bf16 %v1371_v42, %v1370_v12  ;;  %v8223_v51 = vmax.f32 %v7613_v53, 0.0  ;;  %v2407_v53 = vmul.f32 %v7570_v8, %v8202_v57 }
 0x195   :  { %6390 = vmatpush3.bf16.msra.mxu0 %v6389_v36  ;;  %1931 = vmatmul.mubr.f32.gmra.mrb[28].mxu1 %v1474_v21  ;;  %v2398_v36 = vmul.f32 %v7576_v47, %v8177_v15  ;;  %v2399_v21 = vmul.f32 %v7576_v47, %v8172_v62  ;;  %v6353_v48 = vpack.c.bf16 %v1263_v63, %v1262_v40  ;;  %v1456_v40 = vld [vmem:[#allocation4 + $0x50] sm:$0xff] }
 0x196   :  { %6346 = vmatpush3.bf16.msra.mxu1 %v6345_v0  ;;  %6392 = vmatprep.subr.bf16.mxu0 %v6391_v31  ;;  %v6395_v0 = vpack.c.bf16 %v1407_v44, %v1406_v39  ;;  %v6351_v31 = vpack.c.bf16 %v1309_v2, %v1308_v18  ;;  %v2370_v39 = vmul.f32 %v7564_v4, %v8205_v46 }
 0x197   :  { %6348 = vmatprep.subr.bf16.mxu1 %v6347_v1  ;;  %1935 = vmatprep.mubr.f32.mxu1 %v1487_v32  ;;  %v1274_v1 = vmul.f32 %v8209_v54, %v7566_v5  ;;  %v2371_v44 = vmul.f32 %v7564_v4, %v8202_v57  ;;  %v6435_v56 = vpack.c.bf16 %v2399_v21, %v2398_v36 }
 0x198   :  { %v1275_v32 = vmul.f32 %v8209_v54, %v7560_v3  ;;  %v2406_v18 = vmul.f32 %v7570_v8, %v8205_v46  ;;  %v6355_v2 = vpack.c.bf16 %v1311_v25, %v1310_v49  ;;  %v1322_v63 = vmul.f32 %v8048_v60, %v7566_v5 }
 0x199   :  { %6394 = vmatpush3.bf16.msra.mxu0 %v6393_v34  ;;  %1936 = vmatmul.mubr.f32.gmra.mrb[30].mxu1 %v1486_v17  ;;  %v1323_v12 = vmul.f32 %v8048_v60, %v7560_v3  ;;  %v1276_v42 = vmul.f32 %v8209_v54, %v7584_v19  ;;  %v1277_v17 = vmul.f32 %v8209_v54, %v7582_v23  ;;  %v1469_v34 = vld [vmem:[#allocation4 + $0xb8] sm:$0xff] }
 0x19a   :  { %6350 = vmatpush3.bf16.msra.mxu1 %v6349_v61  ;;  %6396 = vmatprep.subr.bf16.mxu0 %v6395_v0  ;;  %v6437_v61 = vpack.c.bf16 %v2371_v44, %v2370_v39  ;;  %v2372_v0 = vmul.f32 %v7564_v4, %v8223_v51  ;;  %v2373_v5 = vmul.f32 %v7564_v4, %v8220_v9 }
 0x19b   :  { %6352 = vmatprep.subr.bf16.mxu1 %v6351_v31  ;;  %2090 = vmatprep.mubr.f32.mxu1 %v1455_v43  ;;  %v6357_v36 = vpack.c.bf16 %v1275_v32, %v1274_v1  ;;  %v6439_v3 = vpack.c.bf16 %v2407_v53, %v2406_v18  ;;  %v2408_v21 = vmul.f32 %v7570_v8, %v8223_v51  ;;  %v1481_v1 = vld [vmem:[#allocation4 + $0x118] sm:$0xff] }
 0x19c   :  { %v2409_v43 = vmul.f32 %v7570_v8, %v8220_v9  ;;  %v6359_v31 = vpack.c.bf16 %v1323_v12, %v1322_v63  ;;  %v1324_v49 = vmul.f32 %v8048_v60, %v7584_v19  ;;  %v1325_v25 = vmul.f32 %v8048_v60, %v7582_v23 }
 0x19d   :  { %6398 = vmatpush3.bf16.msra.mxu0 %v6397_v38  ;;  %v6361_v38 = vpack.c.bf16 %v1277_v17, %v1276_v42  ;;  %v6441_v39 = vpack.c.bf16 %v2373_v5, %v2372_v0  ;;  %v1278_v44 = vmul.f32 %v8209_v54, %v7578_v33  ;;  %v2375_v19 = vmul.f32 %v7564_v4, %v8172_v62  ;;  %v1480_v33 = vld [vmem:[#allocation4 + $0x110] sm:$0xff] }
 0x19e   :  { %6354 = vmatpush3.bf16.msra.mxu1 %v6353_v48  ;;  %6436 = vmatprep.subr.bf16.mxu0 %v6435_v56  ;;  %v1468_v48 = vld [vmem:[#allocation4 + $0xb0] sm:$0xff]  ;;  %v2374_v56 = vmul.f32 %v7564_v4, %v8177_v15  ;;  %v6443_v32 = vpack.c.bf16 %v2409_v43, %v2408_v21  ;;  %v1279_v23 = vmul.f32 %v8209_v54, %v7572_v50  ;;  %v1467_v21 = vld [vmem:[#allocation4 + $0xa8] sm:$0xff] }
 0x19f   :  { %6356 = vmatprep.subr.bf16.mxu1 %v6355_v2  ;;  %v2410_v18 = vmul.f32 %v7570_v8, %v8177_v15  ;;  %v2411_v53 = vmul.f32 %v7570_v8, %v8172_v62  ;;  %v6363_v2 = vpack.c.bf16 %v1325_v25, %v1324_v49  ;;  %v2382_v63 = vmul.f32 %v7621_v13, %v8205_v46  ;;  %v2789_v49 = vld [vmem:[#allocation4 + $0x188] sm:$0xff] }
 0x1a0   :  { %2176 = vmatmul.mubr.f32.vlgmr.msra.gmra.mrb[78].mxu0 %v1456_v40  ;;  %v1493_v40 = vld [vmem:[#allocation4 + $0x178] sm:$0xff]  ;;  %v6445_v4 = vpack.c.bf16 %v2375_v19, %v2374_v56  ;;  %v2383_v50 = vmul.f32 %v7621_v13, %v8202_v57  ;;  %v6365_v12 = vpack.c.bf16 %v1279_v23, %v1278_v44  ;;  %v2418_v8 = vmul.f32 %v7631_v16, %v8205_v46  ;;  %v1479_v56 = vld [vmem:[#allocation4 + $0x108] sm:$0xff] }
 0x1a1   :  { %6438 = vmatpush3.bf16.msra.mxu0 %v6437_v61  ;;  %2180 = vmatprep.mubr.f32.mxu0 %v1469_v34  ;;  %v6447_v42 = vpack.c.bf16 %v2411_v53, %v2410_v18  ;;  %v2419_v17 = vmul.f32 %v7631_v16, %v8202_v57  ;;  %v1492_v34 = vld [vmem:[#allocation4 + $0x170] sm:$0xff]  ;;  %v1454_v61 = vld [vmem:[#allocation4 + $0x40] sm:$0xff]  ;;  %v2384_v5 = vmul.f32 %v7621_v13, %v8223_v51 }
 0x1a2   :  { %6358 = vmatpush3.bf16.msra.mxu1 %v6357_v36  ;;  %6440 = vmatprep.subr.bf16.mxu0 %v6439_v3  ;;  %v6449_v0 = vpack.c.bf16 %v2383_v50, %v2382_v63  ;;  %v2385_v36 = vmul.f32 %v7621_v13, %v8220_v9  ;;  %v2420_v43 = vmul.f32 %v7631_v16, %v8223_v51  ;;  %v1490_v50 = vld [vmem:[#allocation4 + $0x160] sm:$0xff] }
 0x1a3   :  { %6360 = vmatprep.subr.bf16.mxu1 %v6359_v31  ;;  %v6451_v3 = vpack.c.bf16 %v2419_v17, %v2418_v8  ;;  %v2421_v31 = vmul.f32 %v7631_v16, %v8220_v9  ;;  %v9724_v25 = vpack.c.bf16 %v7316_v11, %v7325_v14  ;;  %v2422_v19 = vmul.f32 %v7631_v16, %v8177_v15 }
 0x1a4   :  { %2181 = vmatmul.mubr.f32.gmra.mrb[80].mxu0 %v1468_v48  ;;  %v1466_v48 = vld [vmem:[#allocation4 + $0xa0] sm:$0xff]  ;;  %v2423_v11 = vmul.f32 %v7631_v16, %v8172_v62  ;;  %v2394_v14 = vmul.f32 %v7576_v47, %v8205_v46  ;;  %v2395_v23 = vmul.f32 %v7576_v47, %v8202_v57  ;;  %v2430_v18 = vmul.f32 %v7674_v55, %v8205_v46 }
 0x1a5   :  { %6442 = vmatpush3.bf16.msra.mxu0 %v6441_v39  ;;  %2185 = vmatprep.mubr.f32.mxu0 %v1481_v1  ;;  %v2386_v1 = vmul.f32 %v7621_v13, %v8177_v15  ;;  %v2387_v39 = vmul.f32 %v7621_v13, %v8172_v62  ;;  %v6455_v44 = vpack.c.bf16 %v2421_v31, %v2420_v43  ;;  %v1478_v13 = vld [vmem:[#allocation4 + $0x100] sm:$0xff]  ;;  %v9731_v31 = vld [vmem:[#allocation13_spill] sm:$0xff] }
 0x1a6   :  { %6362 = vmatpush3.bf16.msra.mxu1 %v6361_v38  ;;  %6444 = vmatprep.subr.bf16.mxu0 %v6443_v32  ;;  %v6453_v38 = vpack.c.bf16 %v2385_v36, %v2384_v5  ;;  %v9725_v32 = vpack.c.bf16 %v7346_v26, %v7355_v29  ;;  %v2431_v16 = vmul.f32 %v7674_v55, %v8202_v57  ;;  %v9730_v43 = vld [vmem:[#allocation11_spill] sm:$0xff] }
 0x1a7   :  { %6364 = vmatprep.subr.bf16.mxu1 %v6363_v2  ;;  %v6457_v53 = vpack.c.bf16 %v2387_v39, %v2386_v1  ;;  %v6459_v2 = vpack.c.bf16 %v2423_v11, %v2422_v19  ;;  %v2396_v26 = vmul.f32 %v7576_v47, %v8223_v51  ;;  %v2397_v29 = vmul.f32 %v7576_v47, %v8220_v9  ;;  %v2788_v19 = vld [vmem:[#allocation4 + $0x180] sm:$0xff] }
 0x1a8   :  { %2186 = vmatmul.mubr.f32.gmra.mrb[82].mxu0 %v1480_v33  ;;  %v1491_v33 = vld [vmem:[#allocation4 + $0x168] sm:$0xff]  ;;  %v2528_v8 = vmul.f32 %v7790_v28, %v8223_v51  ;;  %v2529_v17 = vmul.f32 %v7790_v28, %v8220_v9  ;;  %v2531_v5 = vmul.f32 %v7790_v28, %v8172_v62  ;;  %v2502_v36 = vmul.f32 %v7828_v10, %v8205_v46 }
 0x1a9   :  { %6446 = vmatpush3.bf16.msra.mxu0 %v6445_v4  ;;  %2190 = vmatprep.mubr.f32.mxu0 %v1493_v40  ;;  %v9726_v40 = vld [vmem:[#allocation23_spill] sm:$0xff]  ;;  %v9727_v4 = vld [vmem:[#allocation26_spill] sm:$0xff]  ;;  %v2504_v11 = vmul.f32 %v7828_v10, %v8223_v51 }
 0x1aa   :  { %6366 = vmatpush3.bf16.msra.mxu1 %v6365_v12  ;;  %6448 = vmatprep.subr.bf16.mxu0 %v6447_v42  ;;  %v9728_v63 = vpack.c.bf16 %v9726_v40, %v9727_v4  ;;  %v6461_v12 = vpack.c.bf16 %v2395_v23, %v2394_v14  ;;  %v6463_v42 = vpack.c.bf16 %v2431_v16, %v2430_v18  ;;  %v9733_v14 = vld [vmem:[#allocation35_spill] sm:$0xff]  ;;  %v2813_v16 = vld [vmem:[#allocation4 + $0x248] sm:$0xff] }
 0x1ab   :  { %6399 = vmatprep.subr.bf16.mxu1 %v9713_v24  ;;  %v6499_v1 = vpack.c.bf16 %v2529_v17, %v2528_v8  ;;  %v9735_v23 = vld [vmem:[#allocation43_spill] sm:$0xff]  ;;  %v9744_v17 = vld [vmem:[#allocation44_spill] sm:$0xff] }
 0x1ac   :  { %2191 = vmatmul.mubr.f32.gmra.mrb[84].mxu0 %v1492_v34  ;;  %v9729_v34 = vld [vmem:[#allocation93_spill] sm:$0xff]  ;;  %v9736_v18 = vld [vmem:[#allocation39_spill] sm:$0xff] }
 0x1ad   :  { %2091 = vmatmul.mubr.f32.vlgmr.msra.gmra.mrb[32].mxu1 %v1454_v61  ;;  %6450 = vmatpush3.bf16.msra.mxu0 %v6449_v0  ;;  %v2494_v47 = vmul.f32 %v9729_v34, %v8177_v15  ;;  %v2495_v61 = vmul.f32 %v9729_v34, %v8172_v62  ;;  %v2530_v0 = vmul.f32 %v7790_v28, %v8177_v15 }
 0x1ae   :  { %6401 = vmatpush1.bf16.msra.mxu1 %v9724_v25  ;;  %6452 = vmatprep.subr.bf16.mxu0 %v6451_v3  ;;  %v2503_v3 = vmul.f32 %v7828_v10, %v8202_v57  ;;  %v2538_v25 = vmul.f32 %v7836_v52, %v8205_v46 }
 0x1af   :  { %2095 = vmatprep.mubr.f32.mxu1 %v1467_v21  ;;  %6402 = vmatprep.subr.bf16.mxu1 %v9713_v24  ;;  %v1415_v21 = vld [vmem:[%s9513_s4 + $0x8] sm:$0xff]  ;;  %v6501_v39 = vpack.c.bf16 %v2495_v61, %v2494_v47 }
 0x1b0   :  { %3092 = vmatprep.mubr.f32.mxu0 %v2789_v49  ;;  %v9732_v49 = vpack.c.bf16 %v9730_v43, %v9731_v31  ;;  %v9745_v47 = vld [vmem:[#allocation40_spill] sm:$0xff]  ;;  %v2541_v43 = vmul.f32 %v7836_v52, %v8220_v9  ;;  %v2435_v31 = vmul.f32 %v7674_v55, %v8172_v62 }
 0x1b1   :  { %2096 = vmatmul.mubr.f32.gmra.mrb[34].mxu1 %v1466_v48  ;;  %6454 = vmatpush3.bf16.msra.mxu0 %v6453_v38  ;;  %v2539_v48 = vmul.f32 %v7836_v52, %v8202_v57  ;;  %v6465_v38 = vpack.c.bf16 %v2397_v29, %v2396_v26  ;;  %v9739_v26 = vld [vmem:[#allocation17_spill] sm:$0xff]  ;;  %v9740_v29 = vld [vmem:[#allocation19_spill] sm:$0xff] }
 0x1b2   :  { %6404 = vmatpush1.bf16.msra.mxu1 %v9725_v32  ;;  %6456 = vmatprep.subr.bf16.mxu0 %v6455_v44  ;;  %v6503_v44 = vpack.c.bf16 %v2531_v5, %v2530_v0  ;;  %v9734_v32 = vld [vmem:[#allocation31_spill] sm:$0xff]  ;;  %v9741_v40 = vpack.c.bf16 %v9739_v26, %v9740_v29  ;;  %v9746_v0 = vld [vmem:[#allocation52_spill] sm:$0xff]  ;;  %v9755_v29 = vld [vmem:[#allocation34_spill] sm:$0xff] }
 0x1b3   :  { %2100 = vmatprep.mubr.f32.mxu1 %v1479_v56  ;;  %6405 = vmatprep.subr.bf16.mxu1 %v9713_v24  ;;  %v6505_v56 = vpack.c.bf16 %v2503_v3, %v2502_v36  ;;  %v6507_v4 = vpack.c.bf16 %v2539_v48, %v2538_v25  ;;  %v9747_v5 = vld [vmem:[#allocation48_spill] sm:$0xff]  ;;  %v2800_v36 = vld [vmem:[#allocation4 + $0x1e0] sm:$0xff]  ;;  %v2434_v48 = vmul.f32 %v7674_v55, %v8177_v15 }
 0x1b5   :  { %2101 = vmatmul.mubr.f32.gmra.mrb[36].mxu1 %v1478_v13  ;;  %6458 = vmatpush3.bf16.msra.mxu0 %v6457_v53  ;;  %v9737_v53 = vld [vmem:[#allocation51_spill] sm:$0xff]  ;;  %v2540_v13 = vmul.f32 %v7836_v52, %v8223_v51 }
 0x1b6   :  { %6407 = vmatpush1.bf16.msra.mxu1 %v9728_v63  ;;  %6460 = vmatprep.subr.bf16.mxu0 %v6459_v2  ;;  %v9738_v2 = vld [vmem:[#allocation47_spill] sm:$0xff]  ;;  %v2505_v63 = vmul.f32 %v7828_v10, %v8220_v9 }
 0x1b7   :  { %2105 = vmatprep.mubr.f32.mxu1 %v1491_v33  ;;  %6408 = vmatprep.subr.bf16.mxu1 %v9713_v24  ;;  %v6511_v33 = vpack.c.bf16 %v2541_v43, %v2540_v13  ;;  %v2514_v13 = vmul.f32 %v7849_v20, %v8205_v46  ;;  %v2515_v43 = vmul.f32 %v7849_v20, %v8202_v57 }
 0x1b9   :  { %2106 = vmatmul.mubr.f32.gmra.mrb[38].mxu1 %v1490_v50  ;;  %6462 = vmatpush3.bf16.msra.mxu0 %v6461_v12  ;;  %v2801_v50 = vld [vmem:[#allocation4 + $0x1e8] sm:$0xff] }
 0x1ba   :  { %6410 = vmatpush1.bf16.msra.mxu1 %v9732_v49  ;;  %6464 = vmatprep.subr.bf16.mxu0 %v6463_v42  ;;  %v9742_v12 = vld [vmem:[#allocation36_spill] sm:$0xff] }
 0x1bb   :  { %6411 = vmatprep.subr.bf16.mxu1 %v9713_v24  ;;  %5207 = vmatprep.mubr.msk.f32.mxu1 %vm2196_vm1, %v1415_v21  ;;  %v9743_v42 = vld [vmem:[#allocation32_spill] sm:$0xff]  ;;  %v2663_v21 = vmul.f32 %v7998_v6, %v8172_v62 }
 0x1bd   :  { %6466 = vmatpush3.bf16.msra.mxu0 %v6465_v38  ;;  %v9766_v38 = vld [vmem:[#allocation24_spill] sm:$0xff] }
 0x1be   :  { %6413 = vmatpush1.bf16.msra.mxu1 %v9741_v40  ;;  %6500 = vmatprep.subr.bf16.mxu0 %v6499_v1  ;;  %v9767_v40 = vld [vmem:[#allocation27_spill] sm:$0xff] }
 0x1bf   :  { %6414 = vmatprep.subr.bf16.mxu1 %v9713_v24  ;;  %v9768_v26 = vpack.c.bf16 %v9766_v38, %v9767_v40  ;;  %v2812_v38 = vld [vmem:[#allocation4 + $0x240] sm:$0xff]  ;;  %v9787_v40 = vld [vmem:[#allocation12_spill] sm:$0xff] }
 0x1c0   :  { %3093 = vmatmul.mubr.f32.vlgmr.msra.gmra.mrb[86].mxu0 %v2788_v19  ;;  %v6509_v19 = vpack.c.bf16 %v2505_v63, %v2504_v11  ;;  %v2793_v63 = vld [vmem:[#allocation4 + $0x1a8] sm:$0xff] }
 0x1c1   :  { %6502 = vmatpush3.bf16.msra.mxu0 %v6501_v39  ;;  %3097 = vmatprep.mubr.f32.mxu0 %v2801_v50  ;;  %v2825_v39 = vld [vmem:[#allocation4 + $0x2a8] sm:$0xff]  ;;  %v2507_v50 = vmul.f32 %v7828_v10, %v8172_v62 }
 0x1c2   :  { %6416 = vmatpush1.bf16.msra.mxu1 %v9768_v26  ;;  %6504 = vmatprep.subr.bf16.mxu0 %v6503_v44  ;;  %v9788_v26 = vld [vmem:[#allocation14_spill] sm:$0xff] }
 0x1c3   :  { %6417 = vmatprep.subr.bf16.mxu1 %v9713_v24  ;;  %v9789_v44 = vpack.c.bf16 %v9787_v40, %v9788_v26  ;;  %v9790_v26 = vld [vmem:[#allocation18_spill] sm:$0xff] }
 0x1c4   :  { %3098 = vmatmul.mubr.f32.gmra.mrb[88].mxu0 %v2800_v36  ;;  %v2506_v36 = vmul.f32 %v7828_v10, %v8177_v15 }
 0x1c5   :  { %6506 = vmatpush3.bf16.msra.mxu0 %v6505_v56  ;;  %3102 = vmatprep.mubr.f32.mxu0 %v2813_v16  ;;  %v2542_v56 = vmul.f32 %v7836_v52, %v8177_v15  ;;  %v2543_v16 = vmul.f32 %v7836_v52, %v8172_v62 }
 0x1c6   :  { %6419 = vmatpush1.bf16.msra.mxu1 %v9789_v44  ;;  %6508 = vmatprep.subr.bf16.mxu0 %v6507_v4  ;;  %v2824_v4 = vld [vmem:[#allocation4 + $0x2a0] sm:$0xff]  ;;  %v9791_v44 = vld [vmem:[#allocation20_spill] sm:$0xff]  ;;  %v6513_v10 = vpack.c.bf16 %v2507_v50, %v2506_v36  ;;  %v6517_v50 = vpack.c.bf16 %v2515_v43, %v2514_v13  ;;  %v2516_v36 = vmul.f32 %v7849_v20, %v8223_v51 }
 0x1c7   :  { %6420 = vmatprep.subr.bf16.mxu1 %v9713_v24  ;;  %v9792_v11 = vpack.c.bf16 %v9790_v26, %v9791_v44  ;;  %v6515_v52 = vpack.c.bf16 %v2543_v16, %v2542_v56  ;;  %v2517_v56 = vmul.f32 %v7849_v20, %v8220_v9  ;;  %v2553_v26 = vmul.f32 %v7897_v7, %v8220_v9  ;;  %v9796_v44 = vld [vmem:[#allocation15_spill] sm:$0xff] }
 0x1c8   :  { %3103 = vmatmul.mubr.f32.gmra.mrb[90].mxu0 %v2812_v38  ;;  %v9794_v38 = vld [vmem:[#allocation28_spill] sm:$0xff]  ;;  %v2519_v13 = vmul.f32 %v7849_v20, %v8172_v62 }
 0x1c9   :  { %6510 = vmatpush3.bf16.msra.mxu0 %v6509_v19  ;;  %3107 = vmatprep.mubr.f32.mxu0 %v2825_v39  ;;  %v2550_v19 = vmul.f32 %v7897_v7, %v8205_v46  ;;  %v2551_v39 = vmul.f32 %v7897_v7, %v8202_v57  ;;  %v6521_v43 = vpack.c.bf16 %v2517_v56, %v2516_v36  ;;  %v9800_v36 = vld [vmem:[#allocation21_spill] sm:$0xff]  ;;  %v9801_v56 = vld [vmem:[#allocation22_spill] sm:$0xff] }
 0x1ca   :  { %6422 = vmatpush1.bf16.msra.mxu1 %v9792_v11  ;;  %6512 = vmatprep.subr.bf16.mxu0 %v6511_v33  ;;  %v9793_v33 = vld [vmem:[#allocation25_spill] sm:$0xff]  ;;  %v9797_v11 = vld [vmem:[#allocation16_spill] sm:$0xff] }
 0x1cb   :  { %6423 = vmatprep.subr.bf16.mxu1 %v9713_v24  ;;  %v9795_v40 = vpack.c.bf16 %v9793_v33, %v9794_v38  ;;  %v6519_v16 = vpack.c.bf16 %v2551_v39, %v2550_v19  ;;  %v2554_v19 = vmul.f32 %v7897_v7, %v8177_v15  ;;  %v2555_v39 = vmul.f32 %v7897_v7, %v8172_v62  ;;  %v9799_v33 = vld [vmem:[#allocation87_spill] sm:$0xff] }
 0x1cc   :  { %3108 = vmatmul.mubr.f32.gmra.mrb[92].mxu0 %v2824_v4  ;;  %v2552_v4 = vmul.f32 %v7897_v7, %v8223_v51  ;;  %v2466_v38 = vmul.f32 %v9799_v33, %v8205_v46  ;;  %v2526_v7 = vmul.f32 %v7790_v28, %v8205_v46 }
 0x1cd   :  { %6514 = vmatpush3.bf16.msra.mxu0 %v6513_v10  ;;  %3262 = vmatprep.mubr.f32.mxu0 %v2793_v63  ;;  %v9798_v63 = vpack.c.bf16 %v9796_v44, %v9797_v11  ;;  %v2518_v10 = vmul.f32 %v7849_v20, %v8177_v15  ;;  %v2432_v20 = vmul.f32 %v7674_v55, %v8223_v51 }
 0x1ce   :  { %6425 = vmatpush1.bf16.msra.mxu1 %v9795_v40  ;;  %6516 = vmatprep.subr.bf16.mxu0 %v6515_v52  ;;  %v6523_v52 = vpack.c.bf16 %v2553_v26, %v2552_v4  ;;  %v2467_v40 = vmul.f32 %v9799_v33, %v8202_v57  ;;  %v2527_v26 = vmul.f32 %v7790_v28, %v8202_v57  ;;  %v9804_v28 = vld [vmem:[#allocation30_spill] sm:$0xff] }
 0x1cf   :  { %6426 = vmatprep.subr.bf16.mxu1 %v9713_v24  ;;  %v6525_v4 = vpack.c.bf16 %v2519_v13, %v2518_v10  ;;  %v2468_v44 = vmul.f32 %v9799_v33, %v8223_v51  ;;  %v2469_v11 = vmul.f32 %v9799_v33, %v8220_v9  ;;  %v2659_v10 = vmul.f32 %v7998_v6, %v8202_v57 }
 0x1d0   :  { %v6527_v13 = vpack.c.bf16 %v2555_v39, %v2554_v19  ;;  %v6529_v25 = vpack.c.bf16 %v2527_v26, %v2526_v7  ;;  %v2661_v7 = vmul.f32 %v7998_v6, %v8220_v9  ;;  %v2792_v26 = vld [vmem:[#allocation4 + $0x1a0] sm:$0xff] }
 0x1d1   :  { %6518 = vmatpush3.bf16.msra.mxu0 %v6517_v50  ;;  %v2433_v50 = vmul.f32 %v7674_v55, %v8220_v9  ;;  %v6471_v19 = vpack.c.bf16 %v2469_v11, %v2468_v44  ;;  %v2660_v55 = vmul.f32 %v7998_v6, %v8223_v51  ;;  %v9806_v44 = vld [vmem:[#allocation89_spill] sm:$0xff] }
 0x1d2   :  { %6428 = vmatpush1.bf16.msra.mxu1 %v9798_v63  ;;  %6520 = vmatprep.subr.bf16.mxu0 %v6519_v16  ;;  %v9802_v16 = vpack.c.bf16 %v9800_v36, %v9801_v56  ;;  %v2658_v63 = vmul.f32 %v7998_v6, %v8205_v46  ;;  %v9803_v36 = vld [vmem:[#allocation29_spill] sm:$0xff]  ;;  %v2442_v11 = vmul.f32 %v9806_v44, %v8205_v46 }
 0x1d3   :  { %6429 = vmatprep.subr.bf16.mxu1 %v9713_v24  ;;  %v9805_v56 = vpack.c.bf16 %v9803_v36, %v9804_v28 }
 0x1d4   :  { %v6563_v39 = vpack.c.bf16 %v2659_v10, %v2658_v63  ;;  %v2443_v63 = vmul.f32 %v9806_v44, %v8202_v57  ;;  %v2626_v10 = vmul.f32 %v7994_v59, %v8177_v15 }
 0x1d5   :  { %6522 = vmatpush3.bf16.msra.mxu0 %v6521_v43  ;;  %v6467_v43 = vpack.c.bf16 %v2467_v40, %v2466_v38  ;;  %v2624_v38 = vmul.f32 %v7994_v59, %v8223_v51  ;;  %v2625_v40 = vmul.f32 %v7994_v59, %v8220_v9 }
 0x1d6   :  { %6431 = vmatpush1.bf16.msra.mxu1 %v9802_v16  ;;  %6524 = vmatprep.subr.bf16.mxu0 %v6523_v52  ;;  %v6469_v52 = vpack.c.bf16 %v2433_v50, %v2432_v20  ;;  %v1414_v16 = vld [vmem:[%s9513_s4] sm:$0xff]  ;;  %v1417_v20 = vld [vmem:[%s9513_s4 + $0x18] sm:$0xff]  ;;  %v2470_v50 = vmul.f32 %v9799_v33, %v8177_v15 }
 0x1d7   :  { %6432 = vmatprep.subr.bf16.mxu1 %v9713_v24  ;;  %v6565_v28 = vpack.c.bf16 %v2625_v40, %v2624_v38 }
 0x1d9   :  { %6526 = vmatpush3.bf16.msra.mxu0 %v6525_v4  ;;  %v2471_v4 = vmul.f32 %v9799_v33, %v8172_v62  ;;  %v1416_v33 = vld [vmem:[%s9513_s4 + $0x10] sm:$0xff] }
 0x1da   :  { %6434 = vmatpush1.bf16.msra.mxu1 %v9805_v56  ;;  %6528 = vmatprep.subr.bf16.mxu0 %v6527_v13  ;;  %v2627_v13 = vmul.f32 %v7994_v59, %v8172_v62  ;;  %v6473_v56 = vpack.c.bf16 %v2435_v31, %v2434_v48  ;;  %v1418_v31 = vld [vmem:[%s9513_s4 + $0x20] sm:$0xff]  ;;  %v6477_v48 = vpack.c.bf16 %v2443_v63, %v2442_v11 }
 0x1db   :  { %6468 = vmatprep.subr.bf16.mxu1 %v6467_v43  ;;  %v6475_v3 = vpack.c.bf16 %v2471_v4, %v2470_v50  ;;  %v2635_v50 = vmul.f32 %v8133_v27, %v8202_v57  ;;  %v2446_v63 = vmul.f32 %v9806_v44, %v8177_v15 }
 0x1dc   :  { %v6569_v38 = vpack.c.bf16 %v2627_v13, %v2626_v10  ;;  %v2804_v10 = vld [vmem:[#allocation4 + $0x200] sm:$0xff]  ;;  %v2447_v13 = vmul.f32 %v9806_v44, %v8172_v62 }
 0x1dd   :  { %2274 = vmatmul.mubr.f32.vlgmr.msra.gmra.mrb[0].mxu1 %v1414_v16  ;;  %6530 = vmatpush3.bf16.msra.mxu0 %v6529_v25  ;;  %v9807_v25 = vld [vmem:[#allocation90_spill] sm:$0xff]  ;;  %v1419_v16 = vld [vmem:[%s9513_s4 + $0x28] sm:$0xff] }
 0x1de   :  { %6470 = vmatpush3.bf16.msra.mxu1 %v6469_v52  ;;  %6564 = vmatprep.subr.bf16.mxu0 %v6563_v39  ;;  %v2478_v43 = vmul.f32 %v9807_v25, %v8205_v46  ;;  %v2479_v36 = vmul.f32 %v9807_v25, %v8202_v57  ;;  %v6567_v52 = vpack.c.bf16 %v2661_v7, %v2660_v55  ;;  %v1421_v55 = vld [vmem:[%s9513_s4 + $0x38] sm:$0xff] }
 0x1df   :  { %6472 = vmatprep.subr.bf16.mxu1 %v6471_v19  ;;  %5208 = vmatprep.mubr.msk.f32.mxu1 %vm2196_vm1, %v1417_v20  ;;  %v2662_v39 = vmul.f32 %v7998_v6, %v8177_v15  ;;  %v2805_v19 = vld [vmem:[#allocation4 + $0x208] sm:$0xff]  ;;  %v2444_v20 = vmul.f32 %v9806_v44, %v8223_v51  ;;  %v2634_v6 = vmul.f32 %v8133_v27, %v8205_v46 }
 0x1e0   :  { %3263 = vmatmul.mubr.f32.vlgmr.msra.gmra.mrb[94].mxu0 %v2792_v26  ;;  %v6479_v40 = vpack.c.bf16 %v2479_v36, %v2478_v43  ;;  %v2445_v7 = vmul.f32 %v9806_v44, %v8220_v9  ;;  %v2671_v26 = vmul.f32 %v8149_v37, %v8202_v57  ;;  %v2480_v11 = vmul.f32 %v9807_v25, %v8223_v51 }
 0x1e1   :  { %2279 = vmatmul.mubr.f32.gmra.mrb[2].mxu1 %v1416_v33  ;;  %6566 = vmatpush3.bf16.msra.mxu0 %v6565_v28  ;;  %v6571_v4 = vpack.c.bf16 %v2663_v21, %v2662_v39  ;;  %v2481_v21 = vmul.f32 %v9807_v25, %v8220_v9  ;;  %v1420_v33 = vld [vmem:[%s9513_s4 + $0x30] sm:$0xff]  ;;  %v2636_v43 = vmul.f32 %v8133_v27, %v8223_v51 }
 0x1e2   :  { %6474 = vmatpush3.bf16.msra.mxu1 %v6473_v56  ;;  %6568 = vmatprep.subr.bf16.mxu0 %v6567_v52  ;;  %v2637_v36 = vmul.f32 %v8133_v27, %v8220_v9  ;;  %v6573_v28 = vpack.c.bf16 %v2635_v50, %v2634_v6  ;;  %v6481_v56 = vpack.c.bf16 %v2445_v7, %v2444_v20  ;;  %v9808_v6 = vld [vmem:[#allocation92_spill] sm:$0xff] }
 0x1e3   :  { %6476 = vmatprep.subr.bf16.mxu1 %v6475_v3  ;;  %5209 = vmatprep.mubr.msk.f32.mxu1 %vm2196_vm1, %v1419_v16  ;;  %v2670_v3 = vmul.f32 %v8149_v37, %v8205_v46  ;;  %v2672_v16 = vmul.f32 %v8149_v37, %v8223_v51  ;;  %v2673_v39 = vmul.f32 %v8149_v37, %v8220_v9 }
 0x1e4   :  { %3267 = vmatprep.mubr.f32.mxu0 %v2805_v19  ;;  %v2791_v19 = vld [vmem:[#allocation4 + $0x198] sm:$0xff]  ;;  %v6483_v44 = vpack.c.bf16 %v2481_v21, %v2480_v11  ;;  %v6577_v20 = vpack.c.bf16 %v2637_v36, %v2636_v43  ;;  %v2454_v50 = vmul.f32 %v9808_v6, %v8205_v46  ;;  %v2816_v11 = vld [vmem:[#allocation4 + $0x260] sm:$0xff]  ;;  %v2647_v43 = vmul.f32 %v8209_v54, %v8202_v57 }
 0x1e5   :  { %2284 = vmatmul.mubr.f32.gmra.mrb[4].mxu1 %v1418_v31  ;;  %6570 = vmatpush3.bf16.msra.mxu0 %v6569_v38  ;;  %v6575_v52 = vpack.c.bf16 %v2671_v26, %v2670_v3  ;;  %v2482_v31 = vmul.f32 %v9807_v25, %v8177_v15  ;;  %v2817_v38 = vld [vmem:[#allocation4 + $0x268] sm:$0xff]  ;;  %v6579_v7 = vpack.c.bf16 %v2673_v39, %v2672_v16  ;;  %v2828_v39 = vld [vmem:[#allocation4 + $0x2c0] sm:$0xff] }
 0x1e6   :  { %6478 = vmatpush3.bf16.msra.mxu1 %v6477_v48  ;;  %6572 = vmatprep.subr.bf16.mxu0 %v6571_v4  ;;  %v2483_v48 = vmul.f32 %v9807_v25, %v8172_v62  ;;  %v2638_v4 = vmul.f32 %v8133_v27, %v8177_v15  ;;  %v2455_v25 = vmul.f32 %v9808_v6, %v8202_v57 }
 0x1e7   :  { %6480 = vmatprep.subr.bf16.mxu1 %v6479_v40  ;;  %5210 = vmatprep.mubr.msk.f32.mxu1 %vm2196_vm1, %v1421_v55  ;;  %v6485_v40 = vpack.c.bf16 %v2447_v13, %v2446_v63  ;;  %v2639_v55 = vmul.f32 %v8133_v27, %v8172_v62  ;;  %v2674_v3 = vmul.f32 %v8149_v37, %v8177_v15 }
 0x1e8   :  { %3268 = vmatmul.mubr.f32.gmra.mrb[96].mxu0 %v2804_v10  ;;  %v2675_v26 = vmul.f32 %v8149_v37, %v8172_v62  ;;  %v6487_v21 = vpack.c.bf16 %v2483_v48, %v2482_v31  ;;  %v2490_v63 = vmul.f32 %v9729_v34, %v8205_v46  ;;  %v2491_v27 = vmul.f32 %v9729_v34, %v8202_v57  ;;  %v2797_v48 = vld [vmem:[#allocation4 + $0x1c8] sm:$0xff] }
 0x1e9   :  { %2289 = vmatmul.mubr.f32.gmra.mrb[6].mxu1 %v1420_v33  ;;  %6574 = vmatpush3.bf16.msra.mxu0 %v6573_v28  ;;  %v2456_v10 = vmul.f32 %v9808_v6, %v8223_v51  ;;  %v2829_v33 = vld [vmem:[#allocation4 + $0x2c8] sm:$0xff]  ;;  %v2457_v13 = vmul.f32 %v9808_v6, %v8220_v9  ;;  %v2646_v37 = vmul.f32 %v8209_v54, %v8205_v46 }
 0x1ea   :  { %6482 = vmatpush3.bf16.msra.mxu1 %v6481_v56  ;;  %6576 = vmatprep.subr.bf16.mxu0 %v6575_v52  ;;  %v6581_v36 = vpack.c.bf16 %v2639_v55, %v2638_v4  ;;  %v6489_v28 = vpack.c.bf16 %v2455_v25, %v2454_v50  ;;  %v6583_v56 = vpack.c.bf16 %v2675_v26, %v2674_v3 }
 0x1eb   :  { %6484 = vmatprep.subr.bf16.mxu1 %v6483_v44  ;;  %3177 = vmatprep.mubr.f32.mxu1 %v2791_v19  ;;  %v2682_v52 = vmul.f32 %v8048_v60, %v8205_v46  ;;  %v2683_v16 = vmul.f32 %v8048_v60, %v8202_v57  ;;  %v6491_v19 = vpack.c.bf16 %v2491_v27, %v2490_v63 }
 0x1ec   :  { %3272 = vmatprep.mubr.f32.mxu0 %v2817_v38  ;;  %v2492_v44 = vmul.f32 %v9729_v34, %v8223_v51  ;;  %v2493_v31 = vmul.f32 %v9729_v34, %v8220_v9  ;;  %v6493_v38 = vpack.c.bf16 %v2457_v13, %v2456_v10  ;;  %v2648_v50 = vmul.f32 %v8209_v54, %v8223_v51 }
 0x1ed   :  { %6578 = vmatpush3.bf16.msra.mxu0 %v6577_v20  ;;  %v2458_v20 = vmul.f32 %v9808_v6, %v8177_v15  ;;  %v2649_v4 = vmul.f32 %v8209_v54, %v8220_v9  ;;  %v6587_v55 = vpack.c.bf16 %v2683_v16, %v2682_v52  ;;  %v2459_v34 = vmul.f32 %v9808_v6, %v8172_v62  ;;  %v2803_v52 = vld [vmem:[#allocation4 + $0x1f8] sm:$0xff] }
 0x1ee   :  { %6486 = vmatpush3.bf16.msra.mxu1 %v6485_v40  ;;  %6580 = vmatprep.subr.bf16.mxu0 %v6579_v7  ;;  %v6585_v40 = vpack.c.bf16 %v2647_v43, %v2646_v37  ;;  %v2684_v7 = vmul.f32 %v8048_v60, %v8223_v51  ;;  %v2685_v25 = vmul.f32 %v8048_v60, %v8220_v9  ;;  %v9809_v43 = vld [vmem:[#allocation94_spill] sm:$0xff] }
 0x1ef   :  { %6488 = vmatprep.subr.bf16.mxu1 %v6487_v21  ;;  %3273 = vmatmul.mubr.f32.gmra.mrb[98].mxu0 %v2816_v11  ;;  %v6495_v3 = vpack.c.bf16 %v2493_v31, %v2492_v44  ;;  %v2590_v26 = vmul.f32 %v7797_v30, %v8177_v15  ;;  %v2591_v11 = vmul.f32 %v7797_v30, %v8172_v62 }
 0x1f0   :  { %3277 = vmatprep.mubr.f32.mxu0 %v2829_v33  ;;  %v6589_v21 = vpack.c.bf16 %v2649_v4, %v2648_v50  ;;  %v2650_v6 = vmul.f32 %v8209_v54, %v8177_v15  ;;  %v2651_v63 = vmul.f32 %v8209_v54, %v8172_v62  ;;  %v6497_v27 = vpack.c.bf16 %v2459_v34, %v2458_v20  ;;  %v2809_v20 = vld [vmem:[#allocation4 + $0x228] sm:$0xff]  ;;  %v2815_v50 = vld [vmem:[#allocation4 + $0x258] sm:$0xff] }
 0x1f1   :  { %6582 = vmatpush3.bf16.msra.mxu0 %v6581_v36  ;;  %v6591_v10 = vpack.c.bf16 %v2685_v25, %v2684_v7  ;;  %v2562_v33 = vmul.f32 %v7801_v41, %v8205_v46  ;;  %v2563_v13 = vmul.f32 %v7801_v41, %v8202_v57  ;;  %v6531_v37 = vpack.c.bf16 %v2591_v11, %v2590_v26  ;;  %v2808_v26 = vld [vmem:[#allocation4 + $0x220] sm:$0xff]  ;;  %v2814_v11 = vld [vmem:[#allocation4 + $0x250] sm:$0xff] }
 0x1f2   :  { %6490 = vmatpush3.bf16.msra.mxu1 %v6489_v28  ;;  %6584 = vmatprep.subr.bf16.mxu0 %v6583_v56  ;;  %v2598_v36 = vmul.f32 %v9809_v43, %v8205_v46  ;;  %v2599_v28 = vmul.f32 %v9809_v43, %v8202_v57  ;;  %v2790_v56 = vld [vmem:[#allocation4 + $0x190] sm:$0xff]  ;;  %v6593_v54 = vpack.c.bf16 %v2651_v63, %v2650_v6  ;;  %v2827_v6 = vld [vmem:[#allocation4 + $0x2b8] sm:$0xff] }
 0x1f3   :  { %6492 = vmatprep.subr.bf16.mxu1 %v6491_v19  ;;  %3278 = vmatmul.mubr.f32.gmra.mrb[100].mxu0 %v2828_v39  ;;  %v6533_v16 = vpack.c.bf16 %v2563_v13, %v2562_v33  ;;  %v2564_v39 = vmul.f32 %v7801_v41, %v8223_v51  ;;  %v2565_v19 = vmul.f32 %v7801_v41, %v8220_v9  ;;  %v9811_v13 = vld [vmem:[#allocation96_spill] sm:$0xff] }
 0x1f4   :  { %3432 = vmatprep.mubr.f32.mxu0 %v2797_v48  ;;  %v6535_v44 = vpack.c.bf16 %v2599_v28, %v2598_v36  ;;  %v2600_v31 = vmul.f32 %v9809_v43, %v8223_v51  ;;  %v2601_v48 = vmul.f32 %v9809_v43, %v8220_v9  ;;  %v2567_v34 = vmul.f32 %v7801_v41, %v8172_v62  ;;  %v2820_v36 = vld [vmem:[#allocation4 + $0x280] sm:$0xff]  ;;  %v2826_v28 = vld [vmem:[#allocation4 + $0x2b0] sm:$0xff] }
 0x1f5   :  { %6586 = vmatpush3.bf16.msra.mxu0 %v6585_v40  ;;  %v2802_v40 = vld [vmem:[#allocation4 + $0x1f0] sm:$0xff]  ;;  %v6537_v4 = vpack.c.bf16 %v2565_v19, %v2564_v39  ;;  %v2602_v25 = vmul.f32 %v9809_v43, %v8177_v15 }
 0x1f6   :  { %6494 = vmatpush3.bf16.msra.mxu1 %v6493_v38  ;;  %6588 = vmatprep.subr.bf16.mxu0 %v6587_v55  ;;  %v2796_v38 = vld [vmem:[#allocation4 + $0x1c0] sm:$0xff]  ;;  %v2566_v55 = vmul.f32 %v7801_v41, %v8177_v15  ;;  %v6539_v7 = vpack.c.bf16 %v2601_v48, %v2600_v31  ;;  %v2613_v31 = vmul.f32 %v9811_v13, %v8220_v9 }
 0x1f7   :  { %6496 = vmatprep.subr.bf16.mxu1 %v6495_v3  ;;  %v2603_v3 = vmul.f32 %v9809_v43, %v8172_v62  ;;  %v9810_v41 = vld [vmem:[#allocation95_spill] sm:$0xff]  ;;  %v2611_v43 = vmul.f32 %v9811_v13, %v8202_v57 }
 0x1f8   :  { %v6541_v63 = vpack.c.bf16 %v2567_v34, %v2566_v55  ;;  %v2577_v39 = vmul.f32 %v9810_v41, %v8220_v9  ;;  %v2832_v48 = vld [vmem:[#allocation4 + $0x2e0] sm:$0xff]  ;;  %v2615_v55 = vmul.f32 %v9811_v13, %v8172_v62 }
 0x1f9   :  { %6590 = vmatpush3.bf16.msra.mxu0 %v6589_v21  ;;  %v2821_v21 = vld [vmem:[#allocation4 + $0x288] sm:$0xff]  ;;  %v6543_v33 = vpack.c.bf16 %v2603_v3, %v2602_v25  ;;  %v2587_v25 = vmul.f32 %v7797_v30, %v8202_v57 }
 0x1fa   :  { %6498 = vmatpush3.bf16.msra.mxu1 %v6497_v27  ;;  %6592 = vmatprep.subr.bf16.mxu0 %v6591_v10  ;;  %v2574_v27 = vmul.f32 %v9810_v41, %v8205_v46  ;;  %v2575_v10 = vmul.f32 %v9810_v41, %v8202_v57 }
 0x1fb   :  { %6532 = vmatprep.subr.bf16.mxu1 %v6531_v37  ;;  %v2610_v37 = vmul.f32 %v9811_v13, %v8205_v46 }
 0x1fd   :  { %3178 = vmatmul.mubr.f32.vlgmr.msra.gmra.mrb[40].mxu1 %v2790_v56  ;;  %6594 = vmatpush3.bf16.msra.mxu0 %v6593_v54  ;;  %v2833_v56 = vld [vmem:[#allocation4 + $0x2e8] sm:$0xff]  ;;  %v2795_v54 = vld [vmem:[#allocation4 + $0x1b8] sm:$0xff]  ;;  %v6547_v19 = vpack.c.bf16 %v2611_v43, %v2610_v37 }
 0x1fe   :  { %6534 = vmatpush3.bf16.msra.mxu1 %v6533_v16  ;;  %3182 = vmatprep.mubr.f32.mxu1 %v2803_v52  ;;  %v6545_v52 = vpack.c.bf16 %v2575_v10, %v2574_v27  ;;  %v2576_v16 = vmul.f32 %v9810_v41, %v8223_v51 }
 0x1ff   :  { %6536 = vmatprep.subr.bf16.mxu1 %v6535_v44  ;;  %v2612_v44 = vmul.f32 %v9811_v13, %v8223_v51 }
 0x200   :  { %3433 = vmatmul.mubr.f32.vlgmr.msra.gmra.mrb[102].mxu0 %v2796_v38  ;;  %v6549_v38 = vpack.c.bf16 %v2577_v39, %v2576_v16  ;;  %v2794_v39 = vld [vmem:[#allocation4 + $0x1b0] sm:$0xff] }
 0x201   :  { %3183 = vmatmul.mubr.f32.gmra.mrb[42].mxu1 %v2802_v40  ;;  %3437 = vmatprep.mubr.f32.mxu0 %v2809_v20  ;;  %v2578_v40 = vmul.f32 %v9810_v41, %v8177_v15  ;;  %v2579_v20 = vmul.f32 %v9810_v41, %v8172_v62  ;;  %v2589_v41 = vmul.f32 %v7797_v30, %v8220_v9 }
 0x202   :  { %6538 = vmatpush3.bf16.msra.mxu1 %v6537_v4  ;;  %3187 = vmatprep.mubr.f32.mxu1 %v2815_v50  ;;  %v6551_v50 = vpack.c.bf16 %v2613_v31, %v2612_v44  ;;  %v2614_v4 = vmul.f32 %v9811_v13, %v8177_v15  ;;  %v2721_v13 = vmul.f32 %v8032_v45, %v8220_v9 }
 0x203   :  { %6540 = vmatprep.subr.bf16.mxu1 %v6539_v7  ;;  %v6553_v34 = vpack.c.bf16 %v2579_v20, %v2578_v40  ;;  %v2586_v7 = vmul.f32 %v7797_v30, %v8205_v46 }
 0x204   :  { %3438 = vmatmul.mubr.f32.gmra.mrb[104].mxu0 %v2808_v26  ;;  %v6555_v3 = vpack.c.bf16 %v2615_v55, %v2614_v4  ;;  %v2622_v26 = vmul.f32 %v7994_v59, %v8205_v46 }
 0x205   :  { %3188 = vmatmul.mubr.f32.gmra.mrb[44].mxu1 %v2814_v11  ;;  %3442 = vmatprep.mubr.f32.mxu0 %v2821_v21  ;;  %v2623_v11 = vmul.f32 %v7994_v59, %v8202_v57 }
 0x206   :  { %6542 = vmatpush3.bf16.msra.mxu1 %v6541_v63  ;;  %3192 = vmatprep.mubr.f32.mxu1 %v2827_v6  ;;  %v6557_v6 = vpack.c.bf16 %v2587_v25, %v2586_v7  ;;  %v2588_v63 = vmul.f32 %v7797_v30, %v8223_v51  ;;  %v2687_v30 = vmul.f32 %v8048_v60, %v8172_v62  ;;  %v2806_v7 = vld [vmem:[#allocation4 + $0x210] sm:$0xff]  ;;  %v2819_v25 = vld [vmem:[#allocation4 + $0x278] sm:$0xff] }
 0x207   :  { %6544 = vmatprep.subr.bf16.mxu1 %v6543_v33  ;;  %v6559_v10 = vpack.c.bf16 %v2623_v11, %v2622_v26  ;;  %v2720_v33 = vmul.f32 %v8032_v45, %v8223_v51 }
 0x208   :  { %3443 = vmatmul.mubr.f32.gmra.mrb[106].mxu0 %v2820_v36  ;;  %v6561_v43 = vpack.c.bf16 %v2589_v41, %v2588_v63  ;;  %v2686_v36 = vmul.f32 %v8048_v60, %v8177_v15 }
 0x209   :  { %3193 = vmatmul.mubr.f32.gmra.mrb[46].mxu1 %v2826_v28  ;;  %3447 = vmatprep.mubr.f32.mxu0 %v2833_v56  ;;  %v6595_v56 = vpack.c.bf16 %v2721_v13, %v2720_v33  ;;  %v2818_v33 = vld [vmem:[#allocation4 + $0x270] sm:$0xff]  ;;  %v2831_v13 = vld [vmem:[#allocation4 + $0x2d8] sm:$0xff] }
 0x20a   :  { %6546 = vmatpush3.bf16.msra.mxu1 %v6545_v52  ;;  %3347 = vmatprep.mubr.f32.mxu1 %v2795_v54  ;;  %v2722_v54 = vmul.f32 %v8032_v45, %v8177_v15  ;;  %v2723_v52 = vmul.f32 %v8032_v45, %v8172_v62  ;;  %v6597_v31 = vpack.c.bf16 %v2687_v30, %v2686_v36 }
 0x20b   :  { %6548 = vmatprep.subr.bf16.mxu1 %v6547_v19  ;;  %v2807_v19 = vld [vmem:[#allocation4 + $0x218] sm:$0xff] }
 0x20c   :  { %3448 = vmatmul.mubr.f32.gmra.mrb[108].mxu0 %v2832_v48  ;;  %v9812_v48 = vld [vmem:[#allocation97_spill] sm:$0xff]  ;;  %v6599_v20 = vpack.c.bf16 %v2723_v52, %v2722_v54  ;;  %v2799_v52 = vld [vmem:[#allocation4 + $0x1d8] sm:$0xff] }
 0x20d   :  { %v2695_v60 = vmul.f32 %v9812_v48, %v8202_v57  ;;  %v2696_v11 = vmul.f32 %v9812_v48, %v8223_v51  ;;  %v2699_v36 = vmul.f32 %v9812_v48, %v8172_v62  ;;  %v2830_v54 = vld [vmem:[#allocation4 + $0x2d0] sm:$0xff] }
 0x20e   :  { %6550 = vmatpush3.bf16.msra.mxu1 %v6549_v38  ;;  %v2694_v38 = vmul.f32 %v9812_v48, %v8205_v46 }
 0x20f   :  { %6552 = vmatprep.subr.bf16.mxu1 %v6551_v50  ;;  %v9813_v50 = vld [vmem:[#allocation98_spill] sm:$0xff] }
 0x210   :  { %v2730_v4 = vmul.f32 %v9813_v50, %v8205_v46  ;;  %v2731_v55 = vmul.f32 %v9813_v50, %v8202_v57  ;;  %v6601_v26 = vpack.c.bf16 %v2695_v60, %v2694_v38  ;;  %v2732_v41 = vmul.f32 %v9813_v50, %v8223_v51 }
 0x211   :  { %v2743_v38 = vmul.f32 %v8117_v22, %v8202_v57 }
 0x212   :  { %6554 = vmatpush3.bf16.msra.mxu1 %v6553_v34  ;;  %v6603_v63 = vpack.c.bf16 %v2731_v55, %v2730_v4  ;;  %v2744_v4 = vmul.f32 %v8117_v22, %v8223_v51  ;;  %v2745_v55 = vmul.f32 %v8117_v22, %v8220_v9 }
 0x213   :  { %6556 = vmatprep.subr.bf16.mxu1 %v6555_v3  ;;  %v5331_v21 = vpop.f32.mrb[54].mxu0 }
 0x214   :  { %v5332_v27 = vpop.f32.mrb[55].mxu0 }
 0x215   :  { %v8689_v37 = vadd.f32 %v5332_v27, %v5331_v21  ;;  %v2697_v21 = vmul.f32 %v9812_v48, %v8220_v9  ;;  %v2733_v27 = vmul.f32 %v9813_v50, %v8220_v9 }
 0x216   :  { %6558 = vmatpush3.bf16.msra.mxu1 %v6557_v6 }
 0x217   :  { %6560 = vmatprep.subr.bf16.mxu1 %v6559_v10  ;;  %v5334_v59 = vpop.f32.mrb[56].mxu0  ;;  %v6607_v30 = vpack.c.bf16 %v2733_v27, %v2732_v41 }
 0x218   :  { %v5335_v28 = vpop.f32.mrb[57].mxu0 }
 0x219   :  { %v8699_v16 = vadd.f32 %v5335_v28, %v5334_v59  ;;  %v6605_v59 = vpack.c.bf16 %v2697_v21, %v2696_v11  ;;  %v2734_v28 = vmul.f32 %v9813_v50, %v8177_v15  ;;  %v2746_v11 = vmul.f32 %v8117_v22, %v8177_v15 }
 0x21a   :  { %6562 = vmatpush3.bf16.msra.mxu1 %v6561_v43  ;;  %v2698_v43 = vmul.f32 %v9812_v48, %v8177_v15  ;;  %v2742_v48 = vmul.f32 %v8117_v22, %v8205_v46  ;;  %v2747_v21 = vmul.f32 %v8117_v22, %v8172_v62  ;;  %v2798_v22 = vld [vmem:[#allocation4 + $0x1d0] sm:$0xff] }
 0x21b   :  { %6596 = vmatprep.subr.bf16.mxu1 %v6595_v56  ;;  %v5337_v44 = vpop.f32.mrb[58].mxu0  ;;  %v2735_v56 = vmul.f32 %v9813_v50, %v8172_v62 }
 0x21c   :  { %v5338_v40 = vpop.f32.mrb[59].mxu0  ;;  %v6615_v50 = vpack.c.bf16 %v2743_v38, %v2742_v48  ;;  %v6623_v27 = vpack.c.bf16 %v2747_v21, %v2746_v11  ;;  %v9820_v48 = vld [vmem:[#allocation33_spill] sm:$0xff] }
 0x21d   :  { %3348 = vmatmul.mubr.f32.vlgmr.msra.gmra.mrb[48].mxu1 %v2794_v39  ;;  %v8709_v34 = vadd.f32 %v5338_v40, %v5337_v44  ;;  %v6609_v39 = vpack.c.bf16 %v2699_v36, %v2698_v43  ;;  %v2707_v44 = vmul.f32 %v8105_v35, %v8202_v57  ;;  %v2708_v40 = vmul.f32 %v8105_v35, %v8223_v51  ;;  %v2823_v43 = vld [vmem:[#allocation4 + $0x298] sm:$0xff]  ;;  %v9821_v38 = vld [vmem:[#allocation37_spill] sm:$0xff] }
 0x21e   :  { %6598 = vmatpush3.bf16.msra.mxu1 %v6597_v31  ;;  %3352 = vmatprep.mubr.f32.mxu1 %v2807_v19  ;;  %v2706_v19 = vmul.f32 %v8105_v35, %v8205_v46  ;;  %v6611_v31 = vpack.c.bf16 %v2735_v56, %v2734_v28  ;;  %v9815_v36 = vpack.c.bf16 %v9736_v18, %v9735_v23  ;;  %v2835_v56 = vld [vmem:[#allocation4 + $0x2f8] sm:$0xff]  ;;  %v5216_v18 = vld [vmem:[%s9513_s4 + $0x48] sm:$0xff] }
 0x21f   :  { %6600 = vmatprep.subr.bf16.mxu1 %v6599_v20  ;;  %v5340_v3 = vpop.f32.mrb[60].mxu0  ;;  %v2709_v20 = vmul.f32 %v8105_v35, %v8220_v9 }
 0x220   :  { %v5341_v6 = vpop.f32.mrb[61].mxu0  ;;  %v6613_v60 = vpack.c.bf16 %v2707_v44, %v2706_v19  ;;  %v9818_v19 = vpack.c.bf16 %v9745_v47, %v9744_v17  ;;  %v9819_v44 = vpack.c.bf16 %v9747_v5, %v9746_v0 }
 0x221   :  { %3353 = vmatmul.mubr.f32.gmra.mrb[50].mxu1 %v2806_v7  ;;  %v8719_v10 = vadd.f32 %v5341_v6, %v5340_v3  ;;  %v6617_v7 = vpack.c.bf16 %v2709_v20, %v2708_v40  ;;  %v2711_v3 = vmul.f32 %v8105_v35, %v8172_v62  ;;  %v2718_v6 = vmul.f32 %v8032_v45, %v8205_v46  ;;  %v9823_v20 = vld [vmem:[#allocation41_spill] sm:$0xff] }
 0x222   :  { %6602 = vmatpush3.bf16.msra.mxu1 %v6601_v26  ;;  %3357 = vmatprep.mubr.f32.mxu1 %v2819_v25  ;;  %v2710_v25 = vmul.f32 %v8105_v35, %v8177_v15  ;;  %v6619_v26 = vpack.c.bf16 %v2745_v55, %v2744_v4  ;;  %v9826_v55 = vld [vmem:[#allocation49_spill] sm:$0xff] }
 0x223   :  { %6604 = vmatprep.subr.bf16.mxu1 %v6603_v63  ;;  %v2719_v63 = vmul.f32 %v8032_v45, %v8202_v57  ;;  %v9814_v45 = vpack.c.bf16 %v9734_v32, %v9733_v14  ;;  %v2810_v57 = vld [vmem:[#allocation4 + $0x230] sm:$0xff] }
 0x224   :  { %v6621_v9 = vpack.c.bf16 %v2711_v3, %v2710_v25 }
 0x225   :  { %3358 = vmatmul.mubr.f32.gmra.mrb[52].mxu1 %v2818_v33  ;;  %v6625_v33 = vpack.c.bf16 %v2719_v63, %v2718_v6 }
 0x226   :  { %6606 = vmatpush3.bf16.msra.mxu1 %v6605_v59  ;;  %3362 = vmatprep.mubr.f32.mxu1 %v2831_v13  ;;  %v2811_v13 = vld [vmem:[#allocation4 + $0x238] sm:$0xff] }
 0x227   :  { %6608 = vmatprep.subr.bf16.mxu1 %v6607_v30  ;;  %v2822_v30 = vld [vmem:[#allocation4 + $0x290] sm:$0xff] }
 0x229   :  { %3363 = vmatmul.mubr.f32.gmra.mrb[54].mxu1 %v2830_v54  ;;  %v9816_v54 = vpack.c.bf16 %v9738_v2, %v9737_v53 }
 0x22a   :  { %6610 = vmatpush3.bf16.msra.mxu1 %v6609_v39  ;;  %3517 = vmatprep.mubr.f32.mxu1 %v2799_v52  ;;  %v9817_v52 = vpack.c.bf16 %v9743_v42, %v9742_v12 }
 0x22b   :  { %6612 = vmatprep.subr.bf16.mxu1 %v6611_v31 }
 0x22e   :  { %6614 = vmatpush3.bf16.msra.mxu1 %v6613_v60  ;;  %v9822_v60 = vpack.c.bf16 %v9820_v48, %v9821_v38 }
 0x22f   :  { %6616 = vmatprep.subr.bf16.mxu1 %v6615_v50 }
 0x232   :  { %6618 = vmatpush3.bf16.msra.mxu1 %v6617_v7  ;;  %v9827_v7 = vld [vmem:[#allocation53_spill] sm:$0xff] }
 0x233   :  { %6620 = vmatprep.subr.bf16.mxu1 %v6619_v26  ;;  %v5375_v51 = vpop.f32.mrb[62].mxu0  ;;  %v9828_v25 = vpack.c.bf16 %v9826_v55, %v9827_v7 }
 0x234   :  { %v5376_v41 = vpop.f32.mrb[63].mxu0 }
 0x235   :  { %v5377_v35 = vadd.f32 %v5376_v41, %v5375_v51 }
 0x236   :  { %6622 = vmatpush3.bf16.msra.mxu1 %v6621_v9  ;;  %v9829_v9 = vld [vmem:[#allocation38_spill] sm:$0xff] }
 0x237   :  { %6624 = vmatprep.subr.bf16.mxu1 %v6623_v27  ;;  %v8758_v15 = vadd.f32 %v5377_v35, %v8689_v37  ;;  %v9830_v6 = vpack.c.bf16 %v9755_v29, %v9829_v9  ;;  %v9834_v29 = vld [vmem:[#allocation50_spill] sm:$0xff] }
 0x23a   :  { %6626 = vmatpush3.bf16.msra.mxu1 %v6625_v33 }
 0x23b   :  { %6627 = vmatprep.subr.bf16.mxu1 %v9713_v24  ;;  %v5378_v62 = vpop.f32.mrb[64].mxu0 }
 0x23c   :  { %v5379_v59 = vpop.f32.mrb[65].mxu0 }
 0x23d   :  { %3518 = vmatmul.mubr.f32.vlgmr.msra.gmra.mrb[56].mxu1 %v2798_v22  ;;  %v5380_v46 = vadd.f32 %v5379_v59, %v5378_v62  ;;  %v9831_v22 = vld [vmem:[#allocation42_spill] sm:$0xff] }
 0x23e   :  { %6629 = vmatpush1.bf16.msra.mxu1 %v9814_v45  ;;  %3522 = vmatprep.mubr.f32.mxu1 %v2811_v13  ;;  %v9832_v62 = vld [vmem:[#allocation46_spill] sm:$0xff] }
 0x23f   :  { %6630 = vmatprep.subr.bf16.mxu1 %v9713_v24  ;;  %v1843_v37 = vadd.f32 %v5380_v46, %v8699_v16  ;;  %v2834_v16 = vld [vmem:[#allocation4 + $0x2f0] sm:$0xff]  ;;  %v9833_v13 = vpack.c.bf16 %v9831_v22, %v9832_v62 }
 0x241   :  { %3523 = vmatmul.mubr.f32.gmra.mrb[58].mxu1 %v2810_v57 }
 0x242   :  { %6632 = vmatpush1.bf16.msra.mxu1 %v9815_v36  ;;  %3527 = vmatprep.mubr.f32.mxu1 %v2823_v43  ;;  %v9835_v43 = vld [vmem:[#allocation54_spill] sm:$0xff] }
 0x243   :  { %6633 = vmatprep.subr.bf16.mxu1 %v9713_v24  ;;  %v5381_v28 = vpop.f32.mrb[66].mxu0  ;;  %v9836_v36 = vpack.c.bf16 %v9834_v29, %v9835_v43 }
 0x244   :  { %v5382_v14 = vpop.f32.mrb[67].mxu0 }
 0x245   :  { %v5383_v32 = vadd.f32 %v5382_v14, %v5381_v28  ;;  %3528 = vmatmul.mubr.f32.gmra.mrb[60].mxu1 %v2822_v30 }
 0x246   :  { %6635 = vmatpush1.bf16.msra.mxu1 %v9816_v54  ;;  %3532 = vmatprep.mubr.f32.mxu1 %v2835_v56  ;;  %v5218_v56 = vld [vmem:[%s9513_s4 + $0x58] sm:$0xff]  ;;  %v5217_v54 = vld [vmem:[%s9513_s4 + $0x50] sm:$0xff] }
 0x247   :  { %6636 = vmatprep.subr.bf16.mxu1 %v9713_v24  ;;  %v1848_v23 = vadd.f32 %v5383_v32, %v8709_v34 }
 0x249   :  { %3533 = vmatmul.mubr.f32.gmra.mrb[62].mxu1 %v2834_v16 }
 0x24a   :  { %6638 = vmatpush1.bf16.msra.mxu1 %v9817_v52  ;;  %5223 = vmatprep.mubr.msk.f32.mxu1 %vm2196_vm1, %v5216_v18  ;;  %v5220_v52 = vld [vmem:[%s9513_s4 + $0x68] sm:$0xff] }
 0x24b   :  { %6639 = vmatprep.subr.bf16.mxu1 %v9713_v24  ;;  %v5384_v53 = vpop.f32.mrb[68].mxu0 }
 0x24c   :  { %v5385_v2 = vpop.f32.mrb[69].mxu0 }
 0x24d   :  { %v5386_v39 = vadd.f32 %v5385_v2, %v5384_v53 }
 0x24e   :  { %6641 = vmatpush1.bf16.msra.mxu1 %v9818_v19 }
 0x24f   :  { %6642 = vmatprep.subr.bf16.mxu1 %v9713_v24  ;;  %v1853_v34 = vadd.f32 %v5386_v39, %v8719_v10  ;;  %v9824_v10 = vld [vmem:[#allocation45_spill] sm:$0xff]  ;;  %v5222_v39 = vld [vmem:[%s9513_s4 + $0x78] sm:$0xff] }
 0x250   :  { %v9825_v50 = vpack.c.bf16 %v9823_v20, %v9824_v10 }
 0x252   :  { %6644 = vmatpush1.bf16.msra.mxu1 %v9819_v44  ;;  %v4262_v44 = vld [vmem:[#allocation4 + $0x308] sm:$0xff] }
 0x253   :  { %6645 = vmatprep.subr.bf16.mxu1 %v9713_v24  ;;  %v5463_v12 = vpop.f32.mrb[70].mxu0  ;;  %4565 = vmatprep.mubr.f32.mxu0 %v4262_v44 }
 0x254   :  { %v5464_v42 = vpop.f32.mrb[71].mxu0 }
 0x255   :  { %v5465_v31 = vadd.f32 %v5464_v42, %v5463_v12 }
 0x256   :  { %6647 = vmatpush1.bf16.msra.mxu1 %v9822_v60 }
 0x257   :  { %6648 = vmatprep.subr.bf16.mxu1 %v9713_v24  ;;  %v5466_v17 = vpop.f32.mrb[72].mxu0 }
 0x258   :  { %v5467_v47 = vpop.f32.mrb[73].mxu0 }
 0x259   :  { %v5468_v40 = vadd.f32 %v5467_v47, %v5466_v17  ;;  %v4268_v17 = vld [vmem:[#allocation4 + $0x338] sm:$0xff] }
 0x25a   :  { %6650 = vmatpush1.bf16.msra.mxu1 %v9825_v50 }
 0x25b   :  { %6651 = vmatprep.subr.bf16.mxu1 %v9713_v24  ;;  %v5469_v0 = vpop.f32.mrb[74].mxu0 }
 0x25c   :  { %v5470_v5 = vpop.f32.mrb[75].mxu0 }
 0x25d   :  { %v5471_v4 = vadd.f32 %v5470_v5, %v5469_v0 }
 0x25e   :  { %6653 = vmatpush1.bf16.msra.mxu1 %v9828_v25 }
 0x25f   :  { %6654 = vmatprep.subr.bf16.mxu1 %v9713_v24  ;;  %v5472_v3 = vpop.f32.mrb[76].mxu0 }
 0x260   :  { %v5419_v26 = vpop.f32.mrb[24].mxu1  ;;  %v5473_v11 = vpop.f32.mrb[77].mxu0 }
 0x261   :  { %v5420_v21 = vpop.f32.mrb[25].mxu1  ;;  %v5474_v51 = vadd.f32 %v5473_v11, %v5472_v3 }
 0x262   :  { %6656 = vmatpush1.bf16.msra.mxu1 %v9830_v6  ;;  %v5421_v63 = vadd.f32 %v5420_v21, %v5419_v26 }
 0x263   :  { %6657 = vmatprep.subr.bf16.mxu1 %v9713_v24 }
 0x264   :  { %v1923_v41 = vadd.f32 %v5421_v63, %v8758_v15  ;;  %v5422_v27 = vpop.f32.mrb[26].mxu1  ;;  %v5215_v15 = vld [vmem:[%s9513_s4 + $0x40] sm:$0xff] }
 0x265   :  { %v5423_v35 = vpop.f32.mrb[27].mxu1 }
 0x266   :  { %v2008_v33 = vadd.f32 %v5465_v31, %v1923_v41  ;;  %6659 = vmatpush1.bf16.msra.mxu1 %v9833_v13  ;;  %v5424_v59 = vadd.f32 %v5423_v35, %v5422_v27 }
 0x267   :  { %6660 = vmatprep.subr.bf16.mxu1 %v9713_v24 }
 0x268   :  { %v1928_v46 = vadd.f32 %v5424_v59, %v1843_v37  ;;  %v5425_v45 = vpop.f32.mrb[28].mxu1 }
 0x269   :  { %v5426_v57 = vpop.f32.mrb[29].mxu1 }
 0x26a   :  { %6662 = vmatpush1.bf16.msra.mxu1 %v9836_v36  ;;  %v2013_v30 = vadd.f32 %v5468_v40, %v1928_v46  ;;  %v5427_v28 = vadd.f32 %v5426_v57, %v5425_v45 }
 0x26c   :  { %v1933_v14 = vadd.f32 %v5427_v28, %v1848_v23  ;;  %v5428_v32 = vpop.f32.mrb[30].mxu1  ;;  %v5219_v23 = vld [vmem:[%s9513_s4 + $0x60] sm:$0xff] }
 0x26d   :  { %3615 = vmatmul.mubr.f32.vlgmr.msra.gmra.mrb[8].mxu1 %v5215_v15  ;;  %v5429_v37 = vpop.f32.mrb[31].mxu1 }
 0x26e   :  { %5224 = vmatprep.mubr.msk.f32.mxu1 %vm2196_vm1, %v5218_v56  ;;  %v2018_v16 = vadd.f32 %v5471_v4, %v1933_v14  ;;  %v5430_v18 = vadd.f32 %v5429_v37, %v5428_v32 }
 0x270   :  { %v1938_v53 = vadd.f32 %v5430_v18, %v1853_v34  ;;  %v5221_v34 = vld [vmem:[%s9513_s4 + $0x70] sm:$0xff] }
 0x271   :  { %3620 = vmatmul.mubr.f32.gmra.mrb[10].mxu1 %v5217_v54 }
 0x272   :  { %5225 = vmatprep.mubr.msk.f32.mxu1 %vm2196_vm1, %v5220_v52  ;;  %v2023_v2 = vadd.f32 %v5474_v51, %v1938_v53 }
 0x273   :  { %v5551_v19 = vpop.f32.mrb[78].mxu0 }
 0x274   :  { %v5552_v12 = vpop.f32.mrb[79].mxu0 }
 0x275   :  { %3625 = vmatmul.mubr.f32.gmra.mrb[12].mxu1 %v5219_v23  ;;  %v5553_v42 = vadd.f32 %v5552_v12, %v5551_v19 }
 0x276   :  { %5226 = vmatprep.mubr.msk.f32.mxu1 %vm2196_vm1, %v5222_v39 }
 0x277   :  { %v5554_v31 = vpop.f32.mrb[80].mxu0 }
 0x278   :  { %v5555_v48 = vpop.f32.mrb[81].mxu0 }
 0x279   :  { %3630 = vmatmul.mubr.f32.gmra.mrb[14].mxu1 %v5221_v34  ;;  %v5556_v38 = vadd.f32 %v5555_v48, %v5554_v31 }
 0x27a   :  { %4820 = vmatprep.mubr.f32.mxu1 %v4268_v17 }
 0x27b   :  { %v5557_v60 = vpop.f32.mrb[82].mxu0 }
 0x27c   :  { %v5558_v47 = vpop.f32.mrb[83].mxu0 }
 0x27d   :  { %v5559_v40 = vadd.f32 %v5558_v47, %v5557_v60 }
 0x27f   :  { %v5560_v20 = vpop.f32.mrb[84].mxu0 }
 0x280   :  { %v5507_v10 = vpop.f32.mrb[32].mxu1  ;;  %v5561_v50 = vpop.f32.mrb[85].mxu0 }
 0x281   :  { %v5508_v0 = vpop.f32.mrb[33].mxu1  ;;  %v5562_v5 = vadd.f32 %v5561_v50, %v5560_v20 }
 0x282   :  { %v5509_v4 = vadd.f32 %v5508_v0, %v5507_v10 }
 0x284   :  { %v2093_v55 = vadd.f32 %v5509_v4, %v2008_v33  ;;  %v5510_v7 = vpop.f32.mrb[34].mxu1 }
 0x285   :  { %v5511_v25 = vpop.f32.mrb[35].mxu1 }
 0x286   :  { %v5512_v3 = vadd.f32 %v5511_v25, %v5510_v7  ;;  %v2178_v26 = vadd.f32 %v5553_v42, %v2093_v55 }
 0x288   :  { %v2098_v11 = vadd.f32 %v5512_v3, %v2013_v30  ;;  %v5513_v21 = vpop.f32.mrb[36].mxu1 }
 0x289   :  { %v5514_v51 = vpop.f32.mrb[37].mxu1 }
 0x28a   :  { %v5515_v9 = vadd.f32 %v5514_v51, %v5513_v21  ;;  %v2183_v6 = vadd.f32 %v5556_v38, %v2098_v11  ;;  %v9840_v51 = vld [vmem:[#allocation81_spill] sm:$0xff] }
 0x28c   :  { %v2103_v63 = vadd.f32 %v5515_v9, %v2018_v16  ;;  %v5516_v41 = vpop.f32.mrb[38].mxu1  ;;  %v8862_v9 = vmax.f32 %v9840_v51, 0.0 }
 0x28d   :  { %v5517_v27 = vpop.f32.mrb[39].mxu1 }
 0x28e   :  { %v5518_v35 = vadd.f32 %v5517_v27, %v5516_v41  ;;  %v2188_v22 = vadd.f32 %v5559_v40, %v2103_v63  ;;  %v9842_v41 = vld [vmem:[#allocation86_spill] sm:$0xff] }
 0x28f   :  { %v8868_v27 = vmax.f32 %v9842_v41, 0.0 }
 0x290   :  { %v2108_v62 = vadd.f32 %v5518_v35, %v2023_v2  ;;  %v9843_v35 = vld [vmem:[#allocation9_spill] sm:$0xff] }
 0x292   :  { %v2193_v13 = vadd.f32 %v5562_v5, %v2108_v62  ;;  %v9844_v62 = vld [vmem:[#allocation7_spill] sm:$0xff] }
 0x293   :  { %v5595_v59 = vpop.f32.mrb[86].mxu0 }
 0x294   :  { %v5596_v46 = vpop.f32.mrb[87].mxu0 }
 0x295   :  { %v8840_v45 = vadd.f32 %v5596_v46, %v5595_v59  ;;  %v9845_v59 = vld [vmem:[#allocation10_spill] sm:$0xff] }
 0x297   :  { %v5598_v33 = vpop.f32.mrb[88].mxu0 }
 0x298   :  { %v5599_v57 = vpop.f32.mrb[89].mxu0 }
 0x299   :  { %v8842_v29 = vadd.f32 %v5599_v57, %v5598_v33  ;;  %v9846_v33 = vld [vmem:[#allocation80_spill] sm:$0xff] }
 0x29a   :  { %v8879_v57 = vmax.f32 %v9846_v33, 0.0 }
 0x29b   :  { %v5601_v43 = vpop.f32.mrb[90].mxu0 }
 0x29c   :  { %v5602_v36 = vpop.f32.mrb[91].mxu0 }
 0x29d   :  { %v8844_v15 = vadd.f32 %v5602_v36, %v5601_v43  ;;  %v9847_v43 = vld [vmem:[#allocation82_spill] sm:$0xff] }
 0x29e   :  { %v8882_v36 = vmax.f32 %v9847_v43, 0.0 }
 0x29f   :  { %v5604_v30 = vpop.f32.mrb[92].mxu0 }
 0x2a0   :  { %v5605_v28 = vpop.f32.mrb[93].mxu0 }
 0x2a1   :  { %v8846_v14 = vadd.f32 %v5605_v28, %v5604_v30  ;;  %v9848_v30 = vld [vmem:[#allocation84_spill] sm:$0xff] }
 0x2a2   :  { %v8885_v28 = vmax.f32 %v9848_v30, 0.0 }
 0x2b0   :  { %v2275_v56 = vpop.f32.mrb[0].mxu1 }
 0x2b1   :  { %v2276_v32 = vadd.f32 %v2275_v56, %v2178_v26  ;;  %v2277_v37 = vpop.f32.mrb[1].mxu1  ;;  %v6971_v26 = vld [vmem:[%s9511_s2] sm:$0xff] }
 0x2b3   :  { %v5211_v54 = vmul.f32 -1.442695, %v2276_v32  ;;  %v5683_v16 = vpop.f32.mrb[94].mxu0 }
 0x2b4   :  { %v2280_v18 = vpop.f32.mrb[2].mxu1  ;;  %v5684_v52 = vpop.f32.mrb[95].mxu0 }
 0x2b5   :  { %6931 = vpow2.f32 %v5211_v54  ;;  %v2281_v53 = vadd.f32 %v2280_v18, %v2183_v6  ;;  %v2282_v23 = vpop.f32.mrb[3].mxu1  ;;  %v8848_v2 = vadd.f32 %v5684_v52, %v5683_v16  ;;  %v9841_v6 = vld [vmem:[#allocation85_spill] sm:$0xff] }
 0x2b6   :  { %v8865_v63 = vmax.f32 %v9841_v6, 0.0 }
 0x2b7   :  { %v5212_v40 = vmul.f32 -1.442695, %v2281_v53 }
 0x2b8   :  { %v2285_v39 = vpop.f32.mrb[4].mxu1 }
 0x2b9   :  { %v2286_v19 = vadd.f32 %v2285_v39, %v2188_v22  ;;  %v2287_v44 = vpop.f32.mrb[5].mxu1 }
 0x2bb   :  { %v5213_v12 = vmul.f32 -1.442695, %v2286_v19  ;;  %v5686_v42 = vpop.f32.mrb[96].mxu0 }
 0x2bc   :  { %v2290_v34 = vpop.f32.mrb[6].mxu1  ;;  %v5687_v31 = vpop.f32.mrb[97].mxu0 }
 0x2bd   :  { %6933 = vpow2.f32 %v5213_v12  ;;  %v2291_v48 = vadd.f32 %v2290_v34, %v2193_v13  ;;  %v2292_v38 = vpop.f32.mrb[7].mxu1  ;;  %v8850_v60 = vadd.f32 %v5687_v31, %v5686_v42 }
 0x2bf   :  { %9837 = vst [vmem:[#allocation23_spill] sm:$0xff] %v8850_v60  ;;  %v6932_v17 = vpop.eup %6931  ;;  %v5214_v50 = vmul.f32 -1.442695, %v2291_v48  ;;  %v9868_v60 = vld [vmem:[#allocation91_spill] sm:$0xff] }
 0x2c0   :  { %v2310_v47 = vadd.f32 1.0, %v6932_v17  ;;  %v9850_v17 = vld [vmem:[#allocation8_spill] sm:$0xff] }
 0x2c2   :  { %6935 = vrcp.f32 %v2310_v47  ;;  %v5689_v20 = vpop.f32.mrb[98].mxu0 }
 0x2c3   :  { %v5690_v10 = vpop.f32.mrb[99].mxu0  ;;  %6937 = vpow2.f32 %v5212_v40  ;;  %v9851_v40 = vld [vmem:[#allocation79_spill] sm:$0xff] }
 0x2c4   :  { %v8852_v0 = vadd.f32 %v5690_v10, %v5689_v20  ;;  %6939 = vpow2.f32 %v5214_v50 }
 0x2c6   :  { %9838 = vst [vmem:[#allocation26_spill] sm:$0xff] %v8852_v0  ;;  %v5692_v5 = vpop.f32.mrb[100].mxu0 }
 0x2c7   :  { %v6934_v4 = vpop.eup %6933  ;;  %v5693_v55 = vpop.f32.mrb[101].mxu0 }
 0x2c8   :  { %v2312_v7 = vadd.f32 1.0, %v6934_v4  ;;  %v8854_v25 = vadd.f32 %v5693_v55, %v5692_v5  ;;  %v6972_v5 = vld [vmem:[%s9511_s2 + $0x10] sm:$0xff] }
 0x2ca   :  { %9839 = vst [vmem:[#allocation93_spill] sm:$0xff] %v8854_v25  ;;  %6941 = vrcp.f32 %v2312_v7 }
 0x2cc   :  { %v6936_v3 = vpop.eup %6935 }
 0x2cd   :  { %v8859_v11 = vmul.f32 %v6971_v26, %v6936_v3  ;;  %v6938_v21 = vpop.eup %6937 }
 0x2ce   :  { %v2311_v32 = vadd.f32 1.0, %v6938_v21  ;;  %v6940_v52 = vpop.eup %6939 }
 0x2cf   :  { %v8872_v22 = vrot.slane %v8859_v11, %v9843_v35  ;;  %v3718_v13 = vrot.slane %v8859_v11, %v9844_v62  ;;  %v3766_v46 = vrot.slane %v8859_v11, %v9845_v59  ;;  %v8907_v47 = vrot.slane %v8859_v11, %v9850_v17 }
 0x2d0   :  { %v8887_v56 = vpop.f32.mrb[40].mxu1  ;;  %v8911_v20 = vrot.slane %v8859_v11, %v9851_v40  ;;  %6943 = vrcp.f32 %v2311_v32  ;;  %v2313_v55 = vadd.f32 1.0, %v6940_v52 }
 0x2d1   :  { %v3755_v37 = vmul.f32 %v8872_v22, %v8868_v27  ;;  %v3756_v54 = vmul.f32 %v8872_v22, %v8865_v63  ;;  %v3719_v16 = vmul.f32 %v3718_v13, %v8862_v9  ;;  %v8894_v18 = vpop.f32.mrb[41].mxu1  ;;  %v3720_v53 = vmul.f32 %v3718_v13, %v8879_v57 }
 0x2d2   :  { %v3767_v23 = vmul.f32 %v3766_v46, %v8862_v9  ;;  %v3768_v39 = vmul.f32 %v3766_v46, %v8879_v57  ;;  %v3721_v19 = vmul.f32 %v3718_v13, %v8885_v28  ;;  %v3722_v12 = vmul.f32 %v3718_v13, %v8882_v36 }
 0x2d3   :  { %v6663_v44 = vpack.c.bf16 %v3756_v54, %v3755_v37  ;;  %v3769_v42 = vmul.f32 %v3766_v46, %v8885_v28  ;;  %v3770_v34 = vmul.f32 %v3766_v46, %v8882_v36  ;;  %v8903_v31 = vpop.f32.mrb[102].mxu0  ;;  %v6665_v38 = vpack.c.bf16 %v3720_v53, %v3719_v16 }
 0x2d4   :  { %9849 = vst [vmem:[#allocation11_spill] sm:$0xff] %v8903_v31  ;;  %v6942_v48 = vpop.eup %6941  ;;  %v8913_v10 = vpop.f32.mrb[42].mxu1  ;;  %v6667_v7 = vpack.c.bf16 %v3768_v39, %v3767_v23  ;;  %v6669_v26 = vpack.c.bf16 %v3722_v12, %v3721_v19  ;;  %v3723_v51 = vmul.f32 %v3718_v13, %v8868_v27  ;;  %v3724_v6 = vmul.f32 %v3718_v13, %v8865_v63 }
 0x2d5   :  { %v8915_v50 = vpop.f32.mrb[103].mxu0  ;;  %v8920_v4 = vmul.f32 %v6972_v5, %v6942_v48  ;;  %6664 = vmatprep.subr.bf16.mxu0 %v6663_v44  ;;  %v8922_v3 = vpop.f32.mrb[43].mxu1  ;;  %v6671_v21 = vpack.c.bf16 %v3770_v34, %v3769_v42  ;;  %v3771_v43 = vmul.f32 %v3766_v46, %v8868_v27  ;;  %v3772_v37 = vmul.f32 %v3766_v46, %v8865_v63 }
 0x2d6   :  { %9852 = vst [vmem:[#allocation13_spill] sm:$0xff] %v8915_v50  ;;  %6666 = vmatpush3.bf16.msra.mxu0 %v6665_v38  ;;  %v3735_v13 = vmul.f32 %v8907_v47, %v8862_v9  ;;  %v3736_v54 = vmul.f32 %v8907_v47, %v8879_v57  ;;  %v3783_v16 = vmul.f32 %v8911_v20, %v8862_v9  ;;  %6945 = vrcp.f32 %v2313_v55 }
 0x2d7   :  { %9853 = vst [vmem:[#allocation35_spill] sm:$0xff] %v8920_v4  ;;  %6668 = vmatprep.subr.bf16.mxu0 %v6667_v7  ;;  %v8928_v41 = vrot.slane %v8920_v4, %v9843_v35  ;;  %v3974_v33 = vrot.slane %v8920_v4, %v9844_v62  ;;  %v4022_v30 = vrot.slane %v8920_v4, %v9845_v59  ;;  %v8935_v32 = vpop.f32.mrb[104].mxu0 }
 0x2d8   :  { %9854 = vst [vmem:[#allocation31_spill] sm:$0xff] %v8935_v32  ;;  %v8944_v52 = vpop.f32.mrb[44].mxu1  ;;  %v8946_v53 = vpop.f32.mrb[105].mxu0  ;;  %v3784_v19 = vmul.f32 %v8911_v20, %v8879_v57  ;;  %v6673_v5 = vpack.c.bf16 %v3724_v6, %v3723_v51  ;;  %v6675_v61 = vpack.c.bf16 %v3772_v37, %v3771_v43  ;;  %v6677_v8 = vpack.c.bf16 %v3736_v54, %v3735_v13 }
 0x2d9   :  { %9855 = vst [vmem:[#allocation43_spill] sm:$0xff] %v8946_v53  ;;  %v4011_v23 = vmul.f32 %v8928_v41, %v8868_v27  ;;  %v4012_v39 = vmul.f32 %v8928_v41, %v8865_v63  ;;  %v3975_v46 = vmul.f32 %v3974_v33, %v8862_v9  ;;  %v8955_v44 = vpop.f32.mrb[45].mxu1  ;;  %v3976_v12 = vmul.f32 %v3974_v33, %v8879_v57 }
 0x2da   :  { %6670 = vmatpush3.bf16.msra.mxu0 %v6669_v26  ;;  %v4023_v42 = vmul.f32 %v4022_v30, %v8862_v9  ;;  %v4024_v34 = vmul.f32 %v4022_v30, %v8879_v57  ;;  %v3977_v48 = vmul.f32 %v3974_v33, %v8885_v28  ;;  %v3978_v7 = vmul.f32 %v3974_v33, %v8882_v36  ;;  %v6944_v13 = vpop.eup %6943 }
 0x2db   :  { %6672 = vmatprep.subr.bf16.mxu0 %v6671_v21  ;;  %v6759_v38 = vpack.c.bf16 %v4012_v39, %v4011_v23  ;;  %v4025_v49 = vmul.f32 %v4022_v30, %v8885_v28  ;;  %v6761_v1 = vpack.c.bf16 %v3976_v12, %v3975_v46  ;;  %v4026_v26 = vmul.f32 %v4022_v30, %v8882_v36  ;;  %v8978_v39 = vpop.f32.mrb[106].mxu0 }
 0x2dc   :  { %v8964_v58 = vpop.f32.mrb[46].mxu1  ;;  %v6763_v53 = vpack.c.bf16 %v4024_v34, %v4023_v42  ;;  %v6679_v32 = vpack.c.bf16 %v3784_v19, %v3783_v16  ;;  %v3737_v50 = vmul.f32 %v8907_v47, %v8885_v28  ;;  %v3738_v21 = vmul.f32 %v8907_v47, %v8882_v36  ;;  %9856 = vst [vmem:[#allocation39_spill] sm:$0xff] %v8978_v39 }
 0x2dd   :  { %6760 = vmatprep.subr.bf16.mxu1 %v6759_v38  ;;  %v8970_v51 = vpop.f32.mrb[47].mxu1  ;;  %v6765_v6 = vpack.c.bf16 %v3978_v7, %v3977_v48  ;;  %v3979_v43 = vmul.f32 %v3974_v33, %v8868_v27  ;;  %v3980_v37 = vmul.f32 %v3974_v33, %v8865_v63  ;;  %v6767_v54 = vpack.c.bf16 %v4026_v26, %v4025_v49  ;;  %v8986_v33 = vpop.f32.mrb[107].mxu0  ;;  %v9859_v7 = vld [vmem:[#allocation83_spill] sm:$0xff] }
 0x2de   :  { %6674 = vmatpush3.bf16.msra.mxu0 %v6673_v5  ;;  %6762 = vmatpush3.bf16.msra.mxu1 %v6761_v1  ;;  %v3785_v16 = vmul.f32 %v8911_v20, %v8885_v28  ;;  %v3786_v23 = vmul.f32 %v8911_v20, %v8882_v36  ;;  %v4027_v55 = vmul.f32 %v4022_v30, %v8868_v27 }
 0x2df   :  { %6676 = vmatprep.subr.bf16.mxu0 %v6675_v61  ;;  %6764 = vmatprep.subr.bf16.mxu1 %v6763_v53  ;;  %v4028_v1 = vmul.f32 %v4022_v30, %v8865_v63  ;;  %v3739_v46 = vmul.f32 %v8907_v47, %v8868_v27  ;;  %v3990_v61 = vrot.slane %v8920_v4, %v9850_v17  ;;  %v9000_v48 = vpop.f32.mrb[108].mxu0 }
 0x2e0   :  { %9857 = vst [vmem:[#allocation51_spill] sm:$0xff] %v8986_v33  ;;  %v3740_v49 = vmul.f32 %v8907_v47, %v8865_v63  ;;  %v3787_v53 = vmul.f32 %v8911_v20, %v8868_v27  ;;  %v3788_v19 = vmul.f32 %v8911_v20, %v8865_v63  ;;  %v4038_v30 = vrot.slane %v8920_v4, %v9851_v40  ;;  %v6973_v20 = vld [vmem:[%s9511_s2 + $0x8] sm:$0xff] }
 0x2e1   :  { %v3991_v12 = vmul.f32 %v3990_v61, %v8862_v9  ;;  %v3992_v42 = vmul.f32 %v3990_v61, %v8879_v57  ;;  %9858 = vst [vmem:[#allocation47_spill] sm:$0xff] %v9000_v48  ;;  %v9005_v38 = vmul.f32 %v6973_v20, %v6944_v13  ;;  %v6769_v5 = vpack.c.bf16 %v3980_v37, %v3979_v43  ;;  %v6946_v37 = vpop.eup %6945 }
 0x2e2   :  { %6678 = vmatpush3.bf16.msra.mxu0 %v6677_v8  ;;  %6766 = vmatpush3.bf16.msra.mxu1 %v6765_v6  ;;  %v4039_v34 = vmul.f32 %v4038_v30, %v8862_v9  ;;  %v4040_v47 = vmul.f32 %v4038_v30, %v8879_v57  ;;  %v6681_v8 = vpack.c.bf16 %v3738_v21, %v3737_v50  ;;  %v9009_v6 = vpop.f32.mrb[109].mxu0 }
 0x2e3   :  { %6680 = vmatprep.subr.bf16.mxu0 %v6679_v32  ;;  %6768 = vmatprep.subr.bf16.mxu1 %v6767_v54  ;;  %v3798_v26 = vrot.slane %v8859_v11, %v9859_v7  ;;  %9860 = vst [vmem:[#allocation17_spill] sm:$0xff] %v9009_v6  ;;  %v6683_v32 = vpack.c.bf16 %v3786_v23, %v3785_v16 }
 0x2e4   :  { %v6771_v54 = vpack.c.bf16 %v4028_v1, %v4027_v55  ;;  %v6685_v33 = vpack.c.bf16 %v3740_v49, %v3739_v46  ;;  %v6687_v39 = vpack.c.bf16 %v3788_v19, %v3787_v53  ;;  %v6773_v48 = vpack.c.bf16 %v3992_v42, %v3991_v12 }
 0x2e5   :  { %v3751_v31 = vmul.f32 %v8872_v22, %v8862_v9  ;;  %v3752_v13 = vmul.f32 %v8872_v22, %v8879_v57  ;;  %v6775_v50 = vpack.c.bf16 %v4040_v47, %v4039_v34  ;;  %v3993_v21 = vmul.f32 %v3990_v61, %v8885_v28  ;;  %v6974_v47 = vld [vmem:[%s9511_s2 + $0x18] sm:$0xff] }
 0x2e6   :  { %6682 = vmatpush3.bf16.msra.mxu0 %v6681_v8  ;;  %6770 = vmatpush3.bf16.msra.mxu1 %v6769_v5  ;;  %v3994_v43 = vmul.f32 %v3990_v61, %v8882_v36  ;;  %v3799_v16 = vmul.f32 %v3798_v26, %v8862_v9  ;;  %v3800_v23 = vmul.f32 %v3798_v26, %v8879_v57  ;;  %v9861_v8 = vld [vmem:[#allocation88_spill] sm:$0xff] }
 0x2e7   :  { %6684 = vmatprep.subr.bf16.mxu0 %v6683_v32  ;;  %6772 = vmatprep.subr.bf16.mxu1 %v6771_v54  ;;  %v4041_v55 = vmul.f32 %v4038_v30, %v8885_v28  ;;  %v4042_v1 = vmul.f32 %v4038_v30, %v8882_v36  ;;  %v3753_v46 = vmul.f32 %v8872_v22, %v8885_v28 }
 0x2e8   :  { %v3754_v49 = vmul.f32 %v8872_v22, %v8882_v36  ;;  %v3995_v53 = vmul.f32 %v3990_v61, %v8868_v27  ;;  %v3846_v19 = vrot.slane %v9005_v38, %v9844_v62  ;;  %v3996_v12 = vmul.f32 %v3990_v61, %v8865_v63 }
 0x2e9   :  { %v4043_v42 = vmul.f32 %v4038_v30, %v8868_v27  ;;  %v4044_v34 = vmul.f32 %v4038_v30, %v8865_v63  ;;  %v9034_v20 = vmul.f32 %v6974_v47, %v6946_v37  ;;  %v6689_v22 = vpack.c.bf16 %v3752_v13, %v3751_v31 }
 0x2ea   :  { %6686 = vmatpush3.bf16.msra.mxu0 %v6685_v33  ;;  %6774 = vmatpush3.bf16.msra.mxu1 %v6773_v48  ;;  %v9038_v5 = vrot.slane %v8859_v11, %v9861_v8  ;;  %v6777_v33 = vpack.c.bf16 %v3994_v43, %v3993_v21  ;;  %v6691_v48 = vpack.c.bf16 %v3800_v23, %v3799_v16 }
 0x2eb   :  { %6688 = vmatprep.subr.bf16.mxu0 %v6687_v39  ;;  %6776 = vmatprep.subr.bf16.mxu1 %v6775_v50  ;;  %v3847_v61 = vmul.f32 %v3846_v19, %v8862_v9  ;;  %v3848_v32 = vmul.f32 %v3846_v19, %v8879_v57  ;;  %v6779_v30 = vpack.c.bf16 %v4042_v1, %v4041_v55 }
 0x2ec   :  { %v6693_v54 = vpack.c.bf16 %v3754_v49, %v3753_v46  ;;  %v3801_v6 = vmul.f32 %v3798_v26, %v8885_v28  ;;  %v9045_v37 = vrot.slane %v8920_v4, %v9859_v7  ;;  %v6781_v31 = vpack.c.bf16 %v3996_v12, %v3995_v53 }
 0x2ed   :  { %v6783_v39 = vpack.c.bf16 %v4044_v34, %v4043_v42  ;;  %v3802_v13 = vmul.f32 %v3798_v26, %v8882_v36  ;;  %v4007_v50 = vmul.f32 %v8928_v41, %v8862_v9  ;;  %v4008_v21 = vmul.f32 %v8928_v41, %v8879_v57 }
 0x2ee   :  { %9862 = vst [vmem:[#allocation19_spill] sm:$0xff] %v9045_v37  ;;  %6690 = vmatpush3.bf16.msra.mxu0 %v6689_v22  ;;  %6778 = vmatpush3.bf16.msra.mxu1 %v6777_v33  ;;  %v3849_v43 = vmul.f32 %v3846_v19, %v8885_v28  ;;  %v6695_v16 = vpack.c.bf16 %v3848_v32, %v3847_v61 }
 0x2ef   :  { %6692 = vmatprep.subr.bf16.mxu0 %v6691_v48  ;;  %6780 = vmatprep.subr.bf16.mxu1 %v6779_v30  ;;  %v3850_v23 = vmul.f32 %v3846_v19, %v8882_v36  ;;  %v3803_v55 = vmul.f32 %v3798_v26, %v8868_v27  ;;  %v3804_v1 = vmul.f32 %v3798_v26, %v8865_v63  ;;  %v4261_v26 = vld [vmem:[#allocation4 + $0x300] sm:$0xff] }
 0x2f0   :  { %v9056_v46 = vpop.f32.mrb[48].mxu1  ;;  %v4055_v49 = vmul.f32 %v9045_v37, %v8862_v9  ;;  %v4056_v53 = vmul.f32 %v9045_v37, %v8879_v57  ;;  %v4009_v12 = vmul.f32 %v8928_v41, %v8885_v28  ;;  %v9066_v42 = vrot.slane %v9034_v20, %v9859_v7 }
 0x2f1   :  { %v9068_v34 = vpop.f32.mrb[49].mxu1  ;;  %v4010_v47 = vmul.f32 %v8928_v41, %v8882_v36  ;;  %v3851_v22 = vmul.f32 %v3846_v19, %v8868_v27  ;;  %v3852_v33 = vmul.f32 %v3846_v19, %v8865_v63  ;;  %v6697_v48 = vpack.c.bf16 %v3802_v13, %v3801_v6  ;;  %v4274_v13 = vld [vmem:[#allocation4 + $0x368] sm:$0xff] }
 0x2f2   :  { %6694 = vmatpush3.bf16.msra.mxu0 %v6693_v54  ;;  %6782 = vmatpush3.bf16.msra.mxu1 %v6781_v31  ;;  %v9076_v61 = vrot.slane %v9034_v20, %v9843_v35  ;;  %v6785_v32 = vpack.c.bf16 %v4008_v21, %v4007_v50  ;;  %v6699_v30 = vpack.c.bf16 %v3850_v23, %v3849_v43  ;;  %v4273_v23 = vld [vmem:[#allocation4 + $0x360] sm:$0xff] }
 0x2f3   :  { %6696 = vmatprep.subr.bf16.mxu0 %v6695_v16  ;;  %6784 = vmatprep.subr.bf16.mxu1 %v6783_v39  ;;  %v4185_v54 = vmul.f32 %v9066_v42, %v8885_v28  ;;  %v4186_v31 = vmul.f32 %v9066_v42, %v8882_v36  ;;  %v6787_v4 = vpack.c.bf16 %v4056_v53, %v4055_v49 }
 0x2f4   :  { %9863 = vst [vmem:[#allocation36_spill] sm:$0xff] %v9076_v61  ;;  %v9082_v41 = vpop.f32.mrb[50].mxu1  ;;  %v6701_v19 = vpack.c.bf16 %v3804_v1, %v3803_v55  ;;  %v3815_v6 = vmul.f32 %v9038_v5, %v8862_v9  ;;  %v3862_v39 = vrot.slane %v9005_v38, %v9850_v17  ;;  %v6789_v21 = vpack.c.bf16 %v4010_v47, %v4009_v12 }
 0x2f5   :  { %9864 = vst [vmem:[#allocation32_spill] sm:$0xff] %v9082_v41  ;;  %4566 = vmatmul.mubr.f32.vlgmr.msra.gmra.mrb[110].mxu0 %v4261_v26  ;;  %v9088_v50 = vpop.f32.mrb[51].mxu1  ;;  %v6703_v43 = vpack.c.bf16 %v3852_v33, %v3851_v22  ;;  %v3816_v16 = vmul.f32 %v9038_v5, %v8879_v57  ;;  %v4139_v55 = vmul.f32 %v9076_v61, %v8868_v27 }
 0x2f6   :  { %9865 = vst [vmem:[#allocation44_spill] sm:$0xff] %v9088_v50  ;;  %6698 = vmatpush3.bf16.msra.mxu0 %v6697_v48  ;;  %6786 = vmatpush3.bf16.msra.mxu1 %v6785_v32  ;;  %v4140_v1 = vmul.f32 %v9076_v61, %v8865_v63  ;;  %v4150_v49 = vrot.slane %v9034_v20, %v9845_v59 }
 0x2f7   :  { %6700 = vmatprep.subr.bf16.mxu0 %v6699_v30  ;;  %6788 = vmatprep.subr.bf16.mxu1 %v6787_v4  ;;  %v6823_v53 = vpack.c.bf16 %v4186_v31, %v4185_v54  ;;  %v4187_v12 = vmul.f32 %v9066_v42, %v8868_v27  ;;  %v4188_v26 = vmul.f32 %v9066_v42, %v8865_v63  ;;  %v4286_v30 = vld [vmem:[#allocation4 + $0x3c8] sm:$0xff]  ;;  %v4267_v31 = vld [vmem:[#allocation4 + $0x330] sm:$0xff] }
 0x2f8   :  { %v4198_v47 = vrot.slane %v9034_v20, %v9861_v8  ;;  %4570 = vmatprep.mubr.f32.mxu0 %v4274_v13  ;;  %v9104_v4 = vpop.f32.mrb[52].mxu1  ;;  %v3863_v22 = vmul.f32 %v3862_v39, %v8862_v9  ;;  %v3864_v33 = vmul.f32 %v3862_v39, %v8879_v57  ;;  %v3817_v48 = vmul.f32 %v9038_v5, %v8885_v28 }
 0x2f9   :  { %9866 = vst [vmem:[#allocation40_spill] sm:$0xff] %v9104_v4  ;;  %v3818_v32 = vmul.f32 %v9038_v5, %v8882_v36  ;;  %4571 = vmatmul.mubr.f32.gmra.mrb[112].mxu0 %v4273_v23  ;;  %v9112_v54 = vpop.f32.mrb[53].mxu1  ;;  %v4151_v13 = vmul.f32 %v4150_v49, %v8862_v9  ;;  %v3865_v61 = vmul.f32 %v3862_v39, %v8885_v28 }
 0x2fa   :  { %9867 = vst [vmem:[#allocation52_spill] sm:$0xff] %v9112_v54  ;;  %6702 = vmatpush3.bf16.msra.mxu0 %v6701_v19  ;;  %6790 = vmatpush3.bf16.msra.mxu1 %v6789_v21  ;;  %v3866_v17 = vmul.f32 %v3862_v39, %v8882_v36  ;;  %v4152_v37 = vmul.f32 %v4150_v49, %v8879_v57 }
 0x2fb   :  { %6704 = vmatprep.subr.bf16.mxu0 %v6703_v43  ;;  %6824 = vmatprep.subr.bf16.mxu1 %v6823_v53  ;;  %v4199_v62 = vmul.f32 %v4198_v47, %v8862_v9  ;;  %v4200_v23 = vmul.f32 %v4198_v47, %v8879_v57  ;;  %v6705_v25 = vpack.c.bf16 %v3816_v16, %v3815_v6  ;;  %v4285_v43 = vld [vmem:[#allocation4 + $0x3c0] sm:$0xff] }
 0x2fc   :  { %v6825_v0 = vpack.c.bf16 %v4140_v1, %v4139_v55  ;;  %4575 = vmatprep.mubr.f32.mxu0 %v4286_v30  ;;  %v9120_v19 = vpop.f32.mrb[54].mxu1  ;;  %v6707_v21 = vpack.c.bf16 %v3864_v33, %v3863_v22  ;;  %v6827_v54 = vpack.c.bf16 %v4188_v26, %v4187_v12  ;;  %v6709_v4 = vpack.c.bf16 %v3818_v32, %v3817_v48  ;;  %v4298_v55 = vld [vmem:[#allocation4 + $0x428] sm:$0xff]  ;;  %v4280_v33 = vld [vmem:[#allocation4 + $0x398] sm:$0xff] }
 0x2fd   :  { %4821 = vmatmul.mubr.f32.vlgmr.msra.gmra.mrb[64].mxu1 %v4267_v31  ;;  %v9124_v50 = vrot.slane %v8859_v11, %v9868_v60  ;;  %v9126_v53 = vpop.f32.mrb[55].mxu1  ;;  %v6711_v41 = vpack.c.bf16 %v3866_v17, %v3865_v61  ;;  %v3819_v6 = vmul.f32 %v9038_v5, %v8868_v27  ;;  %v3820_v16 = vmul.f32 %v9038_v5, %v8865_v63  ;;  %v4297_v61 = vld [vmem:[#allocation4 + $0x420] sm:$0xff] }
 0x2fe   :  { %6706 = vmatpush3.bf16.msra.mxu0 %v6705_v25  ;;  %6826 = vmatpush3.bf16.msra.mxu1 %v6825_v0  ;;  %v6829_v1 = vpack.c.bf16 %v4152_v37, %v4151_v13  ;;  %v6831_v12 = vpack.c.bf16 %v4200_v23, %v4199_v62  ;;  %v4153_v11 = vmul.f32 %v4150_v49, %v8885_v28 }
 0x2ff   :  { %6708 = vmatprep.subr.bf16.mxu0 %v6707_v21  ;;  %6828 = vmatprep.subr.bf16.mxu1 %v6827_v54  ;;  %v4154_v26 = vmul.f32 %v4150_v49, %v8882_v36  ;;  %v3867_v22 = vmul.f32 %v3862_v39, %v8868_v27  ;;  %v3868_v0 = vmul.f32 %v3862_v39, %v8865_v63 }
 0x300   :  { %v9138_v25 = vrot.slane %v9005_v38, %v9843_v35  ;;  %4576 = vmatmul.mubr.f32.gmra.mrb[114].mxu0 %v4285_v43  ;;  %v4201_v17 = vmul.f32 %v4198_v47, %v8885_v28  ;;  %v4202_v5 = vmul.f32 %v4198_v47, %v8882_v36  ;;  %v3831_v62 = vmul.f32 %v9124_v50, %v8862_v9  ;;  %v4264_v43 = vld [vmem:[#allocation4 + $0x318] sm:$0xff] }
 0x301   :  { %v3832_v37 = vmul.f32 %v9124_v50, %v8879_v57  ;;  %4580 = vmatprep.mubr.f32.mxu0 %v4298_v55  ;;  %v4155_v39 = vmul.f32 %v4150_v49, %v8868_v27  ;;  %v4156_v35 = vmul.f32 %v4150_v49, %v8865_v63  ;;  %v4203_v48 = vmul.f32 %v4198_v47, %v8868_v27 }
 0x302   :  { %6710 = vmatpush3.bf16.msra.mxu0 %v6709_v4  ;;  %6830 = vmatpush3.bf16.msra.mxu1 %v6829_v1  ;;  %v4204_v32 = vmul.f32 %v4198_v47, %v8865_v63  ;;  %v9152_v30 = vrot.slane %v9034_v20, %v9851_v40  ;;  %v6713_v54 = vpack.c.bf16 %v3820_v16, %v3819_v6  ;;  %v4279_v47 = vld [vmem:[#allocation4 + $0x390] sm:$0xff]  ;;  %v4292_v1 = vld [vmem:[#allocation4 + $0x3f8] sm:$0xff] }
 0x303   :  { %6712 = vmatprep.subr.bf16.mxu0 %v6711_v41  ;;  %6832 = vmatprep.subr.bf16.mxu1 %v6831_v12  ;;  %v6833_v31 = vpack.c.bf16 %v4154_v26, %v4153_v11  ;;  %v3879_v4 = vmul.f32 %v9138_v25, %v8862_v9  ;;  %v3880_v13 = vmul.f32 %v9138_v25, %v8879_v57 }
 0x304   :  { %4581 = vmatmul.mubr.f32.gmra.mrb[116].mxu0 %v4297_v61  ;;  %v6715_v49 = vpack.c.bf16 %v3868_v0, %v3867_v22  ;;  %v6835_v41 = vpack.c.bf16 %v4202_v5, %v4201_v17  ;;  %v6717_v23 = vpack.c.bf16 %v3832_v37, %v3831_v62  ;;  %v9160_v21 = vrot.slane %v9034_v20, %v9868_v60 }
 0x305   :  { %4825 = vmatprep.mubr.f32.mxu1 %v4280_v33  ;;  %v6837_v6 = vpack.c.bf16 %v4156_v35, %v4155_v39  ;;  %v3833_v16 = vmul.f32 %v9124_v50, %v8885_v28  ;;  %v3834_v55 = vmul.f32 %v9124_v50, %v8882_v36  ;;  %v6839_v12 = vpack.c.bf16 %v4204_v32, %v4203_v48  ;;  %v4291_v39 = vld [vmem:[#allocation4 + $0x3f0] sm:$0xff]  ;;  %v4304_v32 = vld [vmem:[#allocation4 + $0x458] sm:$0xff] }
 0x306   :  { %6714 = vmatpush3.bf16.msra.mxu0 %v6713_v54  ;;  %6834 = vmatpush3.bf16.msra.mxu1 %v6833_v31  ;;  %v4167_v11 = vmul.f32 %v9152_v30, %v8862_v9  ;;  %v4168_v26 = vmul.f32 %v9152_v30, %v8879_v57  ;;  %v6719_v22 = vpack.c.bf16 %v3880_v13, %v3879_v4 }
 0x307   :  { %6716 = vmatprep.subr.bf16.mxu0 %v6715_v49  ;;  %6836 = vmatprep.subr.bf16.mxu1 %v6835_v41  ;;  %v3881_v0 = vmul.f32 %v9138_v25, %v8885_v28  ;;  %v3882_v17 = vmul.f32 %v9138_v25, %v8882_v36  ;;  %v4215_v5 = vmul.f32 %v9160_v21, %v8862_v9 }
 0x308   :  { %4826 = vmatmul.mubr.f32.gmra.mrb[66].mxu1 %v4279_v47  ;;  %4650 = vmatprep.mubr.f32.mxu0 %v4264_v43  ;;  %v4216_v62 = vmul.f32 %v9160_v21, %v8879_v57  ;;  %v3835_v37 = vmul.f32 %v9124_v50, %v8868_v27  ;;  %v9182_v61 = vrot.slane %v9005_v38, %v9859_v7 }
 0x309   :  { %4830 = vmatprep.mubr.f32.mxu1 %v4292_v1  ;;  %v3836_v35 = vmul.f32 %v9124_v50, %v8865_v63  ;;  %v4169_v33 = vmul.f32 %v9152_v30, %v8885_v28  ;;  %v4170_v48 = vmul.f32 %v9152_v30, %v8882_v36  ;;  %v4217_v7 = vmul.f32 %v9160_v21, %v8885_v28 }
 0x30a   :  { %6718 = vmatpush3.bf16.msra.mxu0 %v6717_v23  ;;  %6838 = vmatpush3.bf16.msra.mxu1 %v6837_v6  ;;  %v4218_v54 = vmul.f32 %v9160_v21, %v8882_v36  ;;  %v6721_v31 = vpack.c.bf16 %v3834_v55, %v3833_v16  ;;  %v6841_v4 = vpack.c.bf16 %v4168_v26, %v4167_v11  ;;  %v4303_v23 = vld [vmem:[#allocation4 + $0x450] sm:$0xff]  ;;  %v4272_v16 = vld [vmem:[#allocation4 + $0x358] sm:$0xff] }
 0x30b   :  { %6720 = vmatprep.subr.bf16.mxu0 %v6719_v22  ;;  %6840 = vmatprep.subr.bf16.mxu1 %v6839_v12  ;;  %v6723_v13 = vpack.c.bf16 %v3882_v17, %v3881_v0  ;;  %v6843_v50 = vpack.c.bf16 %v4216_v62, %v4215_v5  ;;  %v3929_v49 = vmul.f32 %v9182_v61, %v8885_v28 }
 0x30c   :  { %4831 = vmatmul.mubr.f32.gmra.mrb[68].mxu1 %v4291_v39  ;;  %v3930_v41 = vmul.f32 %v9182_v61, %v8882_v36  ;;  %v6725_v47 = vpack.c.bf16 %v3836_v35, %v3835_v37  ;;  %v6845_v43 = vpack.c.bf16 %v4170_v48, %v4169_v33  ;;  %v3883_v6 = vmul.f32 %v9138_v25, %v8868_v27 }
 0x30d   :  { %4835 = vmatprep.mubr.f32.mxu1 %v4304_v32  ;;  %v6847_v55 = vpack.c.bf16 %v4218_v54, %v4217_v7  ;;  %v3884_v1 = vmul.f32 %v9138_v25, %v8865_v63  ;;  %v4171_v12 = vmul.f32 %v9152_v30, %v8868_v27  ;;  %v4172_v11 = vmul.f32 %v9152_v30, %v8865_v63 }
 0x30e   :  { %6722 = vmatpush3.bf16.msra.mxu0 %v6721_v31  ;;  %6842 = vmatpush3.bf16.msra.mxu1 %v6841_v4  ;;  %v3931_v26 = vmul.f32 %v9182_v61, %v8868_v27  ;;  %v3932_v22 = vmul.f32 %v9182_v61, %v8865_v63  ;;  %v3894_v0 = vrot.slane %v9005_v38, %v9845_v59  ;;  %v4263_v59 = vld [vmem:[#allocation4 + $0x310] sm:$0xff] }
 0x30f   :  { %6724 = vmatprep.subr.bf16.mxu0 %v6723_v13  ;;  %6844 = vmatprep.subr.bf16.mxu1 %v6843_v50  ;;  %v6727_v5 = vpack.c.bf16 %v3930_v41, %v3929_v49  ;;  %v4219_v25 = vmul.f32 %v9160_v21, %v8868_v27  ;;  %v4220_v62 = vmul.f32 %v9160_v21, %v8865_v63 }
 0x310   :  { %4836 = vmatmul.mubr.f32.gmra.mrb[70].mxu1 %v4303_v23  ;;  %v9212_v17 = vpop.f32.mrb[56].mxu1  ;;  %v9220_v30 = vrot.slane %v9005_v38, %v9861_v8  ;;  %v4183_v39 = vmul.f32 %v9066_v42, %v8862_v9  ;;  %v4184_v35 = vmul.f32 %v9066_v42, %v8879_v57  ;;  %v6729_v33 = vpack.c.bf16 %v3884_v1, %v3883_v6  ;;  %v4276_v42 = vld [vmem:[#allocation4 + $0x378] sm:$0xff]  ;;  %v4275_v23 = vld [vmem:[#allocation4 + $0x370] sm:$0xff] }
 0x311   :  { %4990 = vmatprep.mubr.f32.mxu1 %v4272_v16  ;;  %v9222_v37 = vpop.f32.mrb[57].mxu1  ;;  %v6849_v21 = vpack.c.bf16 %v4172_v11, %v4171_v12  ;;  %v6731_v48 = vpack.c.bf16 %v3932_v22, %v3931_v26  ;;  %v3895_v32 = vmul.f32 %v3894_v0, %v8862_v9  ;;  %v3896_v7 = vmul.f32 %v3894_v0, %v8879_v57  ;;  %v4288_v26 = vld [vmem:[#allocation4 + $0x3d8] sm:$0xff]  ;;  %v4271_v22 = vld [vmem:[#allocation4 + $0x350] sm:$0xff] }
 0x312   :  { %6726 = vmatpush3.bf16.msra.mxu0 %v6725_v47  ;;  %6846 = vmatpush3.bf16.msra.mxu1 %v6845_v43  ;;  %v6851_v31 = vpack.c.bf16 %v4220_v62, %v4219_v25  ;;  %v3943_v4 = vmul.f32 %v9220_v30, %v8862_v9  ;;  %v3944_v13 = vmul.f32 %v9220_v30, %v8879_v57 }
 0x313   :  { %6728 = vmatprep.subr.bf16.mxu0 %v6727_v5  ;;  %6848 = vmatprep.subr.bf16.mxu1 %v6847_v55  ;;  %v5641_v50 = vadd.f32 %v8894_v18, %v8887_v56  ;;  %v6853_v41 = vpack.c.bf16 %v4184_v35, %v4183_v39  ;;  %v3897_v47 = vmul.f32 %v3894_v0, %v8885_v28  ;;  %v4287_v5 = vld [vmem:[#allocation4 + $0x3d0] sm:$0xff] }
 0x314   :  { %v9230_v54 = vpop.f32.mrb[58].mxu1  ;;  %v3898_v43 = vmul.f32 %v3894_v0, %v8882_v36  ;;  %v5644_v16 = vadd.f32 %v8922_v3, %v8913_v10  ;;  %v6733_v55 = vpack.c.bf16 %v3896_v7, %v3895_v32  ;;  %v3945_v56 = vmul.f32 %v9220_v30, %v8885_v28  ;;  %v9871_v32 = vld [vmem:[#allocation55_spill] sm:$0xff] }
 0x315   :  { %4651 = vmatmul.mubr.f32.vlgmr.msra.gmra.mrb[118].mxu0 %v4263_v59  ;;  %v9238_v49 = vpop.f32.mrb[59].mxu1  ;;  %v3180_v6 = vadd.f32 %v5641_v50, %v8840_v45  ;;  %v3946_v18 = vmul.f32 %v9220_v30, %v8882_v36  ;;  %v5647_v1 = vadd.f32 %v8955_v44, %v8944_v52  ;;  %v6735_v11 = vpack.c.bf16 %v3944_v13, %v3943_v4  ;;  %v9872_v7 = vld [vmem:[#allocation59_spill] sm:$0xff]  ;;  %v9875_v4 = vld [vmem:[#allocation40_spill] sm:$0xff] }
 0x316   :  { %6730 = vmatpush3.bf16.msra.mxu0 %v6729_v33  ;;  %6850 = vmatpush3.bf16.msra.mxu1 %v6849_v21  ;;  %v3185_v45 = vadd.f32 %v5644_v16, %v8842_v29  ;;  %v5650_v10 = vadd.f32 %v8970_v51, %v8964_v58  ;;  %v3899_v25 = vmul.f32 %v3894_v0, %v8868_v27  ;;  %v9869_v33 = vld [vmem:[#allocation32_spill] sm:$0xff] }
 0x317   :  { %6732 = vmatprep.subr.bf16.mxu0 %v6731_v48  ;;  %6852 = vmatprep.subr.bf16.mxu1 %v6851_v31  ;;  %v9259_v52 = vrot.slane %v9005_v38, %v9851_v40  ;;  %v3190_v44 = vadd.f32 %v5647_v1, %v8844_v15  ;;  %v6737_v29 = vpack.c.bf16 %v3898_v43, %v3897_v47  ;;  %v9870_v21 = vld [vmem:[#allocation44_spill] sm:$0xff] }
 0x318   :  { %4655 = vmatprep.mubr.f32.mxu0 %v4276_v42  ;;  %v9251_v12 = vpop.f32.mrb[60].mxu1  ;;  %v3900_v62 = vmul.f32 %v3894_v0, %v8865_v63  ;;  %v3195_v58 = vadd.f32 %v5650_v10, %v8846_v14  ;;  %v6739_v51 = vpack.c.bf16 %v3946_v18, %v3945_v56  ;;  %v9267_v59 = vrot.slane %v9005_v38, %v9868_v60  ;;  %v4300_v0 = vld [vmem:[#allocation4 + $0x438] sm:$0xff]  ;;  %v9876_v13 = vld [vmem:[#allocation52_spill] sm:$0xff]  ;;  %v9878_v18 = vld [vmem:[#allocation93_spill] sm:$0xff] }
 0x319   :  { %4656 = vmatmul.mubr.f32.gmra.mrb[120].mxu0 %v4275_v23  ;;  %v5822_v3 = vpop.f32.mrb[61].mxu1  ;;  %v5729_v40 = vadd.f32 %v9068_v34, %v9056_v46  ;;  %v3265_v39 = vadd.f32 %v8848_v2, %v3180_v6  ;;  %v3947_v35 = vmul.f32 %v9220_v30, %v8868_v27  ;;  %v3948_v14 = vmul.f32 %v9220_v30, %v8865_v63  ;;  %v4299_v2 = vld [vmem:[#allocation4 + $0x430] sm:$0xff]  ;;  %v9874_v34 = vld [vmem:[#allocation23_spill] sm:$0xff]  ;;  %v4266_v56 = vld [vmem:[#allocation4 + $0x328] sm:$0xff] }
 0x31a   :  { %6734 = vmatpush3.bf16.msra.mxu0 %v6733_v55  ;;  %6854 = vmatpush3.bf16.msra.mxu1 %v6853_v41  ;;  %v5732_v48 = vadd.f32 %v9870_v21, %v9869_v33  ;;  %v9873_v46 = vpack.c.bf16 %v9871_v32, %v9872_v7  ;;  %v3270_v31 = vadd.f32 %v9874_v34, %v3185_v45  ;;  %v9877_v41 = vld [vmem:[#allocation26_spill] sm:$0xff]  ;;  %v9880_v45 = vld [vmem:[#allocation67_spill] sm:$0xff]  ;;  %v4283_v21 = vld [vmem:[#allocation4 + $0x3b0] sm:$0xff] }
 0x31b   :  { %6736 = vmatprep.subr.bf16.mxu0 %v6735_v11  ;;  %6855 = vmatprep.subr.bf16.mxu1 %v9713_v24  ;;  %v5735_v42 = vadd.f32 %v9876_v13, %v9875_v4  ;;  %v3911_v30 = vmul.f32 %v9259_v52, %v8862_v9  ;;  %v3912_v50 = vmul.f32 %v9259_v52, %v8879_v57  ;;  %v9886_v32 = vld [vmem:[#allocation71_spill] sm:$0xff] }
 0x31c   :  { %4660 = vmatprep.mubr.f32.mxu0 %v4288_v26  ;;  %v5824_v15 = vpop.f32.mrb[62].mxu1  ;;  %v3275_v23 = vadd.f32 %v9877_v41, %v3190_v44  ;;  %v6741_v47 = vpack.c.bf16 %v3900_v62, %v3899_v25  ;;  %v3959_v43 = vmul.f32 %v9267_v59, %v8862_v9  ;;  %v3960_v6 = vmul.f32 %v9267_v59, %v8879_v57  ;;  %v9879_v26 = vld [vmem:[#allocation63_spill] sm:$0xff]  ;;  %v9883_v25 = vld [vmem:[#allocation13_spill] sm:$0xff] }
 0x31d   :  { %4991 = vmatmul.mubr.f32.vlgmr.msra.gmra.mrb[72].mxu1 %v4271_v22  ;;  %4661 = vmatmul.mubr.f32.gmra.mrb[122].mxu0 %v4287_v5  ;;  %v5825_v38 = vpop.f32.mrb[63].mxu1  ;;  %v5738_v16 = vadd.f32 %v9126_v53, %v9120_v19  ;;  %v6743_v55 = vpack.c.bf16 %v3948_v14, %v3947_v35  ;;  %v3280_v1 = vadd.f32 %v9878_v18, %v3195_v58  ;;  %v9882_v5 = vld [vmem:[#allocation11_spill] sm:$0xff] }
 0x31e   :  { %6738 = vmatpush3.bf16.msra.mxu0 %v6737_v29  ;;  %6857 = vmatpush1.bf16.msra.mxu1 %v9873_v46  ;;  %v5817_v11 = vadd.f32 %v9222_v37, %v9212_v17  ;;  %v9881_v10 = vpack.c.bf16 %v9879_v26, %v9880_v45  ;;  %v3350_v22 = vadd.f32 %v5729_v40, %v3265_v39  ;;  %v4284_v29 = vld [vmem:[#allocation4 + $0x3b8] sm:$0xff]  ;;  %v9884_v14 = vld [vmem:[#allocation31_spill] sm:$0xff] }
 0x31f   :  { %6740 = vmatprep.subr.bf16.mxu0 %v6739_v51  ;;  %6858 = vmatprep.subr.bf16.mxu1 %v9713_v24  ;;  %v5773_v44 = vadd.f32 %v9883_v25, %v9882_v5  ;;  %v6745_v19 = vpack.c.bf16 %v3912_v50, %v3911_v30  ;;  %v3913_v53 = vmul.f32 %v9259_v52, %v8885_v28  ;;  %v9887_v7 = vld [vmem:[#allocation75_spill] sm:$0xff] }
 0x320   :  { %4665 = vmatprep.mubr.f32.mxu0 %v4300_v0  ;;  %v3914_v17 = vmul.f32 %v9259_v52, %v8882_v36  ;;  %v6747_v37 = vpack.c.bf16 %v3960_v6, %v3959_v43  ;;  %v3961_v62 = vmul.f32 %v9267_v59, %v8885_v28  ;;  %v5820_v51 = vadd.f32 %v9238_v49, %v9230_v54  ;;  %v9885_v0 = vld [vmem:[#allocation43_spill] sm:$0xff]  ;;  %v4296_v49 = vld [vmem:[#allocation4 + $0x418] sm:$0xff]  ;;  %v9892_v43 = vld [vmem:[#allocation56_spill] sm:$0xff] }
 0x321   :  { %4666 = vmatmul.mubr.f32.gmra.mrb[124].mxu0 %v4299_v2  ;;  %v3435_v58 = vadd.f32 %v5773_v44, %v3350_v22  ;;  %v3962_v40 = vmul.f32 %v9267_v59, %v8882_v36  ;;  %v5823_v39 = vadd.f32 %v5822_v3, %v9251_v12  ;;  %v3355_v35 = vadd.f32 %v5732_v48, %v3270_v31  ;;  %v9889_v4 = vld [vmem:[#allocation39_spill] sm:$0xff]  ;;  %v9893_v6 = vld [vmem:[#allocation60_spill] sm:$0xff] }
 0x322   :  { %6742 = vmatpush3.bf16.msra.mxu0 %v6741_v47  ;;  %6860 = vmatpush1.bf16.msra.mxu1 %v9881_v10  ;;  %v5776_v33 = vadd.f32 %v9885_v0, %v9884_v14  ;;  %v9888_v46 = vpack.c.bf16 %v9886_v32, %v9887_v7  ;;  %v3915_v2 = vmul.f32 %v9259_v52, %v8868_v27  ;;  %v9890_v13 = vld [vmem:[#allocation51_spill] sm:$0xff]  ;;  %v9896_v10 = vld [vmem:[#allocation17_spill] sm:$0xff]  ;;  %v9901_v0 = vld [vmem:[#allocation72_spill] sm:$0xff] }
 0x323   :  { %6744 = vmatprep.subr.bf16.mxu0 %v6743_v55  ;;  %6861 = vmatprep.subr.bf16.mxu1 %v9713_v24  ;;  %v5826_v54 = vadd.f32 %v5825_v38, %v5824_v15  ;;  %v3916_v12 = vmul.f32 %v9259_v52, %v8865_v63  ;;  %v9326_v48 = vadd.f32 %v5817_v11, %v3435_v58  ;;  %v9891_v41 = vld [vmem:[#allocation7_spill] sm:$0xff]  ;;  %v4295_v52 = vld [vmem:[#allocation4 + $0x410] sm:$0xff] }
 0x324   :  { %4735 = vmatprep.mubr.f32.mxu0 %v4266_v56  ;;  %4995 = vmatprep.mubr.f32.mxu1 %v4284_v29  ;;  %v3440_v3 = vadd.f32 %v5776_v33, %v3355_v35  ;;  %v6749_v34 = vpack.c.bf16 %v3914_v17, %v3913_v53  ;;  %v3360_v31 = vadd.f32 %v5735_v42, %v3275_v23  ;;  %v4308_v23 = vld [vmem:[#allocation4 + $0x478] sm:$0xff]  ;;  %v9895_v45 = vld [vmem:[#allocation47_spill] sm:$0xff]  ;;  %v4307_v29 = vld [vmem:[#allocation4 + $0x470] sm:$0xff] }
 0x325   :  { %4996 = vmatmul.mubr.f32.gmra.mrb[74].mxu1 %v4283_v21  ;;  %v5779_v30 = vadd.f32 %v9890_v13, %v9889_v4  ;;  %v6751_v50 = vpack.c.bf16 %v3962_v40, %v3961_v62  ;;  %v3963_v15 = vmul.f32 %v9267_v59, %v8868_v27  ;;  %v3964_v38 = vmul.f32 %v9267_v59, %v8865_v63  ;;  %v9898_v53 = vld [vmem:[#allocation68_spill] sm:$0xff]  ;;  %v9900_v62 = vld [vmem:[#allocation19_spill] sm:$0xff] }
 0x326   :  { %6746 = vmatpush3.bf16.msra.mxu0 %v6745_v19  ;;  %6863 = vmatpush1.bf16.msra.mxu1 %v9888_v46  ;;  %v4102_v47 = vrot.slane %v9034_v20, %v9891_v41  ;;  %v9894_v55 = vpack.c.bf16 %v9892_v43, %v9893_v6  ;;  %v6753_v56 = vpack.c.bf16 %v3916_v12, %v3915_v2  ;;  %v9897_v19 = vld [vmem:[#allocation64_spill] sm:$0xff]  ;;  %v4265_v32 = vld [vmem:[#allocation4 + $0x320] sm:$0xff] }
 0x327   :  { %6748 = vmatprep.subr.bf16.mxu0 %v6747_v37  ;;  %6864 = vmatprep.subr.bf16.mxu1 %v9713_v24  ;;  %v3445_v42 = vadd.f32 %v5779_v30, %v3360_v31  ;;  %v3927_v18 = vmul.f32 %v9182_v61, %v8862_v9  ;;  %v3928_v59 = vmul.f32 %v9182_v61, %v8879_v57  ;;  %v9902_v33 = vld [vmem:[#allocation76_spill] sm:$0xff]  ;;  %v9906_v30 = vld [vmem:[#allocation57_spill] sm:$0xff] }
 0x328   :  { %5000 = vmatprep.mubr.f32.mxu1 %v4296_v49  ;;  %v9344_v11 = vadd.f32 %v5820_v51, %v3440_v3  ;;  %v3365_v26 = vadd.f32 %v5738_v16, %v3280_v1  ;;  %v5782_v22 = vadd.f32 %v9896_v10, %v9895_v45  ;;  %v6755_v5 = vpack.c.bf16 %v3964_v38, %v3963_v15  ;;  %v5232_v16 = vld [vmem:[%s9513_s4 + $0x88] sm:$0xff]  ;;  %v9904_v49 = vld [vmem:[#allocation35_spill] sm:$0xff] }
 0x329   :  { %5001 = vmatmul.mubr.f32.gmra.mrb[76].mxu1 %v4295_v52  ;;  %v4103_v25 = vmul.f32 %v4102_v47, %v8862_v9  ;;  %v4104_v44 = vmul.f32 %v4102_v47, %v8879_v57  ;;  %v9899_v17 = vpack.c.bf16 %v9897_v19, %v9898_v53  ;;  %v9353_v37 = vadd.f32 %v5823_v39, %v3445_v42  ;;  %v4278_v46 = vld [vmem:[#allocation4 + $0x388] sm:$0xff]  ;;  %v4277_v38 = vld [vmem:[#allocation4 + $0x380] sm:$0xff]  ;;  %v9910_v42 = vld [vmem:[#allocation69_spill] sm:$0xff] }
 0x32a   :  { %6750 = vmatpush3.bf16.msra.mxu0 %v6749_v34  ;;  %6866 = vmatpush1.bf16.msra.mxu1 %v9894_v55  ;;  %v3450_v61 = vadd.f32 %v5782_v22, %v3365_v26  ;;  %v6757_v1 = vpack.c.bf16 %v3928_v59, %v3927_v18  ;;  %v4057_v58 = vmul.f32 %v9900_v62, %v8885_v28  ;;  %v9905_v4 = vld [vmem:[#allocation8_spill] sm:$0xff]  ;;  %v9909_v55 = vld [vmem:[#allocation65_spill] sm:$0xff]  ;;  %v4301_v19 = vld [vmem:[#allocation4 + $0x440] sm:$0xff] }
 0x32b   :  { %6752 = vmatprep.subr.bf16.mxu0 %v6751_v50  ;;  %6867 = vmatprep.subr.bf16.mxu1 %v9713_v24  ;;  %v4058_v51 = vmul.f32 %v9900_v62, %v8882_v36  ;;  %v6791_v35 = vpack.c.bf16 %v4104_v44, %v4103_v25  ;;  %v4105_v39 = vmul.f32 %v4102_v47, %v8885_v28  ;;  %v9907_v50 = vld [vmem:[#allocation61_spill] sm:$0xff]  ;;  %v4290_v41 = vld [vmem:[#allocation4 + $0x3e8] sm:$0xff] }
 0x32c   :  { %5005 = vmatprep.mubr.f32.mxu1 %v4308_v23  ;;  %v9363_v40 = vadd.f32 %v5826_v54, %v3450_v61  ;;  %v4106_v14 = vmul.f32 %v4102_v47, %v8882_v36  ;;  %v9903_v21 = vpack.c.bf16 %v9901_v0, %v9902_v33  ;;  %v4059_v2 = vmul.f32 %v9900_v62, %v8868_v27  ;;  %v4302_v59 = vld [vmem:[#allocation4 + $0x448] sm:$0xff]  ;;  %v9912_v25 = vld [vmem:[#allocation73_spill] sm:$0xff]  ;;  %v9915_v0 = vld [vmem:[#allocation58_spill] sm:$0xff] }
 0x32d   :  { %5006 = vmatmul.mubr.f32.gmra.mrb[78].mxu1 %v4307_v29  ;;  %v6793_v7 = vpack.c.bf16 %v4058_v51, %v4057_v58  ;;  %v4060_v54 = vmul.f32 %v9900_v62, %v8865_v63  ;;  %v4070_v12 = vrot.slane %v9904_v49, %v9861_v8  ;;  %v4107_v34 = vmul.f32 %v4102_v47, %v8868_v27  ;;  %v9913_v44 = vld [vmem:[#allocation77_spill] sm:$0xff]  ;;  %v9916_v33 = vld [vmem:[#allocation62_spill] sm:$0xff] }
 0x32e   :  { %6754 = vmatpush3.bf16.msra.mxu0 %v6753_v56  ;;  %6869 = vmatpush1.bf16.msra.mxu1 %v9899_v17  ;;  %v6795_v3 = vpack.c.bf16 %v4106_v14, %v4105_v39  ;;  %v4108_v31 = vmul.f32 %v4102_v47, %v8865_v63  ;;  %v4118_v13 = vrot.slane %v9034_v20, %v9905_v4  ;;  %v4289_v56 = vld [vmem:[#allocation4 + $0x3e0] sm:$0xff]  ;;  %v4270_v14 = vld [vmem:[#allocation4 + $0x348] sm:$0xff] }
 0x32f   :  { %6756 = vmatprep.subr.bf16.mxu0 %v6755_v5  ;;  %6870 = vmatprep.subr.bf16.mxu1 %v9713_v24  ;;  %v9908_v15 = vpack.c.bf16 %v9906_v30, %v9907_v50  ;;  %v6797_v8 = vpack.c.bf16 %v4060_v54, %v4059_v2  ;;  %v4071_v52 = vmul.f32 %v4070_v12, %v8862_v9 }
 0x330   :  { %5239 = vmatprep.mubr.msk.f32.mxu1 %vm2196_vm1, %v5232_v16  ;;  %v4072_v43 = vmul.f32 %v4070_v12, %v8879_v57  ;;  %v6799_v47 = vpack.c.bf16 %v4108_v31, %v4107_v34  ;;  %v4119_v20 = vmul.f32 %v4118_v13, %v8862_v9  ;;  %v4120_v6 = vmul.f32 %v4118_v13, %v8879_v57  ;;  %v9919_v34 = vld [vmem:[#allocation66_spill] sm:$0xff] }
 0x331   :  { %v9911_v23 = vpack.c.bf16 %v9909_v55, %v9910_v42  ;;  %v4073_v26 = vmul.f32 %v4070_v12, %v8885_v28  ;;  %v4074_v45 = vmul.f32 %v4070_v12, %v8882_v36  ;;  %v4121_v22 = vmul.f32 %v4118_v13, %v8885_v28  ;;  %v9920_v31 = vld [vmem:[#allocation70_spill] sm:$0xff] }
 0x332   :  { %6758 = vmatpush3.bf16.msra.mxu0 %v6757_v1  ;;  %6872 = vmatpush1.bf16.msra.mxu1 %v9903_v21  ;;  %v6801_v18 = vpack.c.bf16 %v4072_v43, %v4071_v52  ;;  %v6803_v10 = vpack.c.bf16 %v4120_v6, %v4119_v20  ;;  %v4122_v5 = vmul.f32 %v4118_v13, %v8882_v36  ;;  %v5231_v43 = vld [vmem:[%s9513_s4 + $0x80] sm:$0xff] }
 0x333   :  { %6792 = vmatprep.subr.bf16.mxu0 %v6791_v35  ;;  %6873 = vmatprep.subr.bf16.mxu1 %v9713_v24  ;;  %v9914_v29 = vpack.c.bf16 %v9912_v25, %v9913_v44  ;;  %v6805_v17 = vpack.c.bf16 %v4074_v45, %v4073_v26  ;;  %v4075_v61 = vmul.f32 %v4070_v12, %v8868_v27  ;;  %v4281_v26 = vld [vmem:[#allocation4 + $0x3a0] sm:$0xff]  ;;  %v5237_v45 = vld [vmem:[%s9513_s4 + $0xb0] sm:$0xff] }
 0x334   :  { %v4076_v16 = vmul.f32 %v4070_v12, %v8865_v63  ;;  %v4086_v1 = vrot.slane %v9904_v49, %v9868_v60  ;;  %v6807_v51 = vpack.c.bf16 %v4122_v5, %v4121_v22  ;;  %v4123_v35 = vmul.f32 %v4118_v13, %v8868_v27  ;;  %v9918_v49 = vld [vmem:[#allocation36_spill] sm:$0xff]  ;;  %v4293_v22 = vld [vmem:[#allocation4 + $0x400] sm:$0xff] }
 0x335   :  { %4736 = vmatmul.mubr.f32.vlgmr.msra.gmra.mrb[126].mxu0 %v4265_v32  ;;  %v4124_v39 = vmul.f32 %v4118_v13, %v8865_v63  ;;  %v9917_v21 = vpack.c.bf16 %v9915_v0, %v9916_v33  ;;  %v4135_v12 = vmul.f32 %v9918_v49, %v8862_v9  ;;  %v9921_v4 = vpack.c.bf16 %v9919_v34, %v9920_v31  ;;  %v4306_v5 = vld [vmem:[#allocation4 + $0x468] sm:$0xff]  ;;  %v4305_v25 = vld [vmem:[#allocation4 + $0x460] sm:$0xff] }
 0x336   :  { %6794 = vmatpush3.bf16.msra.mxu0 %v6793_v7  ;;  %6875 = vmatpush1.bf16.msra.mxu1 %v9908_v15  ;;  %v6809_v32 = vpack.c.bf16 %v4076_v16, %v4075_v61  ;;  %v4088_v7 = vmul.f32 %v4086_v1, %v8879_v57  ;;  %v4090_v50 = vmul.f32 %v4086_v1, %v8882_v36 }
 0x337   :  { %6796 = vmatprep.subr.bf16.mxu0 %v6795_v3  ;;  %4740 = vmatprep.mubr.f32.mxu0 %v4278_v46  ;;  %v6811_v54 = vpack.c.bf16 %v4124_v39, %v4123_v35  ;;  %v4136_v3 = vmul.f32 %v9918_v49, %v8879_v57  ;;  %v4137_v57 = vmul.f32 %v9918_v49, %v8885_v28 }
 0x338   :  { %6876 = vmatprep.subr.bf16.mxu1 %v9713_v24 }
 0x339   :  { %4741 = vmatmul.mubr.f32.gmra.mrb[128].mxu0 %v4277_v38  ;;  %v6815_v38 = vpack.c.bf16 %v4136_v3, %v4135_v12 }
 0x33a   :  { %6798 = vmatpush3.bf16.msra.mxu0 %v6797_v8  ;;  %6878 = vmatpush1.bf16.msra.mxu1 %v9911_v23  ;;  %v4138_v8 = vmul.f32 %v9918_v49, %v8882_v36  ;;  %v4092_v36 = vmul.f32 %v4086_v1, %v8865_v63  ;;  %v5233_v23 = vld [vmem:[%s9513_s4 + $0x90] sm:$0xff]  ;;  %v4269_v63 = vld [vmem:[#allocation4 + $0x340] sm:$0xff] }
 0x33b   :  { %6800 = vmatprep.subr.bf16.mxu0 %v6799_v47  ;;  %4745 = vmatprep.mubr.f32.mxu0 %v4290_v41  ;;  %v9922_v41 = vld [vmem:[#allocation74_spill] sm:$0xff] }
 0x33c   :  { %6879 = vmatprep.subr.bf16.mxu1 %v9713_v24  ;;  %v6819_v42 = vpack.c.bf16 %v4138_v8, %v4137_v57 }
 0x33d   :  { %4746 = vmatmul.mubr.f32.gmra.mrb[130].mxu0 %v4289_v56 }
 0x33e   :  { %6802 = vmatpush3.bf16.msra.mxu0 %v6801_v18  ;;  %6881 = vmatpush1.bf16.msra.mxu1 %v9914_v29  ;;  %v4282_v18 = vld [vmem:[#allocation4 + $0x3a8] sm:$0xff] }
 0x33f   :  { %6804 = vmatprep.subr.bf16.mxu0 %v6803_v10  ;;  %4750 = vmatprep.mubr.f32.mxu0 %v4302_v59  ;;  %v5238_v59 = vld [vmem:[%s9513_s4 + $0xb8] sm:$0xff]  ;;  %v4294_v10 = vld [vmem:[#allocation4 + $0x408] sm:$0xff] }
 0x340   :  { %v3616_v53 = vpop.f32.mrb[8].mxu1  ;;  %6882 = vmatprep.subr.bf16.mxu1 %v9713_v24 }
 0x341   :  { %v9407_v62 = vadd.f32 %v3616_v53, %v9326_v48  ;;  %v3618_v58 = vpop.f32.mrb[9].mxu1  ;;  %4751 = vmatmul.mubr.f32.gmra.mrb[132].mxu0 %v4301_v19  ;;  %v4087_v48 = vmul.f32 %v4086_v1, %v8862_v9 }
 0x342   :  { %6806 = vmatpush3.bf16.msra.mxu0 %v6805_v17  ;;  %6884 = vmatpush1.bf16.msra.mxu1 %v9917_v21 }
 0x343   :  { %6808 = vmatprep.subr.bf16.mxu0 %v6807_v51  ;;  %6885 = vmatprep.subr.bf16.mxu1 %v9713_v24  ;;  %v6813_v30 = vpack.c.bf16 %v4088_v7, %v4087_v48 }
 0x344   :  { %v3621_v60 = vpop.f32.mrb[10].mxu1  ;;  %4905 = vmatprep.mubr.f32.mxu0 %v4270_v14 }
 0x345   :  { %v9418_v46 = vadd.f32 %v3621_v60, %v9344_v11  ;;  %v3623_v2 = vpop.f32.mrb[11].mxu1  ;;  %v4089_v11 = vmul.f32 %v4086_v1, %v8885_v28  ;;  %v4091_v28 = vmul.f32 %v4086_v1, %v8868_v27  ;;  %v5236_v27 = vld [vmem:[%s9513_s4 + $0xa8] sm:$0xff] }
 0x346   :  { %6810 = vmatpush3.bf16.msra.mxu0 %v6809_v32  ;;  %6887 = vmatpush1.bf16.msra.mxu1 %v9921_v4 }
 0x347   :  { %6812 = vmatprep.subr.bf16.mxu0 %v6811_v54  ;;  %6888 = vmatprep.subr.bf16.mxu1 %v9713_v24  ;;  %v9923_v24 = vld [vmem:[#allocation78_spill] sm:$0xff]  ;;  %v6817_v20 = vpack.c.bf16 %v4090_v50, %v4089_v11  ;;  %v6821_v56 = vpack.c.bf16 %v4092_v36, %v4091_v28 }
 0x348   :  { %v3626_v13 = vpop.f32.mrb[12].mxu1  ;;  %v9924_v52 = vpack.c.bf16 %v9922_v41, %v9923_v24 }
 0x349   :  { %v9431_v15 = vadd.f32 %v3626_v13, %v9353_v37  ;;  %v3628_v9 = vpop.f32.mrb[13].mxu1  ;;  %v5234_v37 = vld [vmem:[%s9513_s4 + $0x98] sm:$0xff] }
 0x34a   :  { %6814 = vmatpush3.bf16.msra.mxu0 %v6813_v30  ;;  %6890 = vmatpush1.bf16.msra.mxu1 %v9924_v52 }
 0x34b   :  { %6816 = vmatprep.subr.bf16.mxu0 %v6815_v38 }
 0x34c   :  { %v3631_v47 = vpop.f32.mrb[14].mxu1 }
 0x34d   :  { %v9449_v6 = vadd.f32 %v3631_v47, %v9363_v40  ;;  %v3633_v55 = vpop.f32.mrb[15].mxu1  ;;  %5088 = vmatmul.mubr.f32.vlgmr.msra.gmra.mrb[16].mxu1 %v5231_v43  ;;  %v5235_v40 = vld [vmem:[%s9513_s4 + $0xa0] sm:$0xff] }
 0x34e   :  { %6818 = vmatpush3.bf16.msra.mxu0 %v6817_v20  ;;  %5240 = vmatprep.mubr.msk.f32.mxu1 %vm2196_vm1, %v5234_v37 }
 0x34f   :  { %6820 = vmatprep.subr.bf16.mxu0 %v6819_v42 }
 0x351   :  { %5093 = vmatmul.mubr.f32.gmra.mrb[18].mxu1 %v5233_v23 }
 0x352   :  { %6822 = vmatpush3.bf16.msra.mxu0 %v6821_v56  ;;  %5241 = vmatprep.mubr.msk.f32.mxu1 %vm2196_vm1, %v5236_v27 }
 0x355   :  { %4906 = vmatmul.mubr.f32.vlgmr.msra.gmra.mrb[134].mxu0 %v4269_v63  ;;  %5098 = vmatmul.mubr.f32.gmra.mrb[20].mxu1 %v5235_v40 }
 0x356   :  { %4910 = vmatprep.mubr.f32.mxu0 %v4282_v18  ;;  %5242 = vmatprep.mubr.msk.f32.mxu1 %vm2196_vm1, %v5238_v59 }
 0x359   :  { %4911 = vmatmul.mubr.f32.gmra.mrb[136].mxu0 %v4281_v26  ;;  %5103 = vmatmul.mubr.f32.gmra.mrb[22].mxu1 %v5237_v45 }
 0x35a   :  { %4915 = vmatprep.mubr.f32.mxu0 %v4294_v10 }
 0x35d   :  { %4916 = vmatmul.mubr.f32.gmra.mrb[138].mxu0 %v4293_v22 }
 0x35e   :  { %4920 = vmatprep.mubr.f32.mxu0 %v4306_v5 }
 0x361   :  { %4921 = vmatmul.mubr.f32.gmra.mrb[140].mxu0 %v4305_v25 }
 0x3c8   :  { %v5859_v44 = vpop.f32.mrb[110].mxu0 }
 0x3c9   :  { %v5860_v29 = vpop.f32.mrb[111].mxu0 }
 0x3ca   :  { %v5861_v19 = vadd.f32 %v5860_v29, %v5859_v44 }
 0x3cc   :  { %v5862_v53 = vpop.f32.mrb[112].mxu0 }
 0x3cd   :  { %v5863_v17 = vpop.f32.mrb[113].mxu0 }
 0x3ce   :  { %v5864_v61 = vadd.f32 %v5863_v17, %v5862_v53 }
 0x3d0   :  { %v5991_v16 = vpop.f32.mrb[64].mxu1 }
 0x3d1   :  { %v5992_v1 = vpop.f32.mrb[65].mxu1 }
 0x3d2   :  { %v5993_v58 = vadd.f32 %v5992_v1, %v5991_v16 }
 0x3d3   :  { %v5865_v51 = vpop.f32.mrb[114].mxu0 }
 0x3d4   :  { %v5866_v35 = vpop.f32.mrb[115].mxu0 }
 0x3d5   :  { %v5867_v39 = vadd.f32 %v5866_v35, %v5865_v51 }
 0x3d7   :  { %v5868_v14 = vpop.f32.mrb[116].mxu0 }
 0x3d8   :  { %v5869_v0 = vpop.f32.mrb[117].mxu0 }
 0x3d9   :  { %v5870_v33 = vadd.f32 %v5869_v0, %v5868_v14 }
 0x3db   :  { %v5994_v21 = vpop.f32.mrb[66].mxu1 }
 0x3dc   :  { %v5995_v60 = vpop.f32.mrb[67].mxu1 }
 0x3dd   :  { %v5996_v32 = vadd.f32 %v5995_v60, %v5994_v21 }
 0x3df   :  { %v5997_v48 = vpop.f32.mrb[68].mxu1 }
 0x3e0   :  { %v5998_v7 = vpop.f32.mrb[69].mxu1 }
 0x3e1   :  { %v5999_v2 = vadd.f32 %v5998_v7, %v5997_v48 }
 0x3e3   :  { %v6000_v54 = vpop.f32.mrb[70].mxu1 }
 0x3e4   :  { %v6001_v49 = vpop.f32.mrb[71].mxu1 }
 0x3e5   :  { %v6002_v12 = vadd.f32 %v6001_v49, %v6000_v54 }
 0x3e8   :  { %v5903_v3 = vpop.f32.mrb[118].mxu0 }
 0x3e9   :  { %v5904_v34 = vpop.f32.mrb[119].mxu0 }
 0x3ea   :  { %v5905_v31 = vadd.f32 %v5904_v34, %v5903_v3 }
 0x3ec   :  { %v4653_v4 = vadd.f32 %v5905_v31, %v5861_v19  ;;  %v5906_v13 = vpop.f32.mrb[120].mxu0 }
 0x3ed   :  { %v5907_v30 = vpop.f32.mrb[121].mxu0 }
 0x3ee   :  { %v5908_v11 = vadd.f32 %v5907_v30, %v5906_v13 }
 0x3f0   :  { %v4658_v50 = vadd.f32 %v5908_v11, %v5864_v61  ;;  %v5909_v9 = vpop.f32.mrb[122].mxu0  ;;  %v6079_v38 = vpop.f32.mrb[72].mxu1 }
 0x3f1   :  { %v5910_v57 = vpop.f32.mrb[123].mxu0  ;;  %v6080_v8 = vpop.f32.mrb[73].mxu1 }
 0x3f2   :  { %v5911_v41 = vadd.f32 %v5910_v57, %v5909_v9  ;;  %v9469_v24 = vadd.f32 %v6080_v8, %v6079_v38 }
 0x3f4   :  { %v4663_v52 = vadd.f32 %v5911_v41, %v5867_v39  ;;  %v5912_v43 = vpop.f32.mrb[124].mxu0  ;;  %v5227_v39 = vmul.f32 -1.442695, %v9407_v62 }
 0x3f5   :  { %v5913_v37 = vpop.f32.mrb[125].mxu0 }
 0x3f6   :  { %v5914_v47 = vadd.f32 %v5913_v37, %v5912_v43  ;;  %6947 = vpow2.f32 %v5227_v39  ;;  %v6977_v39 = vld [vmem:[%s9511_s2 + $0x10] sm:$0xff] }
 0x3f8   :  { %v4668_v20 = vadd.f32 %v5914_v47, %v5870_v33  ;;  %v6082_v28 = vpop.f32.mrb[74].mxu1  ;;  %v5228_v33 = vmul.f32 -1.442695, %v9418_v46 }
 0x3f9   :  { %v6083_v36 = vpop.f32.mrb[75].mxu1 }
 0x3fa   :  { %v9471_v55 = vadd.f32 %v6083_v36, %v6082_v28  ;;  %6949 = vpow2.f32 %v5228_v33 }
 0x3fc   :  { %v6085_v42 = vpop.f32.mrb[76].mxu1 }
 0x3fd   :  { %v6086_v23 = vpop.f32.mrb[77].mxu1 }
 0x3fe   :  { %v9473_v27 = vadd.f32 %v6086_v23, %v6085_v42 }
 0x400   :  { %v6088_v56 = vpop.f32.mrb[78].mxu1  ;;  %v6948_v7 = vpop.eup %6947 }
 0x401   :  { %v6089_v63 = vpop.f32.mrb[79].mxu1 }
 0x402   :  { %v9475_v40 = vadd.f32 %v6089_v63, %v6088_v56 }
 0x404   :  { %v6950_v3 = vpop.eup %6949 }
 0x405   :  { %v3652_v46 = vadd.f32 1.0, %v6950_v3 }
 0x408   :  { %v5947_v18 = vpop.f32.mrb[126].mxu0 }
 0x409   :  { %v5948_v59 = vpop.f32.mrb[127].mxu0 }
 0x40a   :  { %v5949_v26 = vadd.f32 %v5948_v59, %v5947_v18 }
 0x40c   :  { %v4738_v45 = vadd.f32 %v5949_v26, %v4653_v4  ;;  %v5950_v10 = vpop.f32.mrb[128].mxu0 }
 0x40d   :  { %v5951_v22 = vpop.f32.mrb[129].mxu0 }
 0x40e   :  { %v5952_v5 = vadd.f32 %v5951_v22, %v5950_v10  ;;  %v4823_v25 = vadd.f32 %v5993_v58, %v4738_v45  ;;  %v5229_v58 = vmul.f32 -1.442695, %v9431_v15 }
 0x410   :  { %v4743_v44 = vadd.f32 %v5952_v5, %v4658_v50  ;;  %v5953_v29 = vpop.f32.mrb[130].mxu0  ;;  %6951 = vpow2.f32 %v5229_v58  ;;  %v6975_v5 = vld [vmem:[%s9511_s2] sm:$0xff] }
 0x411   :  { %v5954_v19 = vpop.f32.mrb[131].mxu0 }
 0x412   :  { %v5955_v53 = vadd.f32 %v5954_v19, %v5953_v29  ;;  %v4828_v17 = vadd.f32 %v5996_v32, %v4743_v44  ;;  %v5230_v32 = vmul.f32 -1.442695, %v9449_v6 }
 0x414   :  { %v4748_v61 = vadd.f32 %v5955_v53, %v4663_v52  ;;  %v5956_v16 = vpop.f32.mrb[132].mxu0  ;;  %6953 = vpow2.f32 %v5230_v32 }
 0x415   :  { %v5957_v1 = vpop.f32.mrb[133].mxu0 }
 0x416   :  { %v5958_v51 = vadd.f32 %v5957_v1, %v5956_v16  ;;  %v4833_v35 = vadd.f32 %v5999_v2, %v4748_v61  ;;  %v3651_v2 = vadd.f32 1.0, %v6948_v7 }
 0x418   :  { %v4753_v14 = vadd.f32 %v5958_v51, %v4668_v20  ;;  %6955 = vrcp.f32 %v3651_v2 }
 0x419   :  { %6957 = vrcp.f32 %v3652_v46 }
 0x41a   :  { %v4838_v0 = vadd.f32 %v6002_v12, %v4753_v14  ;;  %v6952_v30 = vpop.eup %6951 }
 0x41b   :  { %v3653_v38 = vadd.f32 1.0, %v6952_v30 }
 0x41e   :  { %v6954_v52 = vpop.eup %6953 }
 0x41f   :  { %v3654_v20 = vadd.f32 1.0, %v6954_v52 }
 0x420   :  { %v5089_v21 = vpop.f32.mrb[16].mxu1 }
 0x421   :  { %v5091_v60 = vpop.f32.mrb[17].mxu1 }
 0x422   :  { %v6956_v56 = vpop.eup %6955  ;;  %v6978_v60 = vld [vmem:[%s9511_s2 + $0x18] sm:$0xff] }
 0x423   :  { %v5116_v26 = vsub.f32 1.0, %v6956_v56  ;;  %v6958_v45 = vpop.eup %6957 }
 0x424   :  { %v5094_v48 = vpop.f32.mrb[18].mxu1  ;;  %v5117_v44 = vsub.f32 1.0, %v6958_v45 }
 0x425   :  { %v5096_v54 = vpop.f32.mrb[19].mxu1 }
 0x428   :  { %v6035_v49 = vpop.f32.mrb[134].mxu0  ;;  %v5099_v62 = vpop.f32.mrb[20].mxu1 }
 0x429   :  { %v6036_v12 = vpop.f32.mrb[135].mxu0  ;;  %v5101_v34 = vpop.f32.mrb[21].mxu1 }
 0x42a   :  { %v6037_v31 = vadd.f32 %v6036_v12, %v6035_v49 }
 0x42c   :  { %v4908_v4 = vadd.f32 %v6037_v31, %v4823_v25  ;;  %v6038_v15 = vpop.f32.mrb[136].mxu0  ;;  %v5104_v13 = vpop.f32.mrb[22].mxu1  ;;  %v5120_v25 = vmul.f32 %v6975_v5, %v5116_v26 }
 0x42d   :  { %v6039_v11 = vpop.f32.mrb[137].mxu0  ;;  %v5106_v50 = vpop.f32.mrb[23].mxu1 }
 0x42e   :  { %v4993_v6 = vadd.f32 %v9469_v24, %v4908_v4  ;;  %v6040_v9 = vadd.f32 %v6039_v11, %v6038_v15 }
 0x430   :  { %v5090_v57 = vadd.f32 %v5089_v21, %v4993_v6  ;;  %v4913_v8 = vadd.f32 %v6040_v9, %v4828_v17  ;;  %v6041_v41 = vpop.f32.mrb[138].mxu0  ;;  %v6976_v17 = vld [vmem:[%s9511_s2 + $0x8] sm:$0xff] }
 0x431   :  { %v6042_v43 = vpop.f32.mrb[139].mxu0  ;;  %v5121_v61 = vmul.f32 %v6976_v17, %v5117_v44 }
 0x432   :  { %6959 = vtanh.f32 %v5090_v57  ;;  %v4998_v37 = vadd.f32 %v9471_v55, %v4913_v8  ;;  %v6043_v47 = vadd.f32 %v6042_v43, %v6041_v41 }
 0x433   :  { %6961 = vrcp.f32 %v3653_v38 }
 0x434   :  { %v5095_v28 = vadd.f32 %v5094_v48, %v4998_v37  ;;  %v4918_v36 = vadd.f32 %v6043_v47, %v4833_v35  ;;  %v6044_v42 = vpop.f32.mrb[140].mxu0 }
 0x435   :  { %v6045_v23 = vpop.f32.mrb[141].mxu0 }
 0x436   :  { %6963 = vtanh.f32 %v5095_v28  ;;  %v5003_v24 = vadd.f32 %v9473_v27, %v4918_v36  ;;  %v6046_v63 = vadd.f32 %v6045_v23, %v6044_v42 }
 0x437   :  { %6965 = vrcp.f32 %v3654_v20 }
 0x438   :  { %v5100_v18 = vadd.f32 %v5099_v62, %v5003_v24  ;;  %v4923_v59 = vadd.f32 %v6046_v63, %v4838_v0 }
 0x43a   :  { %6967 = vtanh.f32 %v5100_v18  ;;  %v5008_v55 = vadd.f32 %v9475_v40, %v4923_v59 }
 0x43c   :  { %v6960_v10 = vpop.eup %6959  ;;  %v5105_v22 = vadd.f32 %v5104_v13, %v5008_v55 }
 0x43d   :  { %v5124_v29 = vmul.f32 %v6960_v10, %v6956_v56  ;;  %v6962_v19 = vpop.eup %6961 }
 0x43e   :  { %6969 = vtanh.f32 %v5105_v22  ;;  %v5118_v16 = vsub.f32 1.0, %v6962_v19 }
 0x43f   :  { %v5128_v27 = vadd.f32 %v5124_v29, %v5120_v25 }
 0x440   :  { %v6964_v53 = vpop.eup %6963  ;;  %v5122_v14 = vmul.f32 %v6977_v39, %v5118_v16 }
 0x441   :  { %5132 = vst [vmem:[%s9516_s7] sm:$0xff] %v5128_v27  ;;  %v5125_v40 = vmul.f32 %v6964_v53, %v6958_v45  ;;  %v6966_v1 = vpop.eup %6965 }
 0x442   :  { %v5119_v0 = vsub.f32 1.0, %v6966_v1 }
 0x443   :  { %v5129_v51 = vadd.f32 %v5125_v40, %v5121_v61 }
 0x444   :  { %v6968_v35 = vpop.eup %6967  ;;  %v5123_v32 = vmul.f32 %v6978_v60, %v5119_v0 }
 0x445   :  { %5133 = vst [vmem:[%s9516_s7 + $0x8] sm:$0xff] %v5129_v51  ;;  %v5126_v33 = vmul.f32 %v6968_v35, %v6962_v19 }
 0x447   :  { %v5130_v58 = vadd.f32 %v5126_v33, %v5122_v14 }
 0x448   :  { %v6970_v21 = vpop.eup %6969 }
 0x449   :  { %5134 = vst [vmem:[%s9516_s7 + $0x10] sm:$0xff] %v5130_v58  ;;  %v5127_v48 = vmul.f32 %v6970_v21, %v6966_v1 }
 0x44b   :  { %v5131_v7 = vadd.f32 %v5127_v48, %v5123_v32 }
 0x44d   :  { %5135 = vst [vmem:[%s9516_s7 + $0x18] sm:$0xff] %v5131_v7 }
 0x44e   :  { %5140 = vsyncpa [#allocation5], 1 }

</bundles_post_ra>
